<compile_context>
chip_gen: v6e
topology: v6e:2x2x1
jax: 0.10.0
libtpu: 0.0.40
codegen_flags: <defaults>
</compile_context>

<pallas_src>
import numpy as np
import jax
import jax.numpy as jnp
from jax.experimental import pallas as pl
from jax.experimental.pallas import tpu as pltpu

NDF = 18
INPUT_NC = 4
EPS = 1e-5
LRELU_SLOPE = 0.1
K = 4           # kernel size of every conv / conv-transpose in the model
KK = K * K


def _round_up(x, m):
    return (x + m - 1) // m * m


# --------------------------------------------------------------------------
# Static geometry + selection-matrix construction (numpy, trace-time only)
# --------------------------------------------------------------------------
def _layer_geometry(n, h, w):
    # (cin, cout, stride, pad_lo, pad_hi, dilate)
    #  enc*: Conv2d(k=4, s=2, p=2)
    #  dec*: ConvTranspose2d(k=4, s=2, p=2, output_padding=1) expressed as a
    #        stride-1 conv over the stride-2-dilated input with asymmetric
    #        padding lo = k-1-p = 1, hi = lo + output_padding = 2 and a
    #        spatially flipped / in-out-transposed weight.
    specs = [
        (INPUT_NC, NDF,     2, 2, 2, 1),
        (NDF,      NDF * 2, 2, 2, 2, 1),
        (NDF * 2,  NDF * 4, 2, 2, 2, 1),
        (NDF * 4,  NDF * 2, 1, 1, 2, 2),
        (NDF * 2,  NDF,     1, 1, 2, 2),
    ]
    geom = []
    hi, wi = h, w
    mi_pad = _round_up(n * h * w, 16)
    for cin, cout, stride, plo, phi, dil in specs:
        hd = (hi - 1) * dil + 1
        wd = (wi - 1) * dil + 1
        ho = (hd + plo + phi - K) // stride + 1
        wo = (wd + plo + phi - K) // stride + 1
        m_real = n * ho * wo
        mo_pad = _round_up(m_real, 16)
        geom.append(dict(hi=hi, wi=wi, ho=ho, wo=wo, cin=cin, cout=cout,
                         stride=stride, pad_lo=plo, dilate=dil,
                         mi_pad=mi_pad, mo_pad=mo_pad, m_real=m_real))
        hi, wi, mi_pad = ho, wo, mo_pad
    return geom


def _build_selection(n, g):
    """0/1 gather tensor S [K*K, mo_pad, mi_pad].  S[t, o, i] = 1 iff flat
    input row i feeds kernel tap t at flat output position o.  Rows are
    all-zero for padding taps, dilation holes and M-padding positions; columns
    for M-padding rows of the input are never selected."""
    s = np.zeros((KK, g["mo_pad"], g["mi_pad"]), np.float32)
    hd = (g["hi"] - 1) * g["dilate"] + 1
    wd = (g["wi"] - 1) * g["dilate"] + 1
    for b in range(n):
        for oy in range(g["ho"]):
            for ox in range(g["wo"]):
                orow = b * g["ho"] * g["wo"] + oy * g["wo"] + ox
                for kh in range(K):
                    for kw in range(K):
                        dy = oy * g["stride"] + kh - g["pad_lo"]
                        dx = ox * g["stride"] + kw - g["pad_lo"]
                        if (0 <= dy < hd and 0 <= dx < wd
                                and dy % g["dilate"] == 0
                                and dx % g["dilate"] == 0):
                            irow = (b * g["hi"] * g["wi"]
                                    + (dy // g["dilate"]) * g["wi"]
                                    + (dx // g["dilate"]))
                            s[kh * K + kw, orow, irow] = 1.0
    return s


def _build_pool(n, g_last):
    """adaptive_avg_pool2d((1,1)) as an [N, mo_pad] matrix: 1/(Ho*Wo) on the
    real rows of each batch element, 0 on padding rows."""
    p = np.zeros((n, g_last["mo_pad"]), np.float32)
    hw = g_last["ho"] * g_last["wo"]
    for b in range(n):
        p[b, b * hw:(b + 1) * hw] = 1.0 / hw
    return p


# --------------------------------------------------------------------------
# Single fused Pallas kernel for the whole forward pass
# --------------------------------------------------------------------------
def make_forward(n, h, w):
    geom = _layer_geometry(n, h, w)
    sel = [jnp.asarray(_build_selection(n, g), jnp.bfloat16) for g in geom]
    pool = jnp.asarray(_build_pool(n, geom[-1]), jnp.float32)
    mo_pads = [g["mo_pad"] for g in geom]
    m_reals = [g["m_real"] for g in geom]
    couts = [g["cout"] for g in geom]
    mi_pad0 = geom[0]["mi_pad"]

    def kernel(*refs):
        # refs: x, s1..s5, w1..w5, (g1,b1)..(g5,b5), pool, fin_w, fin_b, out
        x_ref = refs[0]
        s_refs = refs[1:6]
        w_refs = refs[6:11]
        gb_refs = refs[11:21]
        pool_ref, wfin_ref, bfin_ref = refs[21:24]
        out_ref = refs[24]

        def conv_bn_lrelu(x_bf, s_ref, w_ref, g_ref, b_ref,
                          mo_pad, m_real, cout):
            # One gather matmul + one weight matmul per kernel tap; all MXU.
            def tap(t, acc):
                cols = jnp.dot(s_ref[t], x_bf,
                               preferred_element_type=jnp.float32)
                cols = cols.astype(jnp.bfloat16)      # lossless: pure gather
                return acc + jnp.dot(cols, w_ref[t],
                                     preferred_element_type=jnp.float32)

            acc = jax.lax.fori_loop(
                0, KK, tap, jnp.zeros((mo_pad, cout), jnp.float32))

            # Training-mode BatchNorm with batch statistics.  Padded rows of
            # acc are exactly zero (all-zero selection rows, no conv bias), so
            # sums over all rows equal sums over the m_real real rows.
            inv_m = 1.0 / m_real
            mean = jnp.sum(acc, axis=0, keepdims=True) * inv_m
            var = jnp.sum(acc * acc, axis=0, keepdims=True) * inv_m - mean * mean
            var = jnp.maximum(var, 0.0)
            z = g_ref[...] * ((acc - mean) * jax.lax.rsqrt(var + EPS)) + b_ref[...]
            return jnp.where(z > 0, z, LRELU_SLOPE * z)   # LeakyReLU(0.1), f32

        act = x_ref[...]                    # bf16 [mi_pad0, INPUT_NC]
        e1 = None
        y = None
        for i in range(5):
            y = conv_bn_lrelu(act, s_refs[i], w_refs[i],
                              gb_refs[2 * i], gb_refs[2 * i + 1],
                              mo_pads[i], m_reals[i], couts[i])
            if i == 0:
                e1 = y
            act = y.astype(jnp.bfloat16)

        # Head: residual add + global average pool + Linear(18 -> 2), f32.
        summed = y + e1                                          # [Mo, NDF]
        pooled = jnp.dot(pool_ref[...], summed,
                         preferred_element_type=jnp.float32)     # [N, NDF]
        out_ref[...] = (jnp.dot(pooled, wfin_ref[...],
                                preferred_element_type=jnp.float32)
                        + bfin_ref[...])

    @jax.jit
    def forward(x_nchw, params):
        nb, c, hh, ww = x_nchw.shape
        # The only XLA glue: NCHW -> flat [N*H*W, C] once at the boundary.
        x2d = jnp.transpose(x_nchw, (0, 2, 3, 1)).reshape(nb * hh * ww, c)
        x2d = x2d.astype(jnp.bfloat16)
        if mi_pad0 != nb * hh * ww:
            x2d = jnp.pad(x2d, ((0, mi_pad0 - nb * hh * ww), (0, 0)))
        args = [x2d] + list(sel)
        args += [params["w%d" % i].astype(jnp.bfloat16) for i in range(1, 6)]
        for i in range(1, 6):
            args += [params["g%d" % i], params["b%d" % i]]
        args += [pool, params["fin_w"], params["fin_b"]]
        vmem = pl.BlockSpec(memory_space=pltpu.MemorySpace.VMEM)
        return pl.pallas_call(
            kernel,
            out_shape=jax.ShapeDtypeStruct((nb, 2), jnp.float32),
            in_specs=[vmem] * len(args),
            out_specs=vmem,
            compiler_params=pltpu.CompilerParams(
                vmem_limit_bytes=32 * 1024 * 1024),
        )(*args)

    return forward


# --------------------------------------------------------------------------
# Parameters (deterministic, in-script).  Conv/ConvTranspose biases are
# intentionally omitted: a per-channel bias added before training-mode
# BatchNorm is exactly cancelled by the batch-mean subtraction, so the forward
# output is identical without it.
# --------------------------------------------------------------------------
def init_params(key):
    ks = jax.random.split(key, 12)

    def conv_w(k, cin, cout):
        # nn.Conv2d weight generated in HWIO, stored tap-major [K*K, Cin, Cout]
        w = 0.1 * jax.random.normal(k, (K, K, cin, cout), jnp.float32)
        return w.reshape(KK, cin, cout)

    def convT_w(k, cin, cout):
        # nn.ConvTranspose2d weight [Cin, Cout, K, K] -> equivalent forward
        # conv weight (spatial flip + in/out transpose), tap-major.
        wt = 0.1 * jax.random.normal(k, (cin, cout, K, K), jnp.float32)
        w_hwio = jnp.transpose(wt[:, :, ::-1, ::-1], (2, 3, 0, 1))
        return w_hwio.reshape(KK, cin, cout)

    def bn(k, c):
        g = 1.0 + 0.1 * jax.random.normal(k, (1, c), jnp.float32)
        b = 0.1 * jax.random.normal(jax.random.fold_in(k, 1), (1, c), jnp.float32)
        return g, b

    p = {}
    p["w1"] = conv_w(ks[0], INPUT_NC, NDF)
    p["g1"], p["b1"] = bn(ks[1], NDF)
    p["w2"] = conv_w(ks[2], NDF, NDF * 2)
    p["g2"], p["b2"] = bn(ks[3], NDF * 2)
    p["w3"] = conv_w(ks[4], NDF * 2, NDF * 4)
    p["g3"], p["b3"] = bn(ks[5], NDF * 4)
    p["w4"] = convT_w(ks[6], NDF * 4, NDF * 2)
    p["g4"], p["b4"] = bn(ks[7], NDF * 2)
    p["w5"] = convT_w(ks[8], NDF * 2, NDF)
    p["g5"], p["b5"] = bn(ks[9], NDF)
    p["fin_w"] = 0.1 * jax.random.normal(ks[10], (NDF, 2), jnp.float32)
    p["fin_b"] = jnp.zeros((1, 2), jnp.float32)
    # TODO(synk): BatchNorm running-mean/var buffer updates (training-time side
    # effect only) are not modeled; forward uses batch statistics as in
    # training-mode PyTorch.
    return p


if __name__ == "__main__":
    key = jax.random.PRNGKey(0)
    k_x, k_p = jax.random.split(key)
    N, H, W = 2, 16, 16
    x = jax.random.normal(k_x, (N, INPUT_NC, H, W), jnp.float32)  # NCHW
    params = init_params(k_p)

    forward = make_forward(N, H, W)
    out = forward(x, params)
    out = jax.block_until_ready(out)
    assert out.shape == (N, 2), out.shape
    assert bool(jnp.all(jnp.isfinite(out)))
    print("KERNEL_OK")
</pallas_src>

<mosaic_0001>
module attributes {stable_mosaic.version = 11 : i64} {
  func.func @kernel(%arg0: memref<512x4xbf16, #tpu.memory_space<vmem>>, %arg1: memref<16x176x512xbf16, #tpu.memory_space<vmem>>, %arg2: memref<16x64x176xbf16, #tpu.memory_space<vmem>>, %arg3: memref<16x32x64xbf16, #tpu.memory_space<vmem>>, %arg4: memref<16x64x32xbf16, #tpu.memory_space<vmem>>, %arg5: memref<16x176x64xbf16, #tpu.memory_space<vmem>>, %arg6: memref<16x4x18xbf16, #tpu.memory_space<vmem>>, %arg7: memref<16x18x36xbf16, #tpu.memory_space<vmem>>, %arg8: memref<16x36x72xbf16, #tpu.memory_space<vmem>>, %arg9: memref<16x72x36xbf16, #tpu.memory_space<vmem>>, %arg10: memref<16x36x18xbf16, #tpu.memory_space<vmem>>, %arg11: memref<1x18xf32, #tpu.memory_space<vmem>>, %arg12: memref<1x18xf32, #tpu.memory_space<vmem>>, %arg13: memref<1x36xf32, #tpu.memory_space<vmem>>, %arg14: memref<1x36xf32, #tpu.memory_space<vmem>>, %arg15: memref<1x72xf32, #tpu.memory_space<vmem>>, %arg16: memref<1x72xf32, #tpu.memory_space<vmem>>, %arg17: memref<1x36xf32, #tpu.memory_space<vmem>>, %arg18: memref<1x36xf32, #tpu.memory_space<vmem>>, %arg19: memref<1x18xf32, #tpu.memory_space<vmem>>, %arg20: memref<1x18xf32, #tpu.memory_space<vmem>>, %arg21: memref<2x176xf32, #tpu.memory_space<vmem>>, %arg22: memref<18x2xf32, #tpu.memory_space<vmem>>, %arg23: memref<1x2xf32, #tpu.memory_space<vmem>>, %arg24: memref<2x2xf32, #tpu.memory_space<vmem>>) attributes {dimension_semantics = [], scalar_prefetch = 0 : i64, scratch_operands = 0 : i64, tpu.core_type = #tpu.core_type<tc>} {
    %c0 = arith.constant 0 : index
    %c0_0 = arith.constant 0 : index
    %0 = vector.load %arg0[%c0, %c0_0] : memref<512x4xbf16, #tpu.memory_space<vmem>>, vector<512x4xbf16>
    %cst = arith.constant 0.000000e+00 : f32
    %1 = vector.broadcast %cst : f32 to vector<176x18xf32>
    %c0_i32 = arith.constant 0 : i32
    %c16_i32 = arith.constant 16 : i32
    %2 = arith.addi %c0_i32, %c16_i32 : i32
    %c1_i32 = arith.constant 1 : i32
    %3 = scf.for %arg25 = %c0_i32 to %2 step %c1_i32 iter_args(%arg26 = %1) -> (vector<176x18xf32>)  : i32 {
      %184 = arith.index_cast %arg25 : i32 to index
      %c0_92 = arith.constant 0 : index
      %c0_93 = arith.constant 0 : index
      %185 = vector.load %arg1[%184, %c0_92, %c0_93] : memref<16x176x512xbf16, #tpu.memory_space<vmem>>, vector<1x176x512xbf16>
      %186 = vector.shape_cast %185 : vector<1x176x512xbf16> to vector<176x512xbf16>
      %cst_94 = arith.constant dense<0.000000e+00> : vector<176x4xf32>
      %187 = tpu.matmul %186, %0, %cst_94 {dimension_numbers = #tpu.dot_dimension_numbers<[1], [0], [0], [1], [0, 0, 1, 1], [], []>} : vector<176x512xbf16>, vector<512x4xbf16>, vector<176x4xf32> -> vector<176x4xf32>
      %188 = arith.truncf %187 : vector<176x4xf32> to vector<176x4xbf16>
      %189 = arith.index_cast %arg25 : i32 to index
      %c0_95 = arith.constant 0 : index
      %c0_96 = arith.constant 0 : index
      %190 = vector.load %arg6[%189, %c0_95, %c0_96] : memref<16x4x18xbf16, #tpu.memory_space<vmem>>, vector<1x4x18xbf16>
      %191 = vector.shape_cast %190 : vector<1x4x18xbf16> to vector<4x18xbf16>
      %cst_97 = arith.constant dense<0.000000e+00> : vector<176x18xf32>
      %192 = tpu.matmul %188, %191, %cst_97 {dimension_numbers = #tpu.dot_dimension_numbers<[1], [0], [0], [1], [0, 0, 1, 1], [], []>} : vector<176x4xbf16>, vector<4x18xbf16>, vector<176x18xf32> -> vector<176x18xf32>
      %193 = arith.addf %arg26, %192 : vector<176x18xf32>
      scf.yield %193 : vector<176x18xf32>
    }
    %c16_i32_1 = arith.constant 16 : i32
    %cst_2 = arith.constant dense<0.000000e+00> : vector<18xf32>
    %4 = vector.multi_reduction <add>, %3, %cst_2 [0] : vector<176x18xf32> to vector<18xf32>
    %5 = vector.shape_cast %4 : vector<18xf32> to vector<1x18xf32>
    %cst_3 = arith.constant 0.00617283955 : f32
    %6 = vector.broadcast %cst_3 : f32 to vector<1x18xf32>
    %7 = arith.mulf %5, %6 : vector<1x18xf32>
    %8 = arith.mulf %3, %3 : vector<176x18xf32>
    %cst_4 = arith.constant dense<0.000000e+00> : vector<18xf32>
    %9 = vector.multi_reduction <add>, %8, %cst_4 [0] : vector<176x18xf32> to vector<18xf32>
    %10 = vector.shape_cast %9 : vector<18xf32> to vector<1x18xf32>
    %cst_5 = arith.constant 0.00617283955 : f32
    %11 = vector.broadcast %cst_5 : f32 to vector<1x18xf32>
    %12 = arith.mulf %10, %11 : vector<1x18xf32>
    %13 = arith.mulf %7, %7 : vector<1x18xf32>
    %14 = arith.subf %12, %13 : vector<1x18xf32>
    %cst_6 = arith.constant 0.000000e+00 : f32
    %15 = vector.broadcast %cst_6 : f32 to vector<1x18xf32>
    %16 = arith.maximumf %14, %15 : vector<1x18xf32>
    %c0_7 = arith.constant 0 : index
    %c0_8 = arith.constant 0 : index
    %17 = vector.load %arg11[%c0_7, %c0_8] : memref<1x18xf32, #tpu.memory_space<vmem>>, vector<1x18xf32>
    %18 = vector.broadcast %7 : vector<1x18xf32> to vector<176x18xf32>
    %19 = arith.subf %3, %18 : vector<176x18xf32>
    %cst_9 = arith.constant 9.99999974E-6 : f32
    %20 = vector.broadcast %cst_9 : f32 to vector<1x18xf32>
    %21 = arith.addf %16, %20 : vector<1x18xf32>
    %22 = math.rsqrt %21 : vector<1x18xf32>
    %23 = vector.broadcast %22 : vector<1x18xf32> to vector<176x18xf32>
    %24 = arith.mulf %19, %23 : vector<176x18xf32>
    %25 = vector.broadcast %17 : vector<1x18xf32> to vector<176x18xf32>
    %26 = arith.mulf %25, %24 : vector<176x18xf32>
    %c0_10 = arith.constant 0 : index
    %c0_11 = arith.constant 0 : index
    %27 = vector.load %arg12[%c0_10, %c0_11] : memref<1x18xf32, #tpu.memory_space<vmem>>, vector<1x18xf32>
    %28 = vector.broadcast %27 : vector<1x18xf32> to vector<176x18xf32>
    %29 = arith.addf %26, %28 : vector<176x18xf32>
    %cst_12 = arith.constant 0.000000e+00 : f32
    %30 = vector.broadcast %cst_12 : f32 to vector<176x18xf32>
    %31 = arith.cmpf ogt, %29, %30 : vector<176x18xf32>
    %cst_13 = arith.constant 1.000000e-01 : f32
    %32 = vector.broadcast %cst_13 : f32 to vector<176x18xf32>
    %33 = arith.mulf %32, %29 : vector<176x18xf32>
    %34 = arith.select %31, %29, %33 : vector<176x18xi1>, vector<176x18xf32>
    %35 = arith.truncf %34 : vector<176x18xf32> to vector<176x18xbf16>
    %cst_14 = arith.constant 0.000000e+00 : f32
    %36 = vector.broadcast %cst_14 : f32 to vector<64x36xf32>
    %c0_i32_15 = arith.constant 0 : i32
    %c16_i32_16 = arith.constant 16 : i32
    %37 = arith.addi %c0_i32_15, %c16_i32_16 : i32
    %c1_i32_17 = arith.constant 1 : i32
    %38 = scf.for %arg25 = %c0_i32_15 to %37 step %c1_i32_17 iter_args(%arg26 = %36) -> (vector<64x36xf32>)  : i32 {
      %184 = arith.index_cast %arg25 : i32 to index
      %c0_92 = arith.constant 0 : index
      %c0_93 = arith.constant 0 : index
      %185 = vector.load %arg2[%184, %c0_92, %c0_93] : memref<16x64x176xbf16, #tpu.memory_space<vmem>>, vector<1x64x176xbf16>
      %186 = vector.shape_cast %185 : vector<1x64x176xbf16> to vector<64x176xbf16>
      %cst_94 = arith.constant dense<0.000000e+00> : vector<64x18xf32>
      %187 = tpu.matmul %186, %35, %cst_94 {dimension_numbers = #tpu.dot_dimension_numbers<[1], [0], [0], [1], [0, 0, 1, 1], [], []>} : vector<64x176xbf16>, vector<176x18xbf16>, vector<64x18xf32> -> vector<64x18xf32>
      %188 = arith.truncf %187 : vector<64x18xf32> to vector<64x18xbf16>
      %189 = arith.index_cast %arg25 : i32 to index
      %c0_95 = arith.constant 0 : index
      %c0_96 = arith.constant 0 : index
      %190 = vector.load %arg7[%189, %c0_95, %c0_96] : memref<16x18x36xbf16, #tpu.memory_space<vmem>>, vector<1x18x36xbf16>
      %191 = vector.shape_cast %190 : vector<1x18x36xbf16> to vector<18x36xbf16>
      %cst_97 = arith.constant dense<0.000000e+00> : vector<64x36xf32>
      %192 = tpu.matmul %188, %191, %cst_97 {dimension_numbers = #tpu.dot_dimension_numbers<[1], [0], [0], [1], [0, 0, 1, 1], [], []>} : vector<64x18xbf16>, vector<18x36xbf16>, vector<64x36xf32> -> vector<64x36xf32>
      %193 = arith.addf %arg26, %192 : vector<64x36xf32>
      scf.yield %193 : vector<64x36xf32>
    }
    %c16_i32_18 = arith.constant 16 : i32
    %cst_19 = arith.constant dense<0.000000e+00> : vector<36xf32>
    %39 = vector.multi_reduction <add>, %38, %cst_19 [0] : vector<64x36xf32> to vector<36xf32>
    %40 = vector.shape_cast %39 : vector<36xf32> to vector<1x36xf32>
    %cst_20 = arith.constant 2.000000e-02 : f32
    %41 = vector.broadcast %cst_20 : f32 to vector<1x36xf32>
    %42 = arith.mulf %40, %41 : vector<1x36xf32>
    %43 = arith.mulf %38, %38 : vector<64x36xf32>
    %cst_21 = arith.constant dense<0.000000e+00> : vector<36xf32>
    %44 = vector.multi_reduction <add>, %43, %cst_21 [0] : vector<64x36xf32> to vector<36xf32>
    %45 = vector.shape_cast %44 : vector<36xf32> to vector<1x36xf32>
    %cst_22 = arith.constant 2.000000e-02 : f32
    %46 = vector.broadcast %cst_22 : f32 to vector<1x36xf32>
    %47 = arith.mulf %45, %46 : vector<1x36xf32>
    %48 = arith.mulf %42, %42 : vector<1x36xf32>
    %49 = arith.subf %47, %48 : vector<1x36xf32>
    %cst_23 = arith.constant 0.000000e+00 : f32
    %50 = vector.broadcast %cst_23 : f32 to vector<1x36xf32>
    %51 = arith.maximumf %49, %50 : vector<1x36xf32>
    %c0_24 = arith.constant 0 : index
    %c0_25 = arith.constant 0 : index
    %52 = vector.load %arg13[%c0_24, %c0_25] : memref<1x36xf32, #tpu.memory_space<vmem>>, vector<1x36xf32>
    %53 = vector.broadcast %42 : vector<1x36xf32> to vector<64x36xf32>
    %54 = arith.subf %38, %53 : vector<64x36xf32>
    %cst_26 = arith.constant 9.99999974E-6 : f32
    %55 = vector.broadcast %cst_26 : f32 to vector<1x36xf32>
    %56 = arith.addf %51, %55 : vector<1x36xf32>
    %57 = math.rsqrt %56 : vector<1x36xf32>
    %58 = vector.broadcast %57 : vector<1x36xf32> to vector<64x36xf32>
    %59 = arith.mulf %54, %58 : vector<64x36xf32>
    %60 = vector.broadcast %52 : vector<1x36xf32> to vector<64x36xf32>
    %61 = arith.mulf %60, %59 : vector<64x36xf32>
    %c0_27 = arith.constant 0 : index
    %c0_28 = arith.constant 0 : index
    %62 = vector.load %arg14[%c0_27, %c0_28] : memref<1x36xf32, #tpu.memory_space<vmem>>, vector<1x36xf32>
    %63 = vector.broadcast %62 : vector<1x36xf32> to vector<64x36xf32>
    %64 = arith.addf %61, %63 : vector<64x36xf32>
    %cst_29 = arith.constant 0.000000e+00 : f32
    %65 = vector.broadcast %cst_29 : f32 to vector<64x36xf32>
    %66 = arith.cmpf ogt, %64, %65 : vector<64x36xf32>
    %cst_30 = arith.constant 1.000000e-01 : f32
    %67 = vector.broadcast %cst_30 : f32 to vector<64x36xf32>
    %68 = arith.mulf %67, %64 : vector<64x36xf32>
    %69 = arith.select %66, %64, %68 : vector<64x36xi1>, vector<64x36xf32>
    %70 = arith.truncf %69 : vector<64x36xf32> to vector<64x36xbf16>
    %cst_31 = arith.constant 0.000000e+00 : f32
    %71 = vector.broadcast %cst_31 : f32 to vector<32x72xf32>
    %c0_i32_32 = arith.constant 0 : i32
    %c16_i32_33 = arith.constant 16 : i32
    %72 = arith.addi %c0_i32_32, %c16_i32_33 : i32
    %c1_i32_34 = arith.constant 1 : i32
    %73 = scf.for %arg25 = %c0_i32_32 to %72 step %c1_i32_34 iter_args(%arg26 = %71) -> (vector<32x72xf32>)  : i32 {
      %184 = arith.index_cast %arg25 : i32 to index
      %c0_92 = arith.constant 0 : index
      %c0_93 = arith.constant 0 : index
      %185 = vector.load %arg3[%184, %c0_92, %c0_93] : memref<16x32x64xbf16, #tpu.memory_space<vmem>>, vector<1x32x64xbf16>
      %186 = vector.shape_cast %185 : vector<1x32x64xbf16> to vector<32x64xbf16>
      %cst_94 = arith.constant dense<0.000000e+00> : vector<32x36xf32>
      %187 = tpu.matmul %186, %70, %cst_94 {dimension_numbers = #tpu.dot_dimension_numbers<[1], [0], [0], [1], [0, 0, 1, 1], [], []>} : vector<32x64xbf16>, vector<64x36xbf16>, vector<32x36xf32> -> vector<32x36xf32>
      %188 = arith.truncf %187 : vector<32x36xf32> to vector<32x36xbf16>
      %189 = arith.index_cast %arg25 : i32 to index
      %c0_95 = arith.constant 0 : index
      %c0_96 = arith.constant 0 : index
      %190 = vector.load %arg8[%189, %c0_95, %c0_96] : memref<16x36x72xbf16, #tpu.memory_space<vmem>>, vector<1x36x72xbf16>
      %191 = vector.shape_cast %190 : vector<1x36x72xbf16> to vector<36x72xbf16>
      %cst_97 = arith.constant dense<0.000000e+00> : vector<32x72xf32>
      %192 = tpu.matmul %188, %191, %cst_97 {dimension_numbers = #tpu.dot_dimension_numbers<[1], [0], [0], [1], [0, 0, 1, 1], [], []>} : vector<32x36xbf16>, vector<36x72xbf16>, vector<32x72xf32> -> vector<32x72xf32>
      %193 = arith.addf %arg26, %192 : vector<32x72xf32>
      scf.yield %193 : vector<32x72xf32>
    }
    %c16_i32_35 = arith.constant 16 : i32
    %cst_36 = arith.constant dense<0.000000e+00> : vector<72xf32>
    %74 = vector.multi_reduction <add>, %73, %cst_36 [0] : vector<32x72xf32> to vector<72xf32>
    %75 = vector.shape_cast %74 : vector<72xf32> to vector<1x72xf32>
    %cst_37 = arith.constant 0.055555556 : f32
    %76 = vector.broadcast %cst_37 : f32 to vector<1x72xf32>
    %77 = arith.mulf %75, %76 : vector<1x72xf32>
    %78 = arith.mulf %73, %73 : vector<32x72xf32>
    %cst_38 = arith.constant dense<0.000000e+00> : vector<72xf32>
    %79 = vector.multi_reduction <add>, %78, %cst_38 [0] : vector<32x72xf32> to vector<72xf32>
    %80 = vector.shape_cast %79 : vector<72xf32> to vector<1x72xf32>
    %cst_39 = arith.constant 0.055555556 : f32
    %81 = vector.broadcast %cst_39 : f32 to vector<1x72xf32>
    %82 = arith.mulf %80, %81 : vector<1x72xf32>
    %83 = arith.mulf %77, %77 : vector<1x72xf32>
    %84 = arith.subf %82, %83 : vector<1x72xf32>
    %cst_40 = arith.constant 0.000000e+00 : f32
    %85 = vector.broadcast %cst_40 : f32 to vector<1x72xf32>
    %86 = arith.maximumf %84, %85 : vector<1x72xf32>
    %c0_41 = arith.constant 0 : index
    %c0_42 = arith.constant 0 : index
    %87 = vector.load %arg15[%c0_41, %c0_42] : memref<1x72xf32, #tpu.memory_space<vmem>>, vector<1x72xf32>
    %88 = vector.broadcast %77 : vector<1x72xf32> to vector<32x72xf32>
    %89 = arith.subf %73, %88 : vector<32x72xf32>
    %cst_43 = arith.constant 9.99999974E-6 : f32
    %90 = vector.broadcast %cst_43 : f32 to vector<1x72xf32>
    %91 = arith.addf %86, %90 : vector<1x72xf32>
    %92 = math.rsqrt %91 : vector<1x72xf32>
    %93 = vector.broadcast %92 : vector<1x72xf32> to vector<32x72xf32>
    %94 = arith.mulf %89, %93 : vector<32x72xf32>
    %95 = vector.broadcast %87 : vector<1x72xf32> to vector<32x72xf32>
    %96 = arith.mulf %95, %94 : vector<32x72xf32>
    %c0_44 = arith.constant 0 : index
    %c0_45 = arith.constant 0 : index
    %97 = vector.load %arg16[%c0_44, %c0_45] : memref<1x72xf32, #tpu.memory_space<vmem>>, vector<1x72xf32>
    %98 = vector.broadcast %97 : vector<1x72xf32> to vector<32x72xf32>
    %99 = arith.addf %96, %98 : vector<32x72xf32>
    %cst_46 = arith.constant 0.000000e+00 : f32
    %100 = vector.broadcast %cst_46 : f32 to vector<32x72xf32>
    %101 = arith.cmpf ogt, %99, %100 : vector<32x72xf32>
    %cst_47 = arith.constant 1.000000e-01 : f32
    %102 = vector.broadcast %cst_47 : f32 to vector<32x72xf32>
    %103 = arith.mulf %102, %99 : vector<32x72xf32>
    %104 = arith.select %101, %99, %103 : vector<32x72xi1>, vector<32x72xf32>
    %105 = arith.truncf %104 : vector<32x72xf32> to vector<32x72xbf16>
    %cst_48 = arith.constant 0.000000e+00 : f32
    %106 = vector.broadcast %cst_48 : f32 to vector<64x36xf32>
    %c0_i32_49 = arith.constant 0 : i32
    %c16_i32_50 = arith.constant 16 : i32
    %107 = arith.addi %c0_i32_49, %c16_i32_50 : i32
    %c1_i32_51 = arith.constant 1 : i32
    %108 = scf.for %arg25 = %c0_i32_49 to %107 step %c1_i32_51 iter_args(%arg26 = %106) -> (vector<64x36xf32>)  : i32 {
      %184 = arith.index_cast %arg25 : i32 to index
      %c0_92 = arith.constant 0 : index
      %c0_93 = arith.constant 0 : index
      %185 = vector.load %arg4[%184, %c0_92, %c0_93] : memref<16x64x32xbf16, #tpu.memory_space<vmem>>, vector<1x64x32xbf16>
      %186 = vector.shape_cast %185 : vector<1x64x32xbf16> to vector<64x32xbf16>
      %cst_94 = arith.constant dense<0.000000e+00> : vector<64x72xf32>
      %187 = tpu.matmul %186, %105, %cst_94 {dimension_numbers = #tpu.dot_dimension_numbers<[1], [0], [0], [1], [0, 0, 1, 1], [], []>} : vector<64x32xbf16>, vector<32x72xbf16>, vector<64x72xf32> -> vector<64x72xf32>
      %188 = arith.truncf %187 : vector<64x72xf32> to vector<64x72xbf16>
      %189 = arith.index_cast %arg25 : i32 to index
      %c0_95 = arith.constant 0 : index
      %c0_96 = arith.constant 0 : index
      %190 = vector.load %arg9[%189, %c0_95, %c0_96] : memref<16x72x36xbf16, #tpu.memory_space<vmem>>, vector<1x72x36xbf16>
      %191 = vector.shape_cast %190 : vector<1x72x36xbf16> to vector<72x36xbf16>
      %cst_97 = arith.constant dense<0.000000e+00> : vector<64x36xf32>
      %192 = tpu.matmul %188, %191, %cst_97 {dimension_numbers = #tpu.dot_dimension_numbers<[1], [0], [0], [1], [0, 0, 1, 1], [], []>} : vector<64x72xbf16>, vector<72x36xbf16>, vector<64x36xf32> -> vector<64x36xf32>
      %193 = arith.addf %arg26, %192 : vector<64x36xf32>
      scf.yield %193 : vector<64x36xf32>
    }
    %c16_i32_52 = arith.constant 16 : i32
    %cst_53 = arith.constant dense<0.000000e+00> : vector<36xf32>
    %109 = vector.multi_reduction <add>, %108, %cst_53 [0] : vector<64x36xf32> to vector<36xf32>
    %110 = vector.shape_cast %109 : vector<36xf32> to vector<1x36xf32>
    %cst_54 = arith.constant 2.000000e-02 : f32
    %111 = vector.broadcast %cst_54 : f32 to vector<1x36xf32>
    %112 = arith.mulf %110, %111 : vector<1x36xf32>
    %113 = arith.mulf %108, %108 : vector<64x36xf32>
    %cst_55 = arith.constant dense<0.000000e+00> : vector<36xf32>
    %114 = vector.multi_reduction <add>, %113, %cst_55 [0] : vector<64x36xf32> to vector<36xf32>
    %115 = vector.shape_cast %114 : vector<36xf32> to vector<1x36xf32>
    %cst_56 = arith.constant 2.000000e-02 : f32
    %116 = vector.broadcast %cst_56 : f32 to vector<1x36xf32>
    %117 = arith.mulf %115, %116 : vector<1x36xf32>
    %118 = arith.mulf %112, %112 : vector<1x36xf32>
    %119 = arith.subf %117, %118 : vector<1x36xf32>
    %cst_57 = arith.constant 0.000000e+00 : f32
    %120 = vector.broadcast %cst_57 : f32 to vector<1x36xf32>
    %121 = arith.maximumf %119, %120 : vector<1x36xf32>
    %c0_58 = arith.constant 0 : index
    %c0_59 = arith.constant 0 : index
    %122 = vector.load %arg17[%c0_58, %c0_59] : memref<1x36xf32, #tpu.memory_space<vmem>>, vector<1x36xf32>
    %123 = vector.broadcast %112 : vector<1x36xf32> to vector<64x36xf32>
    %124 = arith.subf %108, %123 : vector<64x36xf32>
    %cst_60 = arith.constant 9.99999974E-6 : f32
    %125 = vector.broadcast %cst_60 : f32 to vector<1x36xf32>
    %126 = arith.addf %121, %125 : vector<1x36xf32>
    %127 = math.rsqrt %126 : vector<1x36xf32>
    %128 = vector.broadcast %127 : vector<1x36xf32> to vector<64x36xf32>
    %129 = arith.mulf %124, %128 : vector<64x36xf32>
    %130 = vector.broadcast %122 : vector<1x36xf32> to vector<64x36xf32>
    %131 = arith.mulf %130, %129 : vector<64x36xf32>
    %c0_61 = arith.constant 0 : index
    %c0_62 = arith.constant 0 : index
    %132 = vector.load %arg18[%c0_61, %c0_62] : memref<1x36xf32, #tpu.memory_space<vmem>>, vector<1x36xf32>
    %133 = vector.broadcast %132 : vector<1x36xf32> to vector<64x36xf32>
    %134 = arith.addf %131, %133 : vector<64x36xf32>
    %cst_63 = arith.constant 0.000000e+00 : f32
    %135 = vector.broadcast %cst_63 : f32 to vector<64x36xf32>
    %136 = arith.cmpf ogt, %134, %135 : vector<64x36xf32>
    %cst_64 = arith.constant 1.000000e-01 : f32
    %137 = vector.broadcast %cst_64 : f32 to vector<64x36xf32>
    %138 = arith.mulf %137, %134 : vector<64x36xf32>
    %139 = arith.select %136, %134, %138 : vector<64x36xi1>, vector<64x36xf32>
    %140 = arith.truncf %139 : vector<64x36xf32> to vector<64x36xbf16>
    %cst_65 = arith.constant 0.000000e+00 : f32
    %141 = vector.broadcast %cst_65 : f32 to vector<176x18xf32>
    %c0_i32_66 = arith.constant 0 : i32
    %c16_i32_67 = arith.constant 16 : i32
    %142 = arith.addi %c0_i32_66, %c16_i32_67 : i32
    %c1_i32_68 = arith.constant 1 : i32
    %143 = scf.for %arg25 = %c0_i32_66 to %142 step %c1_i32_68 iter_args(%arg26 = %141) -> (vector<176x18xf32>)  : i32 {
      %184 = arith.index_cast %arg25 : i32 to index
      %c0_92 = arith.constant 0 : index
      %c0_93 = arith.constant 0 : index
      %185 = vector.load %arg5[%184, %c0_92, %c0_93] : memref<16x176x64xbf16, #tpu.memory_space<vmem>>, vector<1x176x64xbf16>
      %186 = vector.shape_cast %185 : vector<1x176x64xbf16> to vector<176x64xbf16>
      %cst_94 = arith.constant dense<0.000000e+00> : vector<176x36xf32>
      %187 = tpu.matmul %186, %140, %cst_94 {dimension_numbers = #tpu.dot_dimension_numbers<[1], [0], [0], [1], [0, 0, 1, 1], [], []>} : vector<176x64xbf16>, vector<64x36xbf16>, vector<176x36xf32> -> vector<176x36xf32>
      %188 = arith.truncf %187 : vector<176x36xf32> to vector<176x36xbf16>
      %189 = arith.index_cast %arg25 : i32 to index
      %c0_95 = arith.constant 0 : index
      %c0_96 = arith.constant 0 : index
      %190 = vector.load %arg10[%189, %c0_95, %c0_96] : memref<16x36x18xbf16, #tpu.memory_space<vmem>>, vector<1x36x18xbf16>
      %191 = vector.shape_cast %190 : vector<1x36x18xbf16> to vector<36x18xbf16>
      %cst_97 = arith.constant dense<0.000000e+00> : vector<176x18xf32>
      %192 = tpu.matmul %188, %191, %cst_97 {dimension_numbers = #tpu.dot_dimension_numbers<[1], [0], [0], [1], [0, 0, 1, 1], [], []>} : vector<176x36xbf16>, vector<36x18xbf16>, vector<176x18xf32> -> vector<176x18xf32>
      %193 = arith.addf %arg26, %192 : vector<176x18xf32>
      scf.yield %193 : vector<176x18xf32>
    }
    %c16_i32_69 = arith.constant 16 : i32
    %cst_70 = arith.constant dense<0.000000e+00> : vector<18xf32>
    %144 = vector.multi_reduction <add>, %143, %cst_70 [0] : vector<176x18xf32> to vector<18xf32>
    %145 = vector.shape_cast %144 : vector<18xf32> to vector<1x18xf32>
    %cst_71 = arith.constant 0.00617283955 : f32
    %146 = vector.broadcast %cst_71 : f32 to vector<1x18xf32>
    %147 = arith.mulf %145, %146 : vector<1x18xf32>
    %148 = arith.mulf %143, %143 : vector<176x18xf32>
    %cst_72 = arith.constant dense<0.000000e+00> : vector<18xf32>
    %149 = vector.multi_reduction <add>, %148, %cst_72 [0] : vector<176x18xf32> to vector<18xf32>
    %150 = vector.shape_cast %149 : vector<18xf32> to vector<1x18xf32>
    %cst_73 = arith.constant 0.00617283955 : f32
    %151 = vector.broadcast %cst_73 : f32 to vector<1x18xf32>
    %152 = arith.mulf %150, %151 : vector<1x18xf32>
    %153 = arith.mulf %147, %147 : vector<1x18xf32>
    %154 = arith.subf %152, %153 : vector<1x18xf32>
    %cst_74 = arith.constant 0.000000e+00 : f32
    %155 = vector.broadcast %cst_74 : f32 to vector<1x18xf32>
    %156 = arith.maximumf %154, %155 : vector<1x18xf32>
    %c0_75 = arith.constant 0 : index
    %c0_76 = arith.constant 0 : index
    %157 = vector.load %arg19[%c0_75, %c0_76] : memref<1x18xf32, #tpu.memory_space<vmem>>, vector<1x18xf32>
    %158 = vector.broadcast %147 : vector<1x18xf32> to vector<176x18xf32>
    %159 = arith.subf %143, %158 : vector<176x18xf32>
    %cst_77 = arith.constant 9.99999974E-6 : f32
    %160 = vector.broadcast %cst_77 : f32 to vector<1x18xf32>
    %161 = arith.addf %156, %160 : vector<1x18xf32>
    %162 = math.rsqrt %161 : vector<1x18xf32>
    %163 = vector.broadcast %162 : vector<1x18xf32> to vector<176x18xf32>
    %164 = arith.mulf %159, %163 : vector<176x18xf32>
    %165 = vector.broadcast %157 : vector<1x18xf32> to vector<176x18xf32>
    %166 = arith.mulf %165, %164 : vector<176x18xf32>
    %c0_78 = arith.constant 0 : index
    %c0_79 = arith.constant 0 : index
    %167 = vector.load %arg20[%c0_78, %c0_79] : memref<1x18xf32, #tpu.memory_space<vmem>>, vector<1x18xf32>
    %168 = vector.broadcast %167 : vector<1x18xf32> to vector<176x18xf32>
    %169 = arith.addf %166, %168 : vector<176x18xf32>
    %cst_80 = arith.constant 0.000000e+00 : f32
    %170 = vector.broadcast %cst_80 : f32 to vector<176x18xf32>
    %171 = arith.cmpf ogt, %169, %170 : vector<176x18xf32>
    %cst_81 = arith.constant 1.000000e-01 : f32
    %172 = vector.broadcast %cst_81 : f32 to vector<176x18xf32>
    %173 = arith.mulf %172, %169 : vector<176x18xf32>
    %174 = arith.select %171, %169, %173 : vector<176x18xi1>, vector<176x18xf32>
    %175 = arith.addf %174, %34 : vector<176x18xf32>
    %c0_82 = arith.constant 0 : index
    %c0_83 = arith.constant 0 : index
    %176 = vector.load %arg21[%c0_82, %c0_83] : memref<2x176xf32, #tpu.memory_space<vmem>>, vector<2x176xf32>
    %cst_84 = arith.constant dense<0.000000e+00> : vector<2x18xf32>
    %177 = tpu.matmul %176, %175, %cst_84 {dimension_numbers = #tpu.dot_dimension_numbers<[1], [0], [0], [1], [0, 0, 1, 1], [], []>} : vector<2x176xf32>, vector<176x18xf32>, vector<2x18xf32> -> vector<2x18xf32>
    %c0_85 = arith.constant 0 : index
    %c0_86 = arith.constant 0 : index
    %178 = vector.load %arg22[%c0_85, %c0_86] : memref<18x2xf32, #tpu.memory_space<vmem>>, vector<18x2xf32>
    %cst_87 = arith.constant dense<0.000000e+00> : vector<2x2xf32>
    %179 = tpu.matmul %177, %178, %cst_87 {dimension_numbers = #tpu.dot_dimension_numbers<[1], [0], [0], [1], [0, 0, 1, 1], [], []>} : vector<2x18xf32>, vector<18x2xf32>, vector<2x2xf32> -> vector<2x2xf32>
    %c0_88 = arith.constant 0 : index
    %c0_89 = arith.constant 0 : index
    %180 = vector.load %arg23[%c0_88, %c0_89] : memref<1x2xf32, #tpu.memory_space<vmem>>, vector<1x2xf32>
    %181 = vector.broadcast %180 : vector<1x2xf32> to vector<2x2xf32>
    %182 = arith.addf %179, %181 : vector<2x2xf32>
    %c0_90 = arith.constant 0 : index
    %c0_91 = arith.constant 0 : index
    %183 = vector.load %arg24[%c0_90, %c0_91] : memref<2x2xf32, #tpu.memory_space<vmem>>, vector<2x2xf32>
    tpu.vector_store %arg24[%c0_90, %c0_91], %182 {strides = array<i32>} : memref<2x2xf32, #tpu.memory_space<vmem>>, vector<2x2xf32>,
    return
  }
}

</mosaic_0001>

<bundles_post_ra>
// kernel: forward.1
= control target key start
LH: loop header
LB: loop body
LE: loop exit
PB: predicated region body
PF: predicated region fallthrough
CT: control target
= control target key end

     0   :  { %s8455_s0 = inlined_call_operand.vmem [shape: bf16[512,4], index: 0, kind: input, shape index: {}]   ;;  %s8456_s1 = inlined_call_operand.hbm [shape: bf16[16,176,512], index: 1, kind: input, shape index: {}]   ;;  %s8457_s2 = inlined_call_operand.vmem [shape: bf16[16,64,176], index: 2, kind: input, shape index: {}]   ;;  %s8458_s3 = inlined_call_operand.vmem [shape: bf16[16,32,64], index: 3, kind: input, shape index: {}]   ;;  %s8459_s4 = inlined_call_operand.vmem [shape: bf16[16,64,32], index: 4, kind: input, shape index: {}]   ;;  %s8460_s5 = inlined_call_operand.vmem [shape: bf16[16,176,64], index: 5, kind: input, shape index: {}]   ;;  %s8461_s6 = inlined_call_operand.vmem [shape: bf16[16,4,18], index: 6, kind: input, shape index: {}]   ;;  %s8462_s7 = inlined_call_operand.vmem [shape: bf16[16,18,36], index: 7, kind: input, shape index: {}]   ;;  %s8463_s8 = inlined_call_operand.vmem [shape: bf16[16,36,72], index: 8, kind: input, shape index: {}]   ;;  %s8464_s9 = inlined_call_operand.vmem [shape: bf16[16,72,36], index: 9, kind: input, shape index: {}]   ;;  %s8465_s10 = inlined_call_operand.vmem [shape: bf16[16,36,18], index: 10, kind: input, shape index: {}]   ;;  %s8466_s11 = inlined_call_operand.hbm [shape: f32[1,18], index: 11, kind: input, shape index: {}]   ;;  %s8467_s12 = inlined_call_operand.hbm [shape: f32[1,18], index: 12, kind: input, shape index: {}]   ;;  %s8468_s13 = inlined_call_operand.hbm [shape: f32[1,36], index: 13, kind: input, shape index: {}]   ;;  %s8469_s14 = inlined_call_operand.hbm [shape: f32[1,36], index: 14, kind: input, shape index: {}]   ;;  %s8470_s15 = inlined_call_operand.hbm [shape: f32[1,72], index: 15, kind: input, shape index: {}]   ;;  %s8471_s16 = inlined_call_operand.hbm [shape: f32[1,72], index: 16, kind: input, shape index: {}]   ;;  %s8472_s17 = inlined_call_operand.hbm [shape: f32[1,36], index: 17, kind: input, shape index: {}]   ;;  %s8473_s18 = inlined_call_operand.hbm [shape: f32[1,36], index: 18, kind: input, shape index: {}]   ;;  %s8474_s19 = inlined_call_operand.hbm [shape: f32[1,18], index: 19, kind: input, shape index: {}]   ;;  %s8475_s20 = inlined_call_operand.hbm [shape: f32[1,18], index: 20, kind: input, shape index: {}]   ;;  %s8476_s21 = inlined_call_operand.hbm [shape: f32[2,176], index: 21, kind: input, shape index: {}]   ;;  %s8477_s22 = inlined_call_operand.vmem [shape: f32[18,2], index: 22, kind: input, shape index: {}]   ;;  %s8478_s23 = inlined_call_operand.hbm [shape: f32[1,2], index: 23, kind: input, shape index: {}]   ;;  %s8479_s24 = inlined_call_operand.hbm [shape: f32[2,2], index: 24, kind: output, shape index: {}]  }
   0x1   :  { %8501 = sst [smem:[#allocation97_spill]] %s8455_s0 }
   0x2   :  { %8502 = sst [smem:[#allocation98_spill]] %s8456_s1 }
   0x3   :  { %8503 = sst [smem:[#allocation99_spill]] %s8457_s2 }
   0x4   :  { %8504 = sst [smem:[#allocation100_spill]] %s8458_s3 }
   0x5   :  { %8505 = sst [smem:[#allocation101_spill]] %s8459_s4 }
   0x6   :  { %8506 = sst [smem:[#allocation102_spill]] %s8460_s5 }
   0x7   :  { %8507 = sst [smem:[#allocation103_spill]] %s8461_s6 }
   0x8   :  { %8508 = sst [smem:[#allocation104_spill]] %s8462_s7 }
   0x9   :  { %8509 = sst [smem:[#allocation105_spill]] %s8463_s8 }
   0xa   :  { %29 = vsyncpa [#allocation3], 0 }
   0xb   :  { %30 = vsyncpa [#allocation6], 0 }
   0xc   :  { %31 = vsyncpa [#allocation9], 0 }
   0xd   :  { %32 = vsyncpa [#allocation12], 0 }
   0xe   :  { %33 = vsyncpa [#allocation15], 0 }
   0xf   :  { %34 = vsyncpa [#allocation18], 0 }
  0x10   :  { %35 = vsyncpa [#allocation21], 0 }
  0x11   :  { %36 = vsyncpa [#allocation4], 0  ;;  %s6017_s5 = smov [#allocation5]   ;;  %s6018_s27 = smov [#allocation8]  }
  0x12   :  { %s75_s26 = sshll.u32 %s6017_s5, 4  ;;  %s95_s28 = sshll.u32 %s6018_s27, 4  ;;  %s76_s26 = int_to_ptr.vmem [resolvable:$true] %s75_s26  ;;  %s96_s28 = int_to_ptr.vmem [resolvable:$true] %s95_s28 }
  0x13   :  { %s5177_s6 = scalar_lea.vmem %s76_s26, 16  ;;  %s5181_s2 = scalar_lea.vmem %s76_s26, 32 }
  0x14   :  { %p5178_p0 = scmp.ne.s32.totalorder %s76_s26, %s5177_s6  ;;  %p5182_p1 = scmp.lt.s32.totalorder %s76_s26, %s76_s26 }
  0x15   :  { %p5183_p2 = scmp.lt.s32.totalorder %s5181_s2, %s5177_s6 }
  0x17   :  { %p5184_p3 = por %p5183_p2, %p5182_p1 }
  0x19   :  { %p5185_p4 = pnand %p5184_p3, %p5178_p0 }
  0x1b   :  { %5188 = shalt.err (!%p5185_p4)
}
  0x1c   :  { %78 = dma.hbm_to_vmem [thread:$0]  %s8466_s11, 16, %s76_s26, [#allocation6]  }
  0x1d   :  { %s5197_s7 = scalar_lea.vmem %s96_s28, 16  ;;  %s5201_s30 = scalar_lea.vmem %s96_s28, 32 }
  0x1e   :  { %p5198_p5 = scmp.ne.s32.totalorder %s96_s28, %s5197_s7  ;;  %p5202_p6 = scmp.lt.s32.totalorder %s96_s28, %s96_s28 }
  0x1f   :  { %p5203_p7 = scmp.lt.s32.totalorder %s5201_s30, %s5197_s7 }
  0x21   :  { %p5204_p8 = por %p5203_p7, %p5202_p6 }
  0x23   :  { %p5205_p9 = pnand %p5204_p8, %p5198_p5 }
  0x25   :  { %5208 = shalt.err (!%p5205_p9)
}
  0x26   :  { %98 = dma.hbm_to_vmem [thread:$0]  %s8468_s13, 16, %s96_s28, [#allocation9]  }
  0x27   :  { %s6019_s8 = smov [#allocation11]   ;;  %s6020_s1 = smov [#allocation14]  }
  0x28   :  { %s115_s4 = sshll.u32 %s6019_s8, 4  ;;  %s135_s5 = sshll.u32 %s6020_s1, 4  ;;  %s116_s4 = int_to_ptr.vmem [resolvable:$true] %s115_s4  ;;  %s136_s5 = int_to_ptr.vmem [resolvable:$true] %s135_s5 }
  0x29   :  { %s5217_s27 = scalar_lea.vmem %s116_s4, 16  ;;  %s5221_s11 = scalar_lea.vmem %s116_s4, 32 }
  0x2a   :  { %p5218_p10 = scmp.ne.s32.totalorder %s116_s4, %s5217_s27  ;;  %p5222_p11 = scmp.lt.s32.totalorder %s116_s4, %s116_s4 }
  0x2b   :  { %p5223_p12 = scmp.lt.s32.totalorder %s5221_s11, %s5217_s27 }
  0x2d   :  { %p5224_p13 = por %p5223_p12, %p5222_p11 }
  0x2f   :  { %p5225_p0 = pnand %p5224_p13, %p5218_p10 }
  0x31   :  { %5228 = shalt.err (!%p5225_p0)
}
  0x32   :  { %118 = dma.hbm_to_vmem [thread:$0]  %s8470_s15, 16, %s116_s4, [#allocation12]  }
  0x33   :  { %s5237_s2 = scalar_lea.vmem %s136_s5, 16  ;;  %s5241_s13 = scalar_lea.vmem %s136_s5, 32 }
  0x34   :  { %p5238_p1 = scmp.ne.s32.totalorder %s136_s5, %s5237_s2  ;;  %p5242_p2 = scmp.lt.s32.totalorder %s136_s5, %s136_s5 }
  0x35   :  { %p5243_p3 = scmp.lt.s32.totalorder %s5241_s13, %s5237_s2 }
  0x37   :  { %p5244_p4 = por %p5243_p3, %p5242_p2 }
  0x39   :  { %p5245_p5 = pnand %p5244_p4, %p5238_p1 }
  0x3b   :  { %5248 = shalt.err (!%p5245_p5)
}
  0x3c   :  { %138 = dma.hbm_to_vmem [thread:$0]  %s8472_s17, 16, %s136_s5, [#allocation15]  }
  0x3d   :  { %s6021_s0 = smov [#allocation17]   ;;  %s6022_s30 = smov [#allocation20]  }
  0x3e   :  { %s155_s7 = sshll.u32 %s6021_s0, 4  ;;  %s175_s3 = sshll.u32 %s6022_s30, 4  ;;  %s156_s7 = int_to_ptr.vmem [resolvable:$true] %s155_s7  ;;  %s176_s3 = int_to_ptr.vmem [resolvable:$true] %s175_s3 }
  0x3f   :  { %s5257_s25 = scalar_lea.vmem %s156_s7, 16  ;;  %s5261_s15 = scalar_lea.vmem %s156_s7, 32 }
  0x40   :  { %p5258_p6 = scmp.ne.s32.totalorder %s156_s7, %s5257_s25  ;;  %p5262_p7 = scmp.lt.s32.totalorder %s156_s7, %s156_s7 }
  0x41   :  { %p5263_p8 = scmp.lt.s32.totalorder %s5261_s15, %s5257_s25 }
  0x43   :  { %p5264_p9 = por %p5263_p8, %p5262_p7 }
  0x45   :  { %p5265_p10 = pnand %p5264_p9, %p5258_p6 }
  0x47   :  { %5268 = shalt.err (!%p5265_p10)
}
  0x48   :  { %158 = dma.hbm_to_vmem [thread:$0]  %s8474_s19, 16, %s156_s7, [#allocation18]  }
  0x49   :  { %s5277_s1 = scalar_lea.vmem %s176_s3, 64  ;;  %p5282_p12 = scmp.lt.s32.totalorder %s176_s3, %s176_s3 }
  0x4a   :  { %p5278_p11 = scmp.ne.s32.totalorder %s176_s3, %s5277_s1  ;;  %p5283_p13 = scmp.lt.s32.totalorder %s5277_s1, %s5277_s1 }
  0x4c   :  { %p5284_p0 = por %p5283_p13, %p5282_p12 }
  0x4e   :  { %p5285_p1 = pnand %p5284_p0, %p5278_p11 }
  0x50   :  { %5288 = shalt.err (!%p5285_p1)
}
  0x51   :  { %178 = dma.hbm_to_vmem [thread:$0]  %s8476_s21, 64, %s176_s3, [#allocation21]  }
  0x52   :  { %s6023_s27 = smov [#allocation2]  }
  0x53   :  { %s44_s11 = sshll.u32 %s6023_s27, 4  ;;  %s45_s11 = int_to_ptr.vmem [resolvable:$true] %s44_s11 }
  0x54   :  { %s5297_s26 = scalar_lea.vmem %s45_s11, 90112  ;;  %p5302_p3 = scmp.lt.s32.totalorder %s45_s11, %s45_s11 }
  0x55   :  { %p5298_p2 = scmp.ne.s32.totalorder %s45_s11, %s5297_s26  ;;  %p5303_p4 = scmp.lt.s32.totalorder %s5297_s26, %s5297_s26 }
  0x57   :  { %p5304_p5 = por %p5303_p4, %p5302_p3 }
  0x59   :  { %p5305_p6 = pnand %p5304_p5, %p5298_p2 }
  0x5b   :  { %5308 = shalt.err (!%p5305_p6)
}
  0x5c   :  { %s6024_s19 = smov 256   ;;  %s6025_s6 = smov 16  }
  0x5d   :  { %s8510_s28 = sld [smem:[#allocation98_spill]]  ;;  %s6026_s29 = smov [#allocation7]  }
  0x5e   :  { %s85_s0 = sshll.u32 %s6026_s29, 4  ;;  %s6027_s21 = smov [#allocation10]   ;;  %s86_s0 = int_to_ptr.vmem [resolvable:$true] %s85_s0 }
  0x5f   :  { %s105_s7 = sshll.u32 %s6027_s21, 4  ;;  %s5317_s30 = scalar_lea.vmem %s86_s0, 16  ;;  %s106_s7 = int_to_ptr.vmem [resolvable:$true] %s105_s7 }
  0x60   :  { %p5318_p7 = scmp.ne.s32.totalorder %s86_s0, %s5317_s30  ;;  %s5321_s3 = scalar_lea.vmem %s86_s0, 32 }
  0x61   :  { %p5322_p8 = scmp.lt.s32.totalorder %s86_s0, %s86_s0  ;;  %p5323_p9 = scmp.lt.s32.totalorder %s5321_s3, %s5317_s30 }
  0x63   :  { %50 = dma.hbm_to_vmem [thread:$0]  %s8510_s28, 90112, %s45_s11, [#allocation3], %s6024_s19, %s6024_s19, %s6025_s6  }
  0x64   :  { %p5324_p10 = por %p5323_p9, %p5322_p8 }
  0x66   :  { %p5325_p11 = pnand %p5324_p10, %p5318_p7 }
  0x68   :  { %5328 = shalt.err (!%p5325_p11)
}
  0x69   :  { %88 = dma.hbm_to_vmem [thread:$0]  %s8467_s12, 16, %s86_s0, [#allocation6]  }
  0x6a   :  { %s5337_s8 = scalar_lea.vmem %s106_s7, 16  ;;  %s5341_s4 = scalar_lea.vmem %s106_s7, 32 }
  0x6b   :  { %p5338_p12 = scmp.ne.s32.totalorder %s106_s7, %s5337_s8  ;;  %p5342_p13 = scmp.lt.s32.totalorder %s106_s7, %s106_s7 }
  0x6c   :  { %p5343_p0 = scmp.lt.s32.totalorder %s5341_s4, %s5337_s8 }
  0x6e   :  { %p5344_p1 = por %p5343_p0, %p5342_p13 }
  0x70   :  { %p5345_p2 = pnand %p5344_p1, %p5338_p12 }
  0x72   :  { %5348 = shalt.err (!%p5345_p2)
}
  0x73   :  { %108 = dma.hbm_to_vmem [thread:$0]  %s8469_s14, 16, %s106_s7, [#allocation9]  }
  0x74   :  { %s6028_s5 = smov [#allocation13]   ;;  %s6029_s11 = smov [#allocation16]  }
  0x75   :  { %s125_s27 = sshll.u32 %s6028_s5, 4  ;;  %s145_s26 = sshll.u32 %s6029_s11, 4  ;;  %s126_s27 = int_to_ptr.vmem [resolvable:$true] %s125_s27  ;;  %s146_s26 = int_to_ptr.vmem [resolvable:$true] %s145_s26 }
  0x76   :  { %s5357_s19 = scalar_lea.vmem %s126_s27, 16  ;;  %s5361_s12 = scalar_lea.vmem %s126_s27, 32 }
  0x77   :  { %p5358_p3 = scmp.ne.s32.totalorder %s126_s27, %s5357_s19  ;;  %p5362_p4 = scmp.lt.s32.totalorder %s126_s27, %s126_s27 }
  0x78   :  { %p5363_p5 = scmp.lt.s32.totalorder %s5361_s12, %s5357_s19 }
  0x7a   :  { %p5364_p6 = por %p5363_p5, %p5362_p4 }
  0x7c   :  { %p5365_p7 = pnand %p5364_p6, %p5358_p3 }
  0x7e   :  { %5368 = shalt.err (!%p5365_p7)
}
  0x7f   :  { %128 = dma.hbm_to_vmem [thread:$0]  %s8471_s16, 16, %s126_s27, [#allocation12]  }
  0x80   :  { %s5377_s13 = scalar_lea.vmem %s146_s26, 16  ;;  %s5381_s14 = scalar_lea.vmem %s146_s26, 32 }
  0x81   :  { %p5378_p8 = scmp.ne.s32.totalorder %s146_s26, %s5377_s13  ;;  %p5382_p9 = scmp.lt.s32.totalorder %s146_s26, %s146_s26 }
  0x82   :  { %p5383_p10 = scmp.lt.s32.totalorder %s5381_s14, %s5377_s13 }
  0x84   :  { %p5384_p11 = por %p5383_p10, %p5382_p9 }
  0x86   :  { %p5385_p12 = pnand %p5384_p11, %p5378_p8 }
  0x88   :  { %5388 = shalt.err (!%p5385_p12)
}
  0x89   :  { %148 = dma.hbm_to_vmem [thread:$0]  %s8473_s18, 16, %s146_s26, [#allocation15]  }
  0x8a   :  { %s6030_s0 = smov [#allocation19]   ;;  %s6031_s7 = smov [#allocation22]  }
  0x8b   :  { %s165_s21 = sshll.u32 %s6030_s0, 4  ;;  %s187_s30 = sshll.u32 %s6031_s7, 4  ;;  %s166_s21 = int_to_ptr.vmem [resolvable:$true] %s165_s21  ;;  %s188_s30 = int_to_ptr.vmem [resolvable:$true] %s187_s30 }
  0x8c   :  { %s5397_s3 = scalar_lea.vmem %s166_s21, 16  ;;  %s5401_s16 = scalar_lea.vmem %s166_s21, 32 }
  0x8d   :  { %p5398_p13 = scmp.ne.s32.totalorder %s166_s21, %s5397_s3  ;;  %p5402_p0 = scmp.lt.s32.totalorder %s166_s21, %s166_s21 }
  0x8e   :  { %p5403_p1 = scmp.lt.s32.totalorder %s5401_s16, %s5397_s3 }
  0x90   :  { %p5404_p2 = por %p5403_p1, %p5402_p0 }
  0x92   :  { %p5405_p3 = pnand %p5404_p2, %p5398_p13 }
  0x94   :  { %5408 = shalt.err (!%p5405_p3)
}
  0x95   :  { %168 = dma.hbm_to_vmem [thread:$0]  %s8475_s20, 16, %s166_s21, [#allocation18]  }
  0x96   :  { %s5417_s8 = scalar_lea.vmem %s188_s30, 16  ;;  %s5421_s18 = scalar_lea.vmem %s188_s30, 32 }
  0x97   :  { %p5418_p4 = scmp.ne.s32.totalorder %s188_s30, %s5417_s8  ;;  %p5422_p5 = scmp.lt.s32.totalorder %s188_s30, %s188_s30 }
  0x98   :  { %p5423_p6 = scmp.lt.s32.totalorder %s5421_s18, %s5417_s8 }
  0x9a   :  { %p5424_p7 = por %p5423_p6, %p5422_p5 }
  0x9c   :  { %p5425_p8 = pnand %p5424_p7, %p5418_p4 }
  0x9e   :  { %5428 = shalt.err (!%p5425_p8)
}
  0x9f   :  { %190 = dma.hbm_to_vmem [thread:$0]  %s8478_s23, 16, %s188_s30, [#allocation21]  }
  0xa0   :  { %5725 = dma.done.wait [#allocation3], 90112  }
  0xa1   :  { %5726 = vsyncadd [#allocation3], 4294877184 }
  0xa2   :  { %5727 = dma.done.wait [#allocation6], 32  }
  0xa3   :  { %5728 = vsyncadd [#allocation6], 4294967264 }
  0xa4   :  { %5729 = dma.done.wait [#allocation9], 32  }
  0xa5   :  { %5730 = vsyncadd [#allocation9], 4294967264 }
  0xa6   :  { %5731 = dma.done.wait [#allocation12], 32  }
  0xa7   :  { %5732 = vsyncadd [#allocation12], 4294967264 }
  0xa8   :  { %5733 = dma.done.wait [#allocation15], 32  }
  0xa9   :  { %5734 = vsyncadd [#allocation15], 4294967264 }
  0xaa   :  { %5735 = dma.done.wait [#allocation18], 32  }
  0xab   :  { %5736 = vsyncadd [#allocation18], 4294967264 }
  0xac   :  { %5737 = dma.done.wait [#allocation21], 80  }
  0xad   :  { %5738 = vsyncadd [#allocation21], 4294967216  ;;  %s8511_s5 = sld [smem:[#allocation97_spill]] }
  0xb3   :  { %v6207_v0 = vld [vmem:[%s8511_s5] sm:$0xf]  ;;  %v6212_v1 = vld [vmem:[%s8511_s5 + $0x4] sm:$0xf]  ;;  %v6217_v2 = vld [vmem:[%s8511_s5 + $0x8] sm:$0xf] }
  0xb4   :  { %8512 = vst [vmem:[#allocation32_spill] sm:$0xff] %v6207_v0  ;;  %8513 = vst [vmem:[#allocation33_spill] sm:$0xff] %v6212_v1  ;;  %v6222_v3 = vld [vmem:[%s8511_s5 + $0xc] sm:$0xf]  ;;  %v6227_v4 = vld [vmem:[%s8511_s5 + $0x10] sm:$0xf] }
  0xb5   :  { %8514 = vst [vmem:[#allocation34_spill] sm:$0xff] %v6217_v2  ;;  %8515 = vst [vmem:[#allocation35_spill] sm:$0xff] %v6222_v3  ;;  %v6232_v5 = vld [vmem:[%s8511_s5 + $0x14] sm:$0xf]  ;;  %v6237_v6 = vld [vmem:[%s8511_s5 + $0x18] sm:$0xf] }
  0xb6   :  { %8516 = vst [vmem:[#allocation36_spill] sm:$0xff] %v6227_v4  ;;  %8517 = vst [vmem:[#allocation37_spill] sm:$0xff] %v6232_v5  ;;  %v6242_v7 = vld [vmem:[%s8511_s5 + $0x1c] sm:$0xf]  ;;  %v6247_v8 = vld [vmem:[%s8511_s5 + $0x20] sm:$0xf] }
  0xb7   :  { %8518 = vst [vmem:[#allocation38_spill] sm:$0xff] %v6237_v6  ;;  %8519 = vst [vmem:[#allocation39_spill] sm:$0xff] %v6242_v7  ;;  %v6252_v9 = vld [vmem:[%s8511_s5 + $0x24] sm:$0xf]  ;;  %v6257_v10 = vld [vmem:[%s8511_s5 + $0x28] sm:$0xf] }
  0xb8   :  { %8520 = vst [vmem:[#allocation40_spill] sm:$0xff] %v6247_v8  ;;  %8521 = vst [vmem:[#allocation41_spill] sm:$0xff] %v6252_v9  ;;  %v6262_v11 = vld [vmem:[%s8511_s5 + $0x2c] sm:$0xf]  ;;  %v6267_v12 = vld [vmem:[%s8511_s5 + $0x30] sm:$0xf] }
  0xb9   :  { %8522 = vst [vmem:[#allocation42_spill] sm:$0xff] %v6257_v10  ;;  %8523 = vst [vmem:[#allocation43_spill] sm:$0xff] %v6262_v11  ;;  %v6272_v13 = vld [vmem:[%s8511_s5 + $0x34] sm:$0xf]  ;;  %v6277_v14 = vld [vmem:[%s8511_s5 + $0x38] sm:$0xf] }
  0xba   :  { %8524 = vst [vmem:[#allocation44_spill] sm:$0xff] %v6267_v12  ;;  %8525 = vst [vmem:[#allocation45_spill] sm:$0xff] %v6272_v13  ;;  %v6282_v15 = vld [vmem:[%s8511_s5 + $0x3c] sm:$0xf]  ;;  %v6287_v16 = vld [vmem:[%s8511_s5 + $0x40] sm:$0xf] }
  0xbb   :  { %8526 = vst [vmem:[#allocation46_spill] sm:$0xff] %v6277_v14  ;;  %8527 = vst [vmem:[#allocation47_spill] sm:$0xff] %v6282_v15  ;;  %v6292_v17 = vld [vmem:[%s8511_s5 + $0x44] sm:$0xf]  ;;  %v6297_v18 = vld [vmem:[%s8511_s5 + $0x48] sm:$0xf] }
  0xbc   :  { %8528 = vst [vmem:[#allocation48_spill] sm:$0xff] %v6287_v16  ;;  %8529 = vst [vmem:[#allocation49_spill] sm:$0xff] %v6292_v17  ;;  %v6302_v19 = vld [vmem:[%s8511_s5 + $0x4c] sm:$0xf]  ;;  %v6307_v20 = vld [vmem:[%s8511_s5 + $0x50] sm:$0xf] }
  0xbd   :  { %8530 = vst [vmem:[#allocation50_spill] sm:$0xff] %v6297_v18  ;;  %8531 = vst [vmem:[#allocation51_spill] sm:$0xff] %v6302_v19  ;;  %v6312_v21 = vld [vmem:[%s8511_s5 + $0x54] sm:$0xf]  ;;  %v6317_v22 = vld [vmem:[%s8511_s5 + $0x58] sm:$0xf] }
  0xbe   :  { %8532 = vst [vmem:[#allocation52_spill] sm:$0xff] %v6307_v20  ;;  %8533 = vst [vmem:[#allocation53_spill] sm:$0xff] %v6312_v21  ;;  %v6322_v23 = vld [vmem:[%s8511_s5 + $0x5c] sm:$0xf]  ;;  %v6327_v24 = vld [vmem:[%s8511_s5 + $0x60] sm:$0xf] }
  0xbf   :  { %8534 = vst [vmem:[#allocation54_spill] sm:$0xff] %v6317_v22  ;;  %8535 = vst [vmem:[#allocation55_spill] sm:$0xff] %v6322_v23  ;;  %v6332_v25 = vld [vmem:[%s8511_s5 + $0x64] sm:$0xf]  ;;  %v6337_v26 = vld [vmem:[%s8511_s5 + $0x68] sm:$0xf] }
  0xc0   :  { %8536 = vst [vmem:[#allocation56_spill] sm:$0xff] %v6327_v24  ;;  %8537 = vst [vmem:[#allocation57_spill] sm:$0xff] %v6332_v25  ;;  %v6342_v27 = vld [vmem:[%s8511_s5 + $0x6c] sm:$0xf]  ;;  %v6347_v28 = vld [vmem:[%s8511_s5 + $0x70] sm:$0xf] }
  0xc1   :  { %8538 = vst [vmem:[#allocation58_spill] sm:$0xff] %v6337_v26  ;;  %8539 = vst [vmem:[#allocation59_spill] sm:$0xff] %v6342_v27  ;;  %v6352_v29 = vld [vmem:[%s8511_s5 + $0x74] sm:$0xf]  ;;  %v6357_v30 = vld [vmem:[%s8511_s5 + $0x78] sm:$0xf] }
  0xc2   :  { %8540 = vst [vmem:[#allocation60_spill] sm:$0xff] %v6347_v28  ;;  %8541 = vst [vmem:[#allocation61_spill] sm:$0xff] %v6352_v29  ;;  %v6362_v31 = vld [vmem:[%s8511_s5 + $0x7c] sm:$0xf]  ;;  %v6367_v32 = vld [vmem:[%s8511_s5 + $0x80] sm:$0xf] }
  0xc3   :  { %8542 = vst [vmem:[#allocation62_spill] sm:$0xff] %v6357_v30  ;;  %8543 = vst [vmem:[#allocation63_spill] sm:$0xff] %v6362_v31  ;;  %v6372_v33 = vld [vmem:[%s8511_s5 + $0x84] sm:$0xf]  ;;  %v6377_v34 = vld [vmem:[%s8511_s5 + $0x88] sm:$0xf] }
  0xc4   :  { %8544 = vst [vmem:[#allocation64_spill] sm:$0xff] %v6367_v32  ;;  %8545 = vst [vmem:[#allocation65_spill] sm:$0xff] %v6372_v33  ;;  %v6382_v35 = vld [vmem:[%s8511_s5 + $0x8c] sm:$0xf]  ;;  %v6387_v36 = vld [vmem:[%s8511_s5 + $0x90] sm:$0xf] }
  0xc5   :  { %8546 = vst [vmem:[#allocation66_spill] sm:$0xff] %v6377_v34  ;;  %8547 = vst [vmem:[#allocation67_spill] sm:$0xff] %v6382_v35  ;;  %v6392_v37 = vld [vmem:[%s8511_s5 + $0x94] sm:$0xf]  ;;  %v6397_v38 = vld [vmem:[%s8511_s5 + $0x98] sm:$0xf] }
  0xc6   :  { %8548 = vst [vmem:[#allocation68_spill] sm:$0xff] %v6387_v36  ;;  %8549 = vst [vmem:[#allocation69_spill] sm:$0xff] %v6392_v37  ;;  %v6402_v39 = vld [vmem:[%s8511_s5 + $0x9c] sm:$0xf]  ;;  %v6407_v40 = vld [vmem:[%s8511_s5 + $0xa0] sm:$0xf] }
  0xc7   :  { %8550 = vst [vmem:[#allocation70_spill] sm:$0xff] %v6397_v38  ;;  %8551 = vst [vmem:[#allocation71_spill] sm:$0xff] %v6402_v39  ;;  %v6412_v41 = vld [vmem:[%s8511_s5 + $0xa4] sm:$0xf]  ;;  %v6417_v42 = vld [vmem:[%s8511_s5 + $0xa8] sm:$0xf] }
  0xc8   :  { %8552 = vst [vmem:[#allocation72_spill] sm:$0xff] %v6407_v40  ;;  %8553 = vst [vmem:[#allocation73_spill] sm:$0xff] %v6412_v41  ;;  %v6422_v43 = vld [vmem:[%s8511_s5 + $0xac] sm:$0xf]  ;;  %v6427_v44 = vld [vmem:[%s8511_s5 + $0xb0] sm:$0xf] }
  0xc9   :  { %8554 = vst [vmem:[#allocation74_spill] sm:$0xff] %v6417_v42  ;;  %8555 = vst [vmem:[#allocation75_spill] sm:$0xff] %v6422_v43  ;;  %v6432_v45 = vld [vmem:[%s8511_s5 + $0xb4] sm:$0xf]  ;;  %v6437_v46 = vld [vmem:[%s8511_s5 + $0xb8] sm:$0xf] }
  0xca   :  { %8556 = vst [vmem:[#allocation76_spill] sm:$0xff] %v6427_v44  ;;  %8557 = vst [vmem:[#allocation77_spill] sm:$0xff] %v6432_v45  ;;  %v6442_v47 = vld [vmem:[%s8511_s5 + $0xbc] sm:$0xf]  ;;  %v6447_v48 = vld [vmem:[%s8511_s5 + $0xc0] sm:$0xf] }
  0xcb   :  { %8558 = vst [vmem:[#allocation78_spill] sm:$0xff] %v6437_v46  ;;  %8559 = vst [vmem:[#allocation79_spill] sm:$0xff] %v6442_v47  ;;  %v6452_v49 = vld [vmem:[%s8511_s5 + $0xc4] sm:$0xf]  ;;  %v6457_v50 = vld [vmem:[%s8511_s5 + $0xc8] sm:$0xf] }
  0xcc   :  { %8560 = vst [vmem:[#allocation80_spill] sm:$0xff] %v6447_v48  ;;  %8561 = vst [vmem:[#allocation81_spill] sm:$0xff] %v6452_v49  ;;  %v6462_v51 = vld [vmem:[%s8511_s5 + $0xcc] sm:$0xf]  ;;  %v6467_v52 = vld [vmem:[%s8511_s5 + $0xd0] sm:$0xf] }
  0xcd   :  { %8562 = vst [vmem:[#allocation82_spill] sm:$0xff] %v6457_v50  ;;  %8563 = vst [vmem:[#allocation83_spill] sm:$0xff] %v6462_v51  ;;  %v6472_v53 = vld [vmem:[%s8511_s5 + $0xd4] sm:$0xf]  ;;  %v6477_v54 = vld [vmem:[%s8511_s5 + $0xd8] sm:$0xf] }
  0xce   :  { %8564 = vst [vmem:[#allocation84_spill] sm:$0xff] %v6467_v52  ;;  %8565 = vst [vmem:[#allocation85_spill] sm:$0xff] %v6472_v53  ;;  %v6482_v55 = vld [vmem:[%s8511_s5 + $0xdc] sm:$0xf]  ;;  %v6487_v56 = vld [vmem:[%s8511_s5 + $0xe0] sm:$0xf] }
  0xcf   :  { %8566 = vst [vmem:[#allocation86_spill] sm:$0xff] %v6477_v54  ;;  %8567 = vst [vmem:[#allocation87_spill] sm:$0xff] %v6482_v55  ;;  %v6492_v57 = vld [vmem:[%s8511_s5 + $0xe4] sm:$0xf]  ;;  %v6497_v58 = vld [vmem:[%s8511_s5 + $0xe8] sm:$0xf] }
  0xd0   :  { %8568 = vst [vmem:[#allocation88_spill] sm:$0xff] %v6487_v56  ;;  %8569 = vst [vmem:[#allocation89_spill] sm:$0xff] %v6492_v57  ;;  %v6502_v59 = vld [vmem:[%s8511_s5 + $0xec] sm:$0xf]  ;;  %v6507_v60 = vld [vmem:[%s8511_s5 + $0xf0] sm:$0xf] }
  0xd1   :  { %8570 = vst [vmem:[#allocation90_spill] sm:$0xff] %v6497_v58  ;;  %8571 = vst [vmem:[#allocation91_spill] sm:$0xff] %v6502_v59  ;;  %v6512_v61 = vld [vmem:[%s8511_s5 + $0xf4] sm:$0xf]  ;;  %v6517_v62 = vld [vmem:[%s8511_s5 + $0xf8] sm:$0xf] }
  0xd2   :  { %v6522_v63 = vld [vmem:[%s8511_s5 + $0xfc] sm:$0xf]  ;;  %v6524_v32 = vmov 0.0   ;;  %v6526_v33 = vmov 0.0   ;;  %v6528_v48 = vmov 0.0   ;;  %v6530_v49 = vmov 0.0  }
  0xd3   :  { %v6532_v34 = vmov 0.0   ;;  %v6534_v35 = vmov 0.0   ;;  %v6536_v50 = vmov 0.0   ;;  %v6538_v51 = vmov 0.0   ;;  %s6568_s5 = smov 0  }
  0xd4   :  { %v6540_v36 = vmov 0.0   ;;  %v6542_v37 = vmov 0.0   ;;  %v6544_v52 = vmov 0.0   ;;  %v6546_v53 = vmov 0.0  }
  0xd5   :  { %v6548_v38 = vmov 0.0   ;;  %v6550_v39 = vmov 0.0   ;;  %v6552_v54 = vmov 0.0   ;;  %v6554_v55 = vmov 0.0  }
  0xd6   :  { %v6556_v40 = vmov 0.0   ;;  %v6558_v41 = vmov 0.0   ;;  %v6560_v56 = vmov 0.0   ;;  %v6562_v57 = vmov 0.0  }
  0xd7   :  { %v6564_v42 = vmov 0.0   ;;  %v6566_v43 = vmov 0.0  }
  0xd8 LB: > { %8572 = vst [vmem:[#allocation92_spill] sm:$0xff] %v5743_v32  ;;  %8573 = vst [vmem:[#allocation93_spill] sm:$0xff] %v5747_v33  ;;  %v8577_v31 = vld [vmem:[#allocation63_spill] sm:$0xff]  ;;  %v8578_v30 = vld [vmem:[#allocation62_spill] sm:$0xff]  ;;  %s3964_s4 = smul.u32 352, %s5831_s5  ;;  %s3846_s20 = sshll.u32 %s5831_s5, 1  ;;  %s5831_s5 = sphi %s6568_s5, %s300_s5   ;;  %v5827_v43 = vphi %v6566_v43, %v8688_v43   ;;  %v5823_v42 = vphi %v6564_v42, %v8687_v42   ;;  %v5819_v57 = vphi %v6562_v57, %v8686_v57   ;;  %v5815_v56 = vphi %v6560_v56, %v8685_v56   ;;  %v5811_v41 = vphi %v6558_v41, %v8684_v41   ;;  %v5807_v40 = vphi %v6556_v40, %v8683_v40   ;;  %v5803_v55 = vphi %v6554_v55, %v8682_v55   ;;  %v5799_v54 = vphi %v6552_v54, %v8681_v54   ;;  %v5795_v39 = vphi %v6550_v39, %v8680_v39   ;;  %v5791_v38 = vphi %v6548_v38, %v8679_v38   ;;  %v5787_v53 = vphi %v6546_v53, %v8678_v53   ;;  %v5783_v52 = vphi %v6544_v52, %v8677_v52   ;;  %v5779_v37 = vphi %v6542_v37, %v8676_v37   ;;  %v5775_v36 = vphi %v6540_v36, %v8675_v36   ;;  %v5771_v51 = vphi %v6538_v51, %v8674_v51   ;;  %v5767_v50 = vphi %v6536_v50, %v8673_v50   ;;  %v5763_v35 = vphi %v6534_v35, %v8672_v35   ;;  %v5759_v34 = vphi %v6532_v34, %v8671_v34   ;;  %v5755_v49 = vphi %v6530_v49, %v8670_v49   ;;  %v5751_v48 = vphi %v6528_v48, %v8669_v48   ;;  %v5747_v33 = vphi %v6526_v33, %v8668_v33   ;;  %v5743_v32 = vphi %v6524_v32, %v8667_v32  }
  0xd9   : > { %8574 = vst [vmem:[#allocation94_spill] sm:$0xff] %v5751_v48  ;;  %8575 = vst [vmem:[#allocation95_spill] sm:$0xff] %v5755_v49  ;;  %v3829_v32 = vcombine.low %v8578_v30, %v8577_v31  ;;  %v8579_v15 = vld [vmem:[#allocation47_spill] sm:$0xff]  ;;  %v8580_v14 = vld [vmem:[#allocation46_spill] sm:$0xff]  ;;  %vm8483_vm0 = vcmask 1041408   ;;  %s8637_s27 = sld [smem:[#allocation103_spill]] }
  0xda   : > { %8576 = vst [vmem:[#allocation96_spill] sm:$0xff] %v5759_v34  ;;  %v3821_v33 = vcombine.low %v8580_v14, %v8579_v15  ;;  %v8581_v29 = vld [vmem:[#allocation61_spill] sm:$0xff]  ;;  %v8582_v28 = vld [vmem:[#allocation60_spill] sm:$0xff]  ;;  %v8585_v27 = vld [vmem:[#allocation59_spill] sm:$0xff]  ;;  %s6650_s1 = scalar_lea.vmem [#allocation2], %s3964_s4  ;;  %vm6033_vm1 = vmmov 0  }
  0xdb   : > { %v3828_v48 = vcombine.low %v8582_v28, %v8581_v29  ;;  %4435 = vmatprep.subr.bf16.mxu1 %v3829_v32  ;;  %v8583_v13 = vld [vmem:[#allocation45_spill] sm:$0xff]  ;;  %v8584_v12 = vld [vmem:[#allocation44_spill] sm:$0xff]  ;;  %v8586_v26 = vld [vmem:[#allocation58_spill] sm:$0xff]  ;;  %3973 = vmatprep.subr.bf16.mxu0 %v3829_v32  ;;  %vm1038_vm2 = vcmask 31744   ;;  %s300_s5 = sadd.s32 1, %s5831_s5  }
  0xdc   : > { %4443 = vmatpush3.bf16.msra.mxu1 %v3821_v33  ;;  %v3820_v49 = vcombine.low %v8584_v12, %v8583_v13  ;;  %v3827_v34 = vcombine.low %v8586_v26, %v8585_v27  ;;  %3974 = vmatpush3.bf16.msra.mxu0 %v3821_v33  ;;  %v5053_v14 = vld [vmem:[%s6650_s1 + $0xc4] ss:$16 sps:$4 sm:$0xff]   ;;  %v8588_v10 = vld [vmem:[#allocation42_spill] sm:$0xff]  ;;  %v8590_v24 = vld [vmem:[#allocation56_spill] sm:$0xff]  ;;  %p6886_p9 = scmp.ge.s32.totalorder %s300_s5, 16  }
  0xdd   : > { %4436 = vmatprep.subr.bf16.mxu1 %v3828_v48  ;;  %3975 = vmatprep.subr.bf16.mxu0 %v3828_v48  ;;  %v8587_v11 = vld [vmem:[#allocation43_spill] sm:$0xff]  ;;  %v8589_v25 = vld [vmem:[#allocation57_spill] sm:$0xff]  ;;  %v8592_v8 = vld [vmem:[#allocation40_spill] sm:$0xff]  ;;  %vm8484_vm3 = vcmask (%p6886_p9), 146432   ;;  %s7332_s19 = smov (%p6886_p9), 0  }
  0xde   : > { %v3819_v15 = vcombine.low %v8588_v10, %v8587_v11  ;;  %v3826_v12 = vcombine.low %v8590_v24, %v8589_v25  ;;  %862 = vmatprep.mubr.bf16.mxu1 %v5053_v14  ;;  %v8591_v9 = vld [vmem:[#allocation41_spill] sm:$0xff]  ;;  %v8593_v23 = vld [vmem:[#allocation55_spill] sm:$0xff]  ;;  %v8594_v22 = vld [vmem:[#allocation54_spill] sm:$0xff] }
  0xdf   : > { %v3818_v32 = vcombine.low %v8592_v8, %v8591_v9  ;;  %v3825_v33 = vcombine.low %v8594_v22, %v8593_v23  ;;  %v5068_v48 = vld [vmem:[%s6650_s1 + $0x4] ss:$16 sps:$4 sm:$0xff]   ;;  %v8596_v6 = vld [vmem:[#allocation38_spill] sm:$0xff]  ;;  %v8598_v20 = vld [vmem:[#allocation52_spill] sm:$0xff]  ;;  %s1036_s11 = scalar_lea.vmem %s8637_s27, %s3846_s20 }
  0xe0   : > { %4444 = vmatpush3.bf16.msra.mxu1 %v3820_v49  ;;  %3976 = vmatpush3.bf16.msra.mxu0 %v3820_v49  ;;  %v8595_v7 = vld [vmem:[#allocation39_spill] sm:$0xff]  ;;  %v8597_v21 = vld [vmem:[#allocation53_spill] sm:$0xff]  ;;  %v8600_v4 = vld [vmem:[#allocation36_spill] sm:$0xff] }
  0xe1   : > { %4437 = vmatprep.subr.bf16.mxu1 %v3827_v34  ;;  %3977 = vmatprep.subr.bf16.mxu0 %v3827_v34  ;;  %v3817_v10 = vcombine.low %v8596_v6, %v8595_v7  ;;  %v3824_v14 = vcombine.low %v8598_v20, %v8597_v21  ;;  %v8599_v5 = vld [vmem:[#allocation37_spill] sm:$0xff]  ;;  %v8601_v19 = vld [vmem:[#allocation51_spill] sm:$0xff]  ;;  %v8602_v18 = vld [vmem:[#allocation50_spill] sm:$0xff] }
  0xe2   : > { %814 = vmatprep.mubr.bf16.mxu0 %v5068_v48  ;;  %v3816_v34 = vcombine.low %v8600_v4, %v8599_v5  ;;  %v8603_v3 = vld [vmem:[#allocation35_spill] sm:$0xff]  ;;  %v8604_v2 = vld [vmem:[#allocation34_spill] sm:$0xff]  ;;  %v8605_v17 = vld [vmem:[#allocation49_spill] sm:$0xff] }
  0xe3   : > { %v8606_v16 = vld [vmem:[#allocation48_spill] sm:$0xff]  ;;  %v8607_v1 = vld [vmem:[#allocation33_spill] sm:$0xff]  ;;  %v8609_v47 = vld [vmem:[#allocation79_spill] sm:$0xff] }
  0xe4   : > { %4445 = vmatpush3.bf16.msra.mxu1 %v3819_v15  ;;  %3978 = vmatpush3.bf16.msra.mxu0 %v3819_v15  ;;  %v3815_v15 = vcombine.low %v8604_v2, %v8603_v3  ;;  %v3822_v49 = vcombine.low %v8606_v16, %v8605_v17  ;;  %v8608_v0 = vld [vmem:[#allocation32_spill] sm:$0xff]  ;;  %v8610_v46 = vld [vmem:[#allocation78_spill] sm:$0xff]  ;;  %v8611_v45 = vld [vmem:[#allocation77_spill] sm:$0xff] }
  0xe5   : > { %4438 = vmatprep.subr.bf16.mxu1 %v3826_v12  ;;  %3979 = vmatprep.subr.bf16.mxu0 %v3826_v12  ;;  %v3823_v12 = vcombine.low %v8602_v18, %v8601_v19  ;;  %v3837_v48 = vcombine.low %v8610_v46, %v8609_v47  ;;  %v8612_v44 = vld [vmem:[#allocation76_spill] sm:$0xff]  ;;  %v8613_v59 = vld [vmem:[#allocation91_spill] sm:$0xff]  ;;  %v8614_v58 = vld [vmem:[#allocation90_spill] sm:$0xff] }
  0xe6   : > { %v5057_v3 = vld [vmem:[%s6650_s1 + $0x104] ss:$16 sps:$4 sm:$0xff]   ;;  %v5074_v5 = vld [vmem:[%s6650_s1 + $0x20] ss:$16 sps:$4 sm:$0xff]  }
  0xe7   : > { %v8622_v6 = vld [vmem:[#allocation86_spill] sm:$0xff]  ;;  %v5060_v7 = vld [vmem:[%s6650_s1 + $0x124] ss:$16 sps:$4 sm:$0xff]  }
  0xe8   : > { %4446 = vmatpush3.bf16.msra.mxu1 %v3818_v32  ;;  %3980 = vmatpush3.bf16.msra.mxu0 %v3818_v32  ;;  %v3814_v32 = vcombine.low %v8608_v0, %v8607_v1  ;;  %v5072_v0 = vld [vmem:[%s6650_s1 + $0x24] ss:$16 sps:$4 sm:$0xff]   ;;  %v5080_v8 = vld [vmem:[%s6650_s1 + $0x40] ss:$16 sps:$4 sm:$0xff]  }
  0xe9   : > { %4439 = vmatprep.subr.bf16.mxu1 %v3825_v33  ;;  %3981 = vmatprep.subr.bf16.mxu0 %v3825_v33  ;;  %v5051_v33 = vld [vmem:[%s6650_s1 + $0xc0] ss:$16 sps:$4 sm:$0xff]   ;;  %v8615_v1 = vld [vmem:[#allocation75_spill] sm:$0xff] }
  0xec   : > { %4447 = vmatpush3.bf16.msra.mxu1 %v3817_v10  ;;  %3982 = vmatpush3.bf16.msra.mxu0 %v3817_v10  ;;  %v3845_v10 = vcombine.low %v6517_v62, %v6522_v63 }
  0xed   : > { %4440 = vmatprep.subr.bf16.mxu1 %v3824_v14  ;;  %3983 = vmatprep.subr.bf16.mxu0 %v3824_v14  ;;  %v5054_v14 = vld [vmem:[%s6650_s1 + $0xe4] ss:$16 sps:$4 sm:$0xff]  }
  0xf0   : > { %4448 = vmatpush3.bf16.msra.mxu1 %v3816_v34  ;;  %3984 = vmatpush3.bf16.msra.mxu0 %v3816_v34  ;;  %v3844_v34 = vcombine.low %v6507_v60, %v6512_v61 }
  0xf1   : > { %4441 = vmatprep.subr.bf16.mxu1 %v3823_v12  ;;  %3985 = vmatprep.subr.bf16.mxu0 %v3823_v12  ;;  %v5066_v12 = vld [vmem:[%s6650_s1] ss:$16 sps:$4 sm:$0xff]  }
  0xf4   : > { %4449 = vmatpush3.bf16.msra.mxu1 %v3815_v15  ;;  %3986 = vmatpush3.bf16.msra.mxu0 %v3815_v15  ;;  %v3836_v15 = vcombine.low %v8612_v44, %v8611_v45 }
  0xf5   : > { %4442 = vmatprep.subr.bf16.mxu1 %v3822_v49  ;;  %3987 = vmatprep.subr.bf16.mxu0 %v3822_v49  ;;  %v3843_v49 = vcombine.low %v8614_v58, %v8613_v59  ;;  %v8638_v59 = vmov 0.0  }
  0xf8   : > { %4450 = vmatpush3.bf16.msra.mxu1 %v3814_v32  ;;  %3988 = vmatpush3.bf16.msra.mxu0 %v3814_v32  ;;  %v8616_v32 = vld [vmem:[#allocation74_spill] sm:$0xff] }
  0xf9   : > { %4055 = vmatprep.subr.bf16.mxu1 %v3845_v10  ;;  %v5056_v10 = vld [vmem:[%s6650_s1 + $0xe0] ss:$16 sps:$4 sm:$0xff]   ;;  %v3835_v2 = vcombine.low %v8616_v32, %v8615_v1  ;;  %v8623_v32 = vld [vmem:[#allocation71_spill] sm:$0xff] }
  0xfb   : > { %863 = vmatmul.mubr.bf16.vlgmr.msra.gmra.mxu1 %v5051_v33  ;;  %815 = vmatmul.mubr.bf16.vlgmr.msra.gmra.mxu0 %v5066_v12  ;;  %v8617_v33 = vld [vmem:[#allocation89_spill] sm:$0xff] }
  0xfc   : > { %4056 = vmatpush3.bf16.msra.mxu1 %v3837_v48  ;;  %870 = vmatprep.mubr.bf16.mxu1 %v5054_v14  ;;  %v8618_v48 = vld [vmem:[#allocation88_spill] sm:$0xff]  ;;  %v5078_v14 = vld [vmem:[%s6650_s1 + $0x44] ss:$16 sps:$4 sm:$0xff]  }
  0xfd   : > { %4057 = vmatprep.subr.bf16.mxu1 %v3844_v34  ;;  %822 = vmatprep.mubr.bf16.mxu0 %v5072_v0  ;;  %v3842_v4 = vcombine.low %v8618_v48, %v8617_v33  ;;  %v8619_v0 = vld [vmem:[#allocation73_spill] sm:$0xff]  ;;  %v8620_v34 = vld [vmem:[#allocation72_spill] sm:$0xff]  ;;  %v8624_v33 = vld [vmem:[#allocation70_spill] sm:$0xff] }
  0xfe   : > { %v3834_v12 = vcombine.low %v8620_v34, %v8619_v0  ;;  %v3833_v48 = vcombine.low %v8624_v33, %v8623_v32  ;;  %v8629_v0 = vld [vmem:[#allocation83_spill] sm:$0xff]  ;;  %v8630_v34 = vld [vmem:[#allocation82_spill] sm:$0xff] }
  0xff   : > { %v8631_v32 = vld [vmem:[#allocation67_spill] sm:$0xff]  ;;  %v8632_v33 = vld [vmem:[#allocation66_spill] sm:$0xff] }
 0x100   : > { %4058 = vmatpush3.bf16.msra.mxu1 %v3836_v15  ;;  %v8621_v15 = vld [vmem:[#allocation87_spill] sm:$0xff] }
 0x101   : > { %4059 = vmatprep.subr.bf16.mxu1 %v3843_v49  ;;  %v3841_v1 = vcombine.low %v8622_v6, %v8621_v15  ;;  %v5059_v49 = vld [vmem:[%s6650_s1 + $0x100] ss:$16 sps:$4 sm:$0xff]  }
 0x102   : > { %v8628_v6 = vld [vmem:[#allocation68_spill] sm:$0xff] }
 0x103   : > { %871 = vmatmul.mubr.bf16.gmra.mxu1 %v5056_v10  ;;  %823 = vmatmul.mubr.bf16.gmra.mxu0 %v5074_v5  ;;  %v8627_v5 = vld [vmem:[#allocation69_spill] sm:$0xff]  ;;  %v5062_v15 = vld [vmem:[%s6650_s1 + $0x120] ss:$16 sps:$4 sm:$0xff]  }
 0x104   : > { %4060 = vmatpush3.bf16.msra.mxu1 %v3835_v2  ;;  %878 = vmatprep.mubr.bf16.mxu1 %v5057_v3  ;;  %v8625_v2 = vld [vmem:[#allocation85_spill] sm:$0xff]  ;;  %v8626_v3 = vld [vmem:[#allocation84_spill] sm:$0xff] }
 0x105   : > { %4061 = vmatprep.subr.bf16.mxu1 %v3842_v4  ;;  %830 = vmatprep.mubr.bf16.mxu0 %v5078_v14  ;;  %v3840_v10 = vcombine.low %v8626_v3, %v8625_v2  ;;  %v5084_v4 = vld [vmem:[%s6650_s1 + $0x64] ss:$16 sps:$4 sm:$0xff]   ;;  %v3832_v14 = vcombine.low %v8628_v6, %v8627_v5  ;;  %v5086_v3 = vld [vmem:[%s6650_s1 + $0x60] ss:$16 sps:$4 sm:$0xff]  }
 0x106   : > { %v5065_v6 = vld [vmem:[%s6650_s1 + $0x140] ss:$16 sps:$4 sm:$0xff]  }
 0x108   : > { %4062 = vmatpush3.bf16.msra.mxu1 %v3834_v12  ;;  %v3839_v12 = vcombine.low %v8630_v34, %v8629_v0  ;;  %v5092_v0 = vld [vmem:[%s6650_s1 + $0x80] ss:$16 sps:$4 sm:$0xff]   ;;  %v5096_v34 = vld [vmem:[%s6650_s1 + $0xa4] ss:$16 sps:$4 sm:$0xff]  }
 0x109   : > { %4063 = vmatprep.subr.bf16.mxu1 %v3841_v1  ;;  %v5063_v1 = vld [vmem:[%s6650_s1 + $0x144] ss:$16 sps:$4 sm:$0xff]  }
 0x10b   : > { %879 = vmatmul.mubr.bf16.gmra.mxu1 %v5059_v49  ;;  %831 = vmatmul.mubr.bf16.gmra.mxu0 %v5080_v8  ;;  %v3831_v49 = vcombine.low %v8632_v33, %v8631_v32  ;;  %v8635_v8 = vld [vmem:[#allocation65_spill] sm:$0xff]  ;;  %v5081_v33 = vld [vmem:[%s6650_s1 + $0x4c] ss:$16 sps:$4 sm:$0xff]  }
 0x10c   : > { %4064 = vmatpush3.bf16.msra.mxu1 %v3833_v48  ;;  %886 = vmatprep.mubr.bf16.mxu1 %v5060_v7  ;;  %v8633_v7 = vld [vmem:[#allocation81_spill] sm:$0xff]  ;;  %v8634_v48 = vld [vmem:[#allocation80_spill] sm:$0xff] }
 0x10d   : > { %4065 = vmatprep.subr.bf16.mxu1 %v3840_v10  ;;  %838 = vmatprep.mubr.bf16.mxu0 %v5084_v4  ;;  %v3838_v2 = vcombine.low %v8634_v48, %v8633_v7  ;;  %v5090_v10 = vld [vmem:[%s6650_s1 + $0x84] ss:$16 sps:$4 sm:$0xff]   ;;  %v8636_v4 = vld [vmem:[#allocation64_spill] sm:$0xff]  ;;  %v5077_v32 = vld [vmem:[%s6650_s1 + $0x28] ss:$16 sps:$4 sm:$0xff]  }
 0x10e   : > { %v3830_v5 = vcombine.low %v8636_v4, %v8635_v8  ;;  %v5087_v7 = vld [vmem:[%s6650_s1 + $0x6c] ss:$16 sps:$4 sm:$0xff]   ;;  %v5089_v48 = vld [vmem:[%s6650_s1 + $0x68] ss:$16 sps:$4 sm:$0xff]   ;;  %v8481_v8 = vmov 0.0  }
 0x10f   : > { %4214 = vmatprep.subr.bf16.mxu0 %v8481_v8  ;;  %v1037_v4 = vld [vmem:[%s1036_s11] sm:$0x3] }
 0x110   : > { %4066 = vmatpush3.bf16.msra.mxu1 %v3832_v14  ;;  %v5071_v14 = vld [vmem:[%s6650_s1 + $0xc] ss:$16 sps:$4 sm:$0xff]  }
 0x111   : > { %4067 = vmatprep.subr.bf16.mxu1 %v3839_v12  ;;  %v5069_v12 = vld [vmem:[%s6650_s1 + $0x8] ss:$16 sps:$4 sm:$0xff]  }
 0x113   : > { %887 = vmatmul.mubr.bf16.gmra.mxu1 %v5062_v15  ;;  %839 = vmatmul.mubr.bf16.gmra.mxu0 %v5086_v3  ;;  %v5075_v15 = vld [vmem:[%s6650_s1 + $0x2c] ss:$16 sps:$4 sm:$0xff]   ;;  %v5095_v3 = vld [vmem:[%s6650_s1 + $0x88] ss:$16 sps:$4 sm:$0xff]  }
 0x114   : > { %894 = vmatprep.mubr.bf16.mxu1 %v5063_v1  ;;  %4068 = vmatpush3.bf16.msra.mxu1 %v3831_v49  ;;  %v5098_v1 = vld [vmem:[%s6650_s1 + $0xa0] ss:$16 sps:$4 sm:$0xff]   ;;  %v5083_v49 = vld [vmem:[%s6650_s1 + $0x48] ss:$16 sps:$4 sm:$0xff]  }
 0x115   : > { %4069 = vmatprep.subr.bf16.mxu1 %v3838_v2  ;;  %846 = vmatprep.mubr.bf16.mxu0 %v5090_v10  ;;  %v5093_v2 = vld [vmem:[%s6650_s1 + $0x8c] ss:$16 sps:$4 sm:$0xff]  }
 0x116   : > { %v5099_v10 = vld [vmem:[%s6650_s1 + $0xac] ss:$16 sps:$4 sm:$0xff]  }
 0x118   : > { %4070 = vmatpush3.bf16.msra.mxu1 %v3830_v5  ;;  %v1074_v5 = vsel %vm8483_vm0, %v1037_v4, 0 }
 0x119   : > { %4215 = vmatpush3.bf16.msra.mxu0 %v1074_v5 }
 0x11b   : > { %895 = vmatmul.mubr.bf16.gmra.mxu1 %v5065_v6  ;;  %847 = vmatmul.mubr.bf16.gmra.mxu0 %v5092_v0  ;;  %v5101_v6 = vld [vmem:[%s6650_s1 + $0xa8] ss:$16 sps:$4 sm:$0xff]  }
 0x11c   : > { %935 = vmatprep.mubr.bf16.mxu1 %v5071_v14  ;;  %854 = vmatprep.mubr.bf16.mxu0 %v5096_v34  ;;  %v5102_v14 = vld [vmem:[%s6650_s1 + $0xcc] ss:$16 sps:$4 sm:$0xff]   ;;  %v5104_v0 = vld [vmem:[%s6650_s1 + $0xc8] ss:$16 sps:$4 sm:$0xff]  }
 0x11d   : > { %v5105_v34 = vld [vmem:[%s6650_s1 + $0xec] ss:$16 sps:$4 sm:$0xff]  }
 0x123   : > { %936 = vmatmul.mubr.bf16.vlgmr.msra.gmra.mxu1 %v5069_v12  ;;  %855 = vmatmul.mubr.bf16.gmra.mxu0 %v5098_v1  ;;  %v5107_v12 = vld [vmem:[%s6650_s1 + $0xe8] ss:$16 sps:$4 sm:$0xff]  }
 0x124   : > { %943 = vmatprep.mubr.bf16.mxu1 %v5075_v15  ;;  %v5108_v15 = vld [vmem:[%s6650_s1 + $0x10c] ss:$16 sps:$4 sm:$0xff]   ;;  %v5110_v1 = vld [vmem:[%s6650_s1 + $0x108] ss:$16 sps:$4 sm:$0xff]   ;;  %4216 = vmatprep.mubr.msk.bf16.mxu0 %vm6033_vm1, %v8481_v8 }
 0x12b   : > { %944 = vmatmul.mubr.bf16.gmra.mxu1 %v5077_v32  ;;  %v5111_v32 = vld [vmem:[%s6650_s1 + $0x12c] ss:$16 sps:$4 sm:$0xff]  }
 0x12c   : > { %951 = vmatprep.mubr.bf16.mxu1 %v5081_v33  ;;  %v5113_v33 = vld [vmem:[%s6650_s1 + $0x128] ss:$16 sps:$4 sm:$0xff]  }
 0x133   : > { %952 = vmatmul.mubr.bf16.gmra.mxu1 %v5083_v49  ;;  %v5114_v49 = vld [vmem:[%s6650_s1 + $0x14c] ss:$16 sps:$4 sm:$0xff]  }
 0x134   : > { %959 = vmatprep.mubr.bf16.mxu1 %v5087_v7  ;;  %v5116_v7 = vld [vmem:[%s6650_s1 + $0x148] ss:$16 sps:$4 sm:$0xff]  }
 0x13b   : > { %960 = vmatmul.mubr.bf16.gmra.mxu1 %v5089_v48 }
 0x13c   : > { %967 = vmatprep.mubr.bf16.mxu1 %v5093_v2 }
 0x143   : > { %968 = vmatmul.mubr.bf16.gmra.mxu1 %v5095_v3 }
 0x144   : > { %975 = vmatprep.mubr.bf16.mxu1 %v5099_v10 }
 0x14b   : > { %976 = vmatmul.mubr.bf16.gmra.mxu1 %v5101_v6 }
 0x14c   : > { %983 = vmatprep.mubr.bf16.mxu1 %v5102_v14 }
 0x153   : > { %984 = vmatmul.mubr.bf16.gmra.mxu1 %v5104_v0 }
 0x154   : > { %991 = vmatprep.mubr.bf16.mxu1 %v5105_v34 }
 0x15b   : > { %992 = vmatmul.mubr.bf16.gmra.mxu1 %v5107_v12 }
 0x15c   : > { %999 = vmatprep.mubr.bf16.mxu1 %v5108_v15 }
 0x163   : > { %1000 = vmatmul.mubr.bf16.gmra.mxu1 %v5110_v1 }
 0x164   : > { %1007 = vmatprep.mubr.bf16.mxu1 %v5111_v32 }
 0x16b   : > { %1008 = vmatmul.mubr.bf16.gmra.mxu1 %v5113_v33 }
 0x16c   : > { %1015 = vmatprep.mubr.bf16.mxu1 %v5114_v49 }
 0x173   : > { %1016 = vmatmul.mubr.bf16.gmra.mxu1 %v5116_v7 }
 0x1bb   : > { %v4025_v48 = vpop.f32.mrf.mxu1  ;;  %v3989_v3 = vpop.f32.mrf.mxu0 }
 0x1bd   : > { %v4026_v2 = vpop.f32.mrf.mxu1  ;;  %v3990_v5 = vpop.f32.mrf.mxu0 }
 0x1be   : > { %v6758_v10 = vadd.f32 %v4026_v2, %v4025_v48  ;;  %v3991_v30 = vadd.f32 %v3990_v5, %v3989_v3 }
 0x1bf   : > { %v4028_v4 = vpop.f32.mrf.mxu1  ;;  %v3992_v14 = vpop.f32.mrf.mxu0 }
 0x1c1   : > { %v4029_v6 = vpop.f32.mrf.mxu1  ;;  %v3993_v12 = vpop.f32.mrf.mxu0 }
 0x1c2   : > { %v6760_v0 = vadd.f32 %v4029_v6, %v4028_v4 }
 0x1c3   : > { %v4031_v34 = vpop.f32.mrf.mxu1  ;;  %v3995_v1 = vpop.f32.mrf.mxu0 }
 0x1c5   : > { %v4032_v15 = vpop.f32.mrf.mxu1  ;;  %v3996_v49 = vpop.f32.mrf.mxu0 }
 0x1c6   : > { %v6762_v32 = vadd.f32 %v4032_v15, %v4031_v34 }
 0x1c7   : > { %v4034_v33 = vpop.f32.mrf.mxu1  ;;  %v3998_v48 = vpop.f32.mrf.mxu0 }
 0x1c9   : > { %v4035_v7 = vpop.f32.mrf.mxu1  ;;  %v3999_v16 = vpop.f32.mrf.mxu0 }
 0x1ca   : > { %v6764_v8 = vadd.f32 %v4035_v7, %v4034_v33  ;;  %v4000_v3 = vadd.f32 %v3999_v16, %v3998_v48 }
 0x1cb   : > { %v4037_v9 = vpop.f32.mrf.mxu1  ;;  %v4001_v18 = vpop.f32.mrf.mxu0 }
 0x1cd   : > { %v4038_v2 = vpop.f32.mrf.mxu1  ;;  %v4002_v20 = vpop.f32.mrf.mxu0 }
 0x1ce   : > { %v6766_v11 = vadd.f32 %v4038_v2, %v4037_v9 }
 0x1cf   : > { %v4040_v13 = vpop.f32.mrf.mxu1  ;;  %v4004_v22 = vpop.f32.mrf.mxu0 }
 0x1d1   : > { %v4041_v4 = vpop.f32.mrf.mxu1  ;;  %v4005_v24 = vpop.f32.mrf.mxu0 }
 0x1d2   : > { %v6768_v6 = vadd.f32 %v4041_v4, %v4040_v13 }
 0x1d3   : > { %v4043_v17 = vpop.f32.mrf.mxu1  ;;  %v4007_v26 = vpop.f32.mrf.mxu0 }
 0x1d5   : > { %v4044_v19 = vpop.f32.mrf.mxu1 }
 0x1d6   : > { %v6770_v34 = vadd.f32 %v4044_v19, %v4043_v17  ;;  %v4008_v19 = vpop.f32.mrf.mxu0 }
 0x1d7   : > { %v4046_v15 = vpop.f32.mrf.mxu1 }
 0x1d8   : > { %v4010_v44 = vpop.f32.mrf.mxu0 }
 0x1d9   : > { %v4047_v21 = vpop.f32.mrf.mxu1 }
 0x1da   : > { %v6772_v33 = vadd.f32 %v4047_v21, %v4046_v15  ;;  %v3994_v21 = vadd.f32 %v3993_v12, %v3992_v14 }
 0x1db   : > { %v4049_v7 = vpop.f32.mrf.mxu1 }
 0x1dd   : > { %v4050_v23 = vpop.f32.mrf.mxu1 }
 0x1de   : > { %v6774_v9 = vadd.f32 %v4050_v23, %v4049_v7 }
 0x1df   : > { %v4052_v2 = vpop.f32.mrf.mxu1 }
 0x1e1   : > { %v4053_v25 = vpop.f32.mrf.mxu1 }
 0x1e2   : > { %v6776_v13 = vadd.f32 %v4053_v25, %v4052_v2  ;;  %v4011_v25 = vpop.f32.mrf.mxu0 }
 0x1e3   : > { %v4071_v4 = vpop.f32.mrf.mxu1 }
 0x1e4   : > { %v4013_v14 = vpop.f32.mrf.mxu0 }
 0x1e5   : > { %v4072_v27 = vpop.f32.mrf.mxu1 }
 0x1e6   : > { %v4073_v28 = vadd.f32 %v4072_v27, %v4071_v4  ;;  %v3997_v27 = vadd.f32 %v3996_v49, %v3995_v1 }
 0x1e7   : > { %v4074_v17 = vpop.f32.mrf.mxu1 }
 0x1e8   : > { %v938_v45 = vadd.f32 %v4073_v28, %v3991_v30 }
 0x1e9   : > { %v4075_v29 = vpop.f32.mrf.mxu1 }
 0x1ea   : > { %v4076_v15 = vadd.f32 %v4075_v29, %v4074_v17 }
 0x1eb   : > { %v4077_v31 = vpop.f32.mrf.mxu1 }
 0x1ec   : > { %v941_v23 = vadd.f32 %v4076_v15, %v3994_v21  ;;  %v4006_v15 = vadd.f32 %v4005_v24, %v4004_v22 }
 0x1ed   : > { %v4078_v7 = vpop.f32.mrf.mxu1 }
 0x1ee   : > { %v1024_v46 = vpack.c.bf16 %v941_v23, %v938_v45  ;;  %v4079_v2 = vadd.f32 %v4078_v7, %v4077_v31  ;;  %v4014_v45 = vpop.f32.mrf.mxu0 }
 0x1ef   : > { %v4080_v47 = vpop.f32.mrf.mxu1 }
 0x1f0   : > { %4217 = vmatmul.mubr.msk.bf16.vlgmr.msra.gmra.mxu0 %vm1038_vm2, %v1024_v46  ;;  %v946_v12 = vadd.f32 %v4079_v2, %v3997_v27  ;;  %v4003_v46 = vadd.f32 %v4002_v20, %v4001_v18 }
 0x1f1   : > { %v4081_v58 = vpop.f32.mrf.mxu1  ;;  %4220 = vmatprep.mubr.msk.bf16.mxu0 %vm6033_vm1, %v8638_v59 }
 0x1f2   : > { %v4082_v5 = vadd.f32 %v4081_v58, %v4080_v47  ;;  %v4016_v47 = vpop.f32.mrf.mxu0 }
 0x1f3   : > { %v4083_v29 = vpop.f32.mrf.mxu1 }
 0x1f4   : > { %v949_v28 = vadd.f32 %v4082_v5, %v4000_v3  ;;  %v4017_v2 = vpop.f32.mrf.mxu0  ;;  %v4009_v5 = vadd.f32 %v4008_v19, %v4007_v26 }
 0x1f5   : > { %v4084_v30 = vpop.f32.mrf.mxu1 }
 0x1f6   : > { %v1025_v4 = vpack.c.bf16 %v949_v28, %v946_v12  ;;  %v4085_v21 = vadd.f32 %v4084_v30, %v4083_v29  ;;  %v4012_v29 = vadd.f32 %v4011_v25, %v4010_v44  ;;  %v4019_v22 = vpop.f32.mrf.mxu0 }
 0x1f7   : > { %v4086_v17 = vpop.f32.mrf.mxu1 }
 0x1f8   : > { %4221 = vmatmul.mubr.msk.bf16.gmra.mxu0 %vm1038_vm2, %v1025_v4  ;;  %v954_v58 = vadd.f32 %v4085_v21, %v4003_v46  ;;  %v4015_v46 = vadd.f32 %v4014_v45, %v4013_v14 }
 0x1f9   : > { %v4087_v31 = vpop.f32.mrf.mxu1  ;;  %4224 = vmatprep.mubr.msk.bf16.mxu0 %vm6033_vm1, %v8638_v59 }
 0x1fa   : > { %v4088_v1 = vadd.f32 %v4087_v31, %v4086_v17  ;;  %v4020_v17 = vpop.f32.mrf.mxu0 }
 0x1fb   : > { %v4089_v16 = vpop.f32.mrf.mxu1 }
 0x1fc   : > { %v957_v49 = vadd.f32 %v4088_v1, %v4006_v15  ;;  %v4018_v15 = vadd.f32 %v4017_v2, %v4016_v47  ;;  %v4022_v44 = vpop.f32.mrf.mxu0 }
 0x1fd   : > { %v4090_v48 = vpop.f32.mrf.mxu1 }
 0x1fe   : > { %v1026_v23 = vpack.c.bf16 %v957_v49, %v954_v58  ;;  %v4091_v27 = vadd.f32 %v4090_v48, %v4089_v16  ;;  %v4023_v49 = vpop.f32.mrf.mxu0 }
 0x1ff   : > { %v4092_v7 = vpop.f32.mrf.mxu1 }
 0x200   : > { %4225 = vmatmul.mubr.msk.bf16.gmra.mxu0 %vm1038_vm2, %v1026_v23  ;;  %v962_v24 = vadd.f32 %v4091_v27, %v4009_v5  ;;  %v4021_v27 = vadd.f32 %v4020_v17, %v4019_v22 }
 0x201   : > { %v4093_v3 = vpop.f32.mrf.mxu1  ;;  %4228 = vmatprep.mubr.msk.bf16.mxu0 %vm6033_vm1, %v8638_v59 }
 0x202   : > { %v4094_v18 = vadd.f32 %v4093_v3, %v4092_v7  ;;  %v4024_v3 = vadd.f32 %v4023_v49, %v4022_v44 }
 0x203   : > { %v4095_v20 = vpop.f32.mrf.mxu1 }
 0x204   : > { %v965_v12 = vadd.f32 %v4094_v18, %v4012_v29 }
 0x205   : > { %v4096_v28 = vpop.f32.mrf.mxu1 }
 0x206   : > { %v1027_v30 = vpack.c.bf16 %v965_v12, %v962_v24  ;;  %v4097_v21 = vadd.f32 %v4096_v28, %v4095_v20 }
 0x207   : > { %v4098_v4 = vpop.f32.mrf.mxu1 }
 0x208   : > { %4229 = vmatmul.mubr.msk.bf16.gmra.mxu0 %vm1038_vm2, %v1027_v30  ;;  %v970_v25 = vadd.f32 %v4097_v21, %v4015_v46 }
 0x209   : > { %v4099_v31 = vpop.f32.mrf.mxu1  ;;  %4232 = vmatprep.mubr.msk.bf16.mxu0 %vm6033_vm1, %v8638_v59 }
 0x20a   : > { %v4100_v26 = vadd.f32 %v4099_v31, %v4098_v4 }
 0x20b   : > { %v4101_v19 = vpop.f32.mrf.mxu1 }
 0x20c   : > { %v973_v1 = vadd.f32 %v4100_v26, %v4018_v15 }
 0x20d   : > { %v4102_v16 = vpop.f32.mrf.mxu1 }
 0x20e   : > { %v1028_v58 = vpack.c.bf16 %v973_v1, %v970_v25  ;;  %v4103_v23 = vadd.f32 %v4102_v16, %v4101_v19 }
 0x20f   : > { %v4104_v48 = vpop.f32.mrf.mxu1 }
 0x210   : > { %4233 = vmatmul.mubr.msk.bf16.gmra.mxu0 %vm1038_vm2, %v1028_v58  ;;  %v978_v47 = vadd.f32 %v4103_v23, %v4021_v27 }
 0x211   : > { %v4105_v7 = vpop.f32.mrf.mxu1  ;;  %4236 = vmatprep.mubr.msk.bf16.mxu0 %vm6033_vm1, %v8638_v59 }
 0x212   : > { %v4106_v14 = vadd.f32 %v4105_v7, %v4104_v48 }
 0x213   : > { %v4107_v45 = vpop.f32.mrf.mxu1 }
 0x214   : > { %v981_v2 = vadd.f32 %v4106_v14, %v4024_v3 }
 0x215   : > { %v4108_v5 = vpop.f32.mrf.mxu1 }
 0x216   : > { %v1029_v29 = vpack.c.bf16 %v981_v2, %v978_v47  ;;  %v4109_v20 = vadd.f32 %v4108_v5, %v4107_v45 }
 0x217   : > { %v4110_v18 = vpop.f32.mrf.mxu1 }
 0x218   : > { %4237 = vmatmul.mubr.msk.bf16.gmra.mxu0 %vm1038_vm2, %v1029_v29  ;;  %v986_v30 = vadd.f32 %v4109_v20, %v6758_v10 }
 0x219   : > { %v4111_v24 = vpop.f32.mrf.mxu1  ;;  %4240 = vmatprep.mubr.msk.bf16.mxu0 %vm6033_vm1, %v8638_v59 }
 0x21a   : > { %v4112_v12 = vadd.f32 %v4111_v24, %v4110_v18 }
 0x21b   : > { %v4113_v28 = vpop.f32.mrf.mxu1 }
 0x21c   : > { %v989_v22 = vadd.f32 %v4112_v12, %v6760_v0 }
 0x21d   : > { %v4114_v4 = vpop.f32.mrf.mxu1 }
 0x21e   : > { %v1030_v17 = vpack.c.bf16 %v989_v22, %v986_v30  ;;  %v4115_v31 = vadd.f32 %v4114_v4, %v4113_v28 }
 0x21f   : > { %v4116_v21 = vpop.f32.mrf.mxu1 }
 0x220   : > { %4241 = vmatmul.mubr.msk.bf16.gmra.mxu0 %vm1038_vm2, %v1030_v17  ;;  %v994_v44 = vadd.f32 %v4115_v31, %v6762_v32 }
 0x221   : > { %v4117_v46 = vpop.f32.mrf.mxu1  ;;  %4244 = vmatprep.mubr.msk.bf16.mxu0 %vm6033_vm1, %v8638_v59 }
 0x222   : > { %v4118_v15 = vadd.f32 %v4117_v46, %v4116_v21 }
 0x223   : > { %v4119_v26 = vpop.f32.mrf.mxu1 }
 0x224   : > { %v997_v19 = vadd.f32 %v4118_v15, %v6764_v8 }
 0x225   : > { %v4120_v25 = vpop.f32.mrf.mxu1 }
 0x226   : > { %v1031_v10 = vpack.c.bf16 %v997_v19, %v994_v44  ;;  %v4121_v0 = vadd.f32 %v4120_v25, %v4119_v26 }
 0x227   : > { %v4122_v1 = vpop.f32.mrf.mxu1 }
 0x228   : > { %4245 = vmatmul.mubr.msk.bf16.gmra.mxu0 %vm1038_vm2, %v1031_v10  ;;  %v1002_v48 = vadd.f32 %v4121_v0, %v6766_v11 }
 0x229   : > { %v4123_v16 = vpop.f32.mrf.mxu1  ;;  %4248 = vmatprep.mubr.msk.bf16.mxu0 %vm6033_vm1, %v8638_v59 }
 0x22a   : > { %v4124_v58 = vadd.f32 %v4123_v16, %v4122_v1 }
 0x22b   : > { %v4125_v49 = vpop.f32.mrf.mxu1 }
 0x22c   : > { %v1005_v23 = vadd.f32 %v4124_v58, %v6768_v6 }
 0x22d   : > { %v4126_v7 = vpop.f32.mrf.mxu1 }
 0x22e   : > { %v1032_v32 = vpack.c.bf16 %v1005_v23, %v1002_v48  ;;  %v4127_v8 = vadd.f32 %v4126_v7, %v4125_v49 }
 0x22f   : > { %v4128_v27 = vpop.f32.mrf.mxu1 }
 0x230   : > { %4249 = vmatmul.mubr.msk.bf16.gmra.mxu0 %vm1038_vm2, %v1032_v32  ;;  %v1010_v47 = vadd.f32 %v4127_v8, %v6770_v34 }
 0x231   : > { %v4129_v3 = vpop.f32.mrf.mxu1  ;;  %4252 = vmatprep.mubr.msk.bf16.mxu0 %vm6033_vm1, %v8638_v59 }
 0x232   : > { %v4130_v14 = vadd.f32 %v4129_v3, %v4128_v27 }
 0x233   : > { %v4131_v45 = vpop.f32.mrf.mxu1 }
 0x234   : > { %v1013_v2 = vadd.f32 %v4130_v14, %v6772_v33 }
 0x235   : > { %v4132_v5 = vpop.f32.mrf.mxu1 }
 0x236   : > { %v1033_v11 = vpack.c.bf16 %v1013_v2, %v1010_v47  ;;  %v4133_v6 = vadd.f32 %v4132_v5, %v4131_v45 }
 0x237   : > { %v4134_v29 = vpop.f32.mrf.mxu1 }
 0x238   : > { %4253 = vmatmul.mubr.msk.bf16.gmra.mxu0 %vm1038_vm2, %v1033_v11  ;;  %v1018_v24 = vadd.f32 %v4133_v6, %v6774_v9 }
 0x239   : > { %v4135_v18 = vpop.f32.mrf.mxu1  ;;  %4256 = vmatprep.mubr.msk.bf16.mxu0 %vm6033_vm1, %v8638_v59 }
 0x23a   : > { %v4136_v20 = vadd.f32 %v4135_v18, %v4134_v29 }
 0x23c   : > { %v1021_v12 = vadd.f32 %v4136_v20, %v6776_v13  ;;  %v8656_v20 = vld [vmem:[#allocation96_spill] sm:$0xff] }
 0x23e   : > { %v1034_v28 = vpack.c.bf16 %v1021_v12, %v1018_v24 }
 0x240   : > { %4257 = vmatmul.mubr.msk.bf16.gmra.mxu0 %vm1038_vm2, %v1034_v28  ;;  %v8658_v28 = vld [vmem:[#allocation95_spill] sm:$0xff] }
 0x2b0   : > { %v1110_v34 = vpop.f32.mrf.mxu0 }
 0x2b1   : > { %v6820_v43 = vadd.f32 %v5827_v43, %v1110_v34  }
 0x2b2   : > { %v4218_v33 = vpop.f32.mrf.mxu0 }
 0x2b3   : > { %v8639_v30 = vmov %v6820_v43 }
 0x2b4   : > { %v1113_v22 = vpop.f32.mrf.mxu0  ;;  %v1270_v62 = vmul.f32 (%p6886_p9), %v8639_v30, %v8639_v30 }
 0x2b5   : > { %v6823_v42 = vadd.f32 %v5823_v42, %v1113_v22  }
 0x2b6   : > { %v4219_v17 = vpop.f32.mrf.mxu0 }
 0x2b7   : > { %v8640_v4 = vmov %v6823_v42  ;;  %v8660_v17 = vld [vmem:[#allocation94_spill] sm:$0xff] }
 0x2b8   : > { %v1118_v21 = vpop.f32.mrf.mxu0 }
 0x2b9   : > { %v6826_v57 = vadd.f32 %v5819_v57, %v1118_v21  }
 0x2ba   : > { %v4222_v9 = vpop.f32.mrf.mxu0 }
 0x2bb   : > { %v8641_v59 = vmov %v6826_v57 }
 0x2bc   : > { %v1121_v31 = vpop.f32.mrf.mxu0 }
 0x2bd   : > { %v6829_v56 = vadd.f32 %v5815_v56, %v1121_v31   ;;  %v8662_v31 = vld [vmem:[#allocation93_spill] sm:$0xff] }
 0x2be   : > { %v4223_v46 = vpop.f32.mrf.mxu0 }
 0x2bf   : > { %v8642_v13 = vmov %v6829_v56 }
 0x2c0   : > { %v1126_v15 = vpop.f32.mrf.mxu0 }
 0x2c1   : > { %v6832_v41 = vadd.f32 %v5811_v41, %v1126_v15  }
 0x2c2   : > { %v4226_v43 = vpop.f32.mrf.mxu0 }
 0x2c3   : > { %v8643_v26 = vmov %v6832_v41  ;;  %v8664_v43 = vld [vmem:[#allocation92_spill] sm:$0xff] }
 0x2c4   : > { %v1129_v44 = vpop.f32.mrf.mxu0 }
 0x2c5   : > { %v6835_v40 = vadd.f32 %v5807_v40, %v1129_v44  }
 0x2c6   : > { %v4227_v42 = vpop.f32.mrf.mxu0 }
 0x2c7   : > { %v8644_v19 = vmov %v6835_v40  ;;  %v8687_v42 = vmov %v8640_v4 }
 0x2c8   : > { %v1134_v25 = vpop.f32.mrf.mxu0  ;;  %v1229_v60 = vsel (%p6886_p9), %vm8484_vm3, %v8644_v19, 0.0  ;;  %v1271_v42 = vmul.f32 (%p6886_p9), %v8640_v4, %v8640_v4 }
 0x2c9   : > { %v6838_v55 = vadd.f32 %v5803_v55, %v1134_v25   ;;  %v1220_v25 = vsel (%p6886_p9), %vm8484_vm3, %v8639_v30, 0.0 }
 0x2ca   : > { %v4230_v57 = vpop.f32.mrf.mxu0 }
 0x2cb   : > { %v8645_v10 = vmov %v6838_v55  ;;  %v8686_v57 = vmov %v8641_v59 }
 0x2cc   : > { %v1137_v1 = vpop.f32.mrf.mxu0  ;;  %v1231_v63 = vsel (%p6886_p9), %vm8484_vm3, %v8645_v10, 0.0  ;;  %v1272_v57 = vmul.f32 (%p6886_p9), %v8641_v59, %v8641_v59 }
 0x2cd   : > { %v6841_v54 = vadd.f32 %v5799_v54, %v1137_v1   ;;  %v1221_v1 = vsel (%p6886_p9), %vm8484_vm3, %v8640_v4, 0.0 }
 0x2ce   : > { %v4231_v56 = vpop.f32.mrf.mxu0 }
 0x2cf   : > { %v8646_v0 = vmov %v6841_v54  ;;  %v8685_v56 = vmov %v8642_v13 }
 0x2d0   : > { %v1142_v16 = vpop.f32.mrf.mxu0 }
 0x2d1   : > { %v6844_v39 = vadd.f32 %v5795_v39, %v1142_v16   ;;  %v1223_v16 = vsel (%p6886_p9), %vm8484_vm3, %v8641_v59, 0.0 }
 0x2d2   : > { %v4234_v41 = vpop.f32.mrf.mxu0 }
 0x2d3   : > { %v8647_v58 = vmov %v6844_v39  ;;  %v8684_v41 = vmov %v8643_v26 }
 0x2d4   : > { %v1145_v49 = vpop.f32.mrf.mxu0  ;;  %v1233_v41 = vsel (%p6886_p9), %vm8484_vm3, %v8646_v0, 0.0 }
 0x2d5   : > { %v6847_v38 = vadd.f32 %v5791_v38, %v1145_v49  }
 0x2d6   : > { %v4235_v40 = vpop.f32.mrf.mxu0 }
 0x2d7   : > { %v8648_v23 = vmov %v6847_v38  ;;  %v8683_v40 = vmov %v8644_v19 }
 0x2d8   : > { %v1150_v48 = vpop.f32.mrf.mxu0 }
 0x2d9   : > { %v6850_v53 = vadd.f32 %v5787_v53, %v1150_v48  }
 0x2da   : > { %v4238_v55 = vpop.f32.mrf.mxu0 }
 0x2db   : > { %v8649_v7 = vmov %v6850_v53  ;;  %v8682_v55 = vmov %v8645_v10 }
 0x2dc   : > { %v1153_v32 = vpop.f32.mrf.mxu0  ;;  %v1235_v55 = vsel (%p6886_p9), %vm8484_vm3, %v8647_v58, 0.0 }
 0x2dd   : > { %v6853_v52 = vadd.f32 %v5783_v52, %v1153_v32  }
 0x2de   : > { %v4239_v54 = vpop.f32.mrf.mxu0 }
 0x2df   : > { %v8650_v27 = vmov %v6853_v52  ;;  %v8681_v54 = vmov %v8646_v0 }
 0x2e0   : > { %v1158_v8 = vpop.f32.mrf.mxu0  ;;  %v1293_v54 = vsel (%p6886_p9), %vm8484_vm3, %v1271_v42, 0.0 }
 0x2e1   : > { %v6856_v37 = vadd.f32 %v5779_v37, %v1158_v8   ;;  %v1222_v8 = vadd.f32 (%p6886_p9), %v1221_v1, %v1220_v25 }
 0x2e2   : > { %v4242_v39 = vpop.f32.mrf.mxu0 }
 0x2e3   : > { %v8651_v3 = vmov %v6856_v37  ;;  %v8680_v39 = vmov %v8647_v58 }
 0x2e4   : > { %v1161_v14 = vpop.f32.mrf.mxu0  ;;  %v1295_v39 = vsel (%p6886_p9), %vm8484_vm3, %v1272_v57, 0.0 }
 0x2e5   : > { %v6859_v36 = vadd.f32 %v5775_v36, %v1161_v14   ;;  %v1225_v14 = vsel (%p6886_p9), %vm8484_vm3, %v8642_v13, 0.0 }
 0x2e6   : > { %v4243_v38 = vpop.f32.mrf.mxu0 }
 0x2e7   : > { %v8652_v45 = vmov %v6859_v36  ;;  %v8679_v38 = vmov %v8648_v23 }
 0x2e8   : > { %v1166_v47 = vpop.f32.mrf.mxu0 }
 0x2e9   : > { %v6862_v51 = vadd.f32 %v5771_v51, %v1166_v47   ;;  %v1224_v47 = vadd.f32 (%p6886_p9), %v1223_v16, %v1222_v8  ;;  %v1245_v8 = vsel (%p6886_p9), %vm8484_vm3, %v8652_v45, 0.0 }
 0x2ea   : > { %v4246_v53 = vpop.f32.mrf.mxu0 }
 0x2eb   : > { %v8653_v2 = vmov %v6862_v51  ;;  %v8678_v53 = vmov %v8649_v7 }
 0x2ec   : > { %v1169_v5 = vpop.f32.mrf.mxu0 }
 0x2ed   : > { %v6865_v50 = vadd.f32 %v5767_v50, %v1169_v5   ;;  %v1227_v5 = vsel (%p6886_p9), %vm8484_vm3, %v8643_v26, 0.0 }
 0x2ee   : > { %v4247_v52 = vpop.f32.mrf.mxu0 }
 0x2ef   : > { %v8654_v11 = vmov %v6865_v50  ;;  %v8677_v52 = vmov %v8650_v27 }
 0x2f0   : > { %v1174_v29 = vpop.f32.mrf.mxu0  ;;  %v1237_v52 = vsel (%p6886_p9), %vm8484_vm3, %v8648_v23, 0.0  ;;  %v1249_v57 = vsel (%p6886_p9), %vm8484_vm3, %v8654_v11, 0.0 }
 0x2f1   : > { %v6868_v35 = vadd.f32 %v5763_v35, %v1174_v29   ;;  %v1226_v29 = vadd.f32 (%p6886_p9), %v1225_v14, %v1224_v47  ;;  %v1279_v14 = vmul.f32 (%p6886_p9), %v8648_v23, %v8648_v23 }
 0x2f2   : > { %v4250_v37 = vpop.f32.mrf.mxu0 }
 0x2f3   : > { %v8655_v6 = vmov %v6868_v35  ;;  %v8676_v37 = vmov %v8651_v3  ;;  %v1228_v61 = vadd.f32 (%p6886_p9), %v1227_v5, %v1226_v29 }
 0x2f4   : > { %v1177_v18 = vpop.f32.mrf.mxu0  ;;  %v1275_v37 = vmul.f32 (%p6886_p9), %v8644_v19, %v8644_v19 }
 0x2f5   : > { %v6871_v34 = vadd.f32 %v8656_v20, %v1177_v18   ;;  %v1230_v56 = vadd.f32 (%p6886_p9), %v1229_v60, %v1228_v61  ;;  %v1247_v60 = vsel (%p6886_p9), %vm8484_vm3, %v8653_v2, 0.0  ;;  %v1280_v61 = vmul.f32 (%p6886_p9), %v8649_v7, %v8649_v7 }
 0x2f6   : > { %v4251_v36 = vpop.f32.mrf.mxu0 }
 0x2f7   : > { %v8657_v24 = vmov %v6871_v34  ;;  %v8675_v36 = vmov %v8652_v45  ;;  %v1232_v40 = vadd.f32 (%p6886_p9), %v1231_v63, %v1230_v56  ;;  %v1281_v56 = vmul.f32 (%p6886_p9), %v8650_v27, %v8650_v27 }
 0x2f8   : > { %v1182_v12 = vpop.f32.mrf.mxu0 }
 0x2f9   : > { %v6874_v49 = vadd.f32 %v8658_v28, %v1182_v12   ;;  %v1234_v38 = vadd.f32 (%p6886_p9), %v1233_v41, %v1232_v40  ;;  %v1239_v12 = vsel (%p6886_p9), %vm8484_vm3, %v8649_v7, 0.0  ;;  %v1276_v28 = vmul.f32 (%p6886_p9), %v8645_v10, %v8645_v10 }
 0x2fa   : > { %v4254_v51 = vpop.f32.mrf.mxu0  ;;  %v1309_v41 = vsel (%p6886_p9), %vm8484_vm3, %v1279_v14, 0.0 }
 0x2fb   : > { %v8659_v22 = vmov %v6874_v49  ;;  %v8674_v51 = vmov %v8653_v2  ;;  %v1236_v20 = vadd.f32 (%p6886_p9), %v1235_v55, %v1234_v38  ;;  %v1303_v25 = vsel (%p6886_p9), %vm8484_vm3, %v1276_v28, 0.0 }
 0x2fc   : > { %v1185_v33 = vpop.f32.mrf.mxu0  ;;  %v8670_v49 = vmov %v8659_v22  ;;  %v1282_v55 = vmul.f32 (%p6886_p9), %v8651_v3, %v8651_v3  ;;  %v1253_v38 = vsel (%p6886_p9), %vm8484_vm3, %v8657_v24, 0.0 }
 0x2fd   : > { %v6877_v48 = vadd.f32 %v8660_v17, %v1185_v33   ;;  %v1273_v49 = vmul.f32 (%p6886_p9), %v8642_v13, %v8642_v13 }
 0x2fe   : > { %v4255_v50 = vpop.f32.mrf.mxu0 }
 0x2ff   : > { %v8661_v21 = vmov %v6877_v48  ;;  %v8673_v50 = vmov %v8654_v11  ;;  %v1297_v18 = vsel (%p6886_p9), %vm8484_vm3, %v1273_v49, 0.0 }
 0x300   : > { %v1190_v9 = vpop.f32.mrf.mxu0  ;;  %v8669_v48 = vmov %v8661_v21  ;;  %v1241_v50 = vsel (%p6886_p9), %vm8484_vm3, %v8650_v27, 0.0 }
 0x301   : > { %v6880_v33 = vadd.f32 %v8662_v31, %v1190_v9   ;;  %v1292_v48 = vsel (%p6886_p9), %vm8484_vm3, %v1270_v62, 0.0  ;;  %v1277_v9 = vmul.f32 (%p6886_p9), %v8646_v0, %v8646_v0  ;;  %v1301_v31 = vsel (%p6886_p9), %vm8484_vm3, %v1275_v37, 0.0 }
 0x302   : > { %v4258_v35 = vpop.f32.mrf.mxu0  ;;  %v1294_v53 = vadd.f32 (%p6886_p9), %v1293_v54, %v1292_v48  ;;  %v1251_v48 = vsel (%p6886_p9), %vm8484_vm3, %v8655_v6, 0.0 }
 0x303   : > { %v8663_v46 = vmov %v6880_v33  ;;  %v8672_v35 = vmov %v8655_v6  ;;  %v1305_v47 = vsel (%p6886_p9), %vm8484_vm3, %v1277_v9, 0.0 }
 0x304   : > { %v1193_v15 = vpop.f32.mrf.mxu0  ;;  %v8668_v33 = vmov %v8663_v46  ;;  %299 = sbr.rel (!%p6886_p9) target bundleno = 216 (0xd8), region = 213  ;;  %v1296_v36 = vadd.f32 (%p6886_p9), %v1295_v39, %v1294_v53  ;;  %v1283_v53 = vmul.f32 (%p6886_p9), %v8652_v45, %v8652_v45 }
 0x305   : > { %v6883_v32 = vadd.f32 %v8664_v43, %v1193_v15   ;;  %v8688_v43 = vmov %v8639_v30  ;;  %v1238_v33 = vadd.f32 (%p6886_p9), %v1237_v52, %v1236_v20  ;;  %v1313_v52 = vsel (%p6886_p9), %vm8484_vm3, %v1281_v56, 0.0 }
 0x306   : > { %v4259_v34 = vpop.f32.mrf.mxu0  ;;  %v1298_v17 = vadd.f32 (%p6886_p9), %v1297_v18, %v1296_v36  ;;  %v1243_v43 = vsel (%p6886_p9), %vm8484_vm3, %v8651_v3, 0.0  ;;  %v1255_v20 = vsel (%p6886_p9), %vm8484_vm3, %v8659_v22, 0.0  ;;  %v1284_v36 = vmul.f32 (%p6886_p9), %v8653_v2, %v8653_v2 }
 0x307   : > { %v8665_v44 = vmov %v6883_v32  ;;  %v8671_v34 = vmov %v8657_v24  ;;  %v1240_v35 = vadd.f32 (%p6886_p9), %v1239_v12, %v1238_v33  ;;  %v1315_v12 = vsel (%p6886_p9), %vm8484_vm3, %v1282_v55, 0.0 }
 0x308   : > { %v8667_v32 = vmov %v8665_v44  ;;  %v1278_v34 = vmul.f32 (%p6886_p9), %v8647_v58, %v8647_v58  ;;  %v1257_v33 = vsel (%p6886_p9), %vm8484_vm3, %v8661_v21, 0.0  ;;  %v1290_v56 = vmul.f32 (%p6886_p9), %v8663_v46, %v8663_v46 }
 0x309   :  { %v1274_v32 = vmul.f32 %v8643_v26, %v8643_v26  ;;  %v1242_v1 = vadd.f32 %v1241_v50, %v1240_v35  ;;  %v1317_v50 = vsel %vm8484_vm3, %v1283_v53, 0.0  ;;  %v1259_v35 = vsel %vm8484_vm3, %v8663_v46, 0.0 }
 0x30a   :  { %v1307_v62 = vsel %vm8484_vm3, %v1278_v34, 0.0 }
 0x30b   :  { %v1299_v51 = vsel %vm8484_vm3, %v1274_v32, 0.0  ;;  %v1244_v5 = vadd.f32 %v1243_v43, %v1242_v1  ;;  %v1311_v32 = vsel %vm8484_vm3, %v1280_v61, 0.0  ;;  %v1319_v43 = vsel %vm8484_vm3, %v1284_v36, 0.0 }
 0x30c   :  { %v1300_v15 = vadd.f32 %v1299_v51, %v1298_v17  ;;  %v1285_v17 = vmul.f32 %v8654_v11, %v8654_v11  ;;  %v1261_v1 = vsel %vm8484_vm3, %v8665_v44, 0.0 }
 0x30d   :  { %v1246_v63 = vadd.f32 %v1245_v8, %v1244_v5  ;;  %v1288_v5 = vmul.f32 %v8659_v22, %v8659_v22 }
 0x30e   :  { %v1302_v16 = vadd.f32 %v1301_v31, %v1300_v15  ;;  %v1286_v15 = vmul.f32 %v8655_v6, %v8655_v6  ;;  %v1321_v8 = vsel %vm8484_vm3, %v1285_v17, 0.0 }
 0x30f   :  { %v1248_v49 = vadd.f32 %v1247_v60, %v1246_v63 }
 0x310   :  { %v1304_v29 = vadd.f32 %v1303_v25, %v1302_v16  ;;  %v1287_v16 = vmul.f32 %v8657_v24, %v8657_v24 }
 0x311   :  { %v1250_v54 = vadd.f32 %v1249_v57, %v1248_v49 }
 0x312   :  { %v1306_v42 = vadd.f32 %v1305_v47, %v1304_v29  ;;  %v1323_v29 = vsel %vm8484_vm3, %v1286_v15, 0.0  ;;  %v1325_v63 = vsel %vm8484_vm3, %v1287_v16, 0.0 }
 0x313   :  { %v1252_v37 = vadd.f32 %v1251_v48, %v1250_v54  ;;  %v1291_v48 = vmul.f32 %v8665_v44, %v8665_v44 }
 0x314   :  { %v1308_v40 = vadd.f32 %v1307_v62, %v1306_v42  ;;  %v1289_v62 = vmul.f32 %v8661_v21, %v8661_v21 }
 0x315   :  { %v1254_v28 = vadd.f32 %v1253_v38, %v1252_v37 }
 0x316   :  { %v1310_v39 = vadd.f32 %v1309_v41, %v1308_v40  ;;  %v1327_v41 = vsel %vm8484_vm3, %v1288_v5, 0.0  ;;  %v1329_v55 = vsel %vm8484_vm3, %v1289_v62, 0.0 }
 0x317   :  { %v1256_v9 = vadd.f32 %v1255_v20, %v1254_v28 }
 0x318   :  { %v1312_v18 = vadd.f32 %v1311_v32, %v1310_v39  ;;  %v1331_v39 = vsel %vm8484_vm3, %v1290_v56, 0.0 }
 0x319   :  { %v1258_v34 = vadd.f32 %v1257_v33, %v1256_v9 }
 0x31a   :  { %v1314_v51 = vadd.f32 %v1313_v52, %v1312_v18  ;;  %v1333_v52 = vsel %vm8484_vm3, %v1291_v48, 0.0 }
 0x31b   :  { %v1260_v14 = vadd.f32 %v1259_v35, %v1258_v34 }
 0x31c   :  { %v1316_v31 = vadd.f32 %v1315_v12, %v1314_v51 }
 0x31d   :  { %v1262_v60 = vadd.f32 %v1261_v1, %v1260_v14 }
 0x31e   :  { %v1318_v25 = vadd.f32 %v1317_v50, %v1316_v31 }
 0x31f   :  { %v1263_v42 = vrot.slane %v1262_v60, 4 }
 0x320   :  { %v1320_v47 = vadd.f32 %v1319_v43, %v1318_v25 }
 0x321   :  { %v1264_v49 = vadd.f32 %v1263_v42, %v1262_v60 }
 0x322   :  { %v1322_v61 = vadd.f32 %v1321_v8, %v1320_v47 }
 0x323   :  { %v1265_v32 = vrot.slane %v1264_v49, 2 }
 0x324   :  { %v1324_v57 = vadd.f32 %v1323_v29, %v1322_v61 }
 0x325   :  { %v1266_v38 = vadd.f32 %v1265_v32, %v1264_v49  ;;  %v3858_v49 = vld [vmem:[#allocation5] ss:$0 sm:$0xff] }
 0x326   :  { %v1326_v40 = vadd.f32 %v1325_v63, %v1324_v57 }
 0x327   :  { %v1267_v18 = vrot.slane %v1266_v38, 1 }
 0x328   :  { %v1328_v54 = vadd.f32 %v1327_v41, %v1326_v40 }
 0x329   :  { %v1268_v12 = vadd.f32 %v1267_v18, %v1266_v38 }
 0x32a   :  { %v1330_v53 = vadd.f32 %v1329_v55, %v1328_v54 }
 0x32b   :  { %v1269_v33 = vmul.f32 0.0061728396, %v1268_v12 }
 0x32c   :  { %v1332_v37 = vadd.f32 %v1331_v39, %v1330_v53 }
 0x32d   :  { %v1342_v31 = vmul.f32 %v1269_v33, %v1269_v33  ;;  %v1346_v25 = vsub.f32 %v8639_v30, %v1269_v33  ;;  %v1347_v1 = vsub.f32 %v8640_v4, %v1269_v33  ;;  %v1348_v16 = vsub.f32 %v8641_v59, %v1269_v33 }
 0x32e   :  { %v1334_v20 = vadd.f32 %v1333_v52, %v1332_v37  ;;  %v1349_v8 = vsub.f32 %v8642_v13, %v1269_v33  ;;  %v1350_v14 = vsub.f32 %v8643_v26, %v1269_v33  ;;  %v1351_v47 = vsub.f32 %v8644_v19, %v1269_v33 }
 0x32f   :  { %v1352_v5 = vsub.f32 %v8645_v10, %v1269_v33  ;;  %v1353_v29 = vsub.f32 %v8646_v0, %v1269_v33  ;;  %v1354_v60 = vsub.f32 %v8647_v58, %v1269_v33  ;;  %v1355_v61 = vsub.f32 %v8648_v23, %v1269_v33 }
 0x330   :  { %v1335_v36 = vrot.slane %v1334_v20, 4  ;;  %v1356_v30 = vsub.f32 %v8649_v7, %v1269_v33  ;;  %v1357_v4 = vsub.f32 %v8650_v27, %v1269_v33  ;;  %v1358_v59 = vsub.f32 %v8651_v3, %v1269_v33 }
 0x331   :  { %v1359_v13 = vsub.f32 %v8652_v45, %v1269_v33  ;;  %v1360_v26 = vsub.f32 %v8653_v2, %v1269_v33  ;;  %v1361_v19 = vsub.f32 %v8654_v11, %v1269_v33  ;;  %v1362_v10 = vsub.f32 %v8655_v6, %v1269_v33 }
 0x332   :  { %v1336_v28 = vadd.f32 %v1335_v36, %v1334_v20  ;;  %v1363_v0 = vsub.f32 %v8657_v24, %v1269_v33  ;;  %v1364_v58 = vsub.f32 %v8659_v22, %v1269_v33  ;;  %v1365_v23 = vsub.f32 %v8661_v21, %v1269_v33 }
 0x333   :  { %v1366_v7 = vsub.f32 %v8663_v46, %v1269_v33  ;;  %v1367_v27 = vsub.f32 %v8665_v44, %v1269_v33 }
 0x334   :  { %v1337_v51 = vrot.slane %v1336_v28, 2 }
 0x336   :  { %v1338_v17 = vadd.f32 %v1337_v51, %v1336_v28 }
 0x338   :  { %v1339_v50 = vrot.slane %v1338_v17, 1 }
 0x33a   :  { %v1340_v9 = vadd.f32 %v1339_v50, %v1338_v17 }
 0x33c   :  { %v1341_v35 = vmul.f32 0.0061728396, %v1340_v9  ;;  %v3859_v9 = vld [vmem:[#allocation7] ss:$0 sm:$0xff] }
 0x33e   :  { %v1343_v15 = vsub.f32 %v1341_v35, %v1342_v31 }
 0x340   :  { %v1344_v43 = vmax.f32 %v1343_v15, 0.0 }
 0x342   :  { %v1368_v34 = vadd.f32 1e-05, %v1344_v43 }
 0x344   :  { %5117 = vrsqrt.f32 %v1368_v34 }
 0x351   :  { %v5118_v62 = vpop.eup %5117 }
 0x352   :  { %v1370_v3 = vmul.f32 %v5118_v62, %v1346_v25  ;;  %v1371_v63 = vmul.f32 %v5118_v62, %v1347_v1  ;;  %v1372_v45 = vmul.f32 %v5118_v62, %v1348_v16  ;;  %v1373_v42 = vmul.f32 %v5118_v62, %v1349_v8 }
 0x353   :  { %v1374_v2 = vmul.f32 %v5118_v62, %v1350_v14  ;;  %v1375_v57 = vmul.f32 %v5118_v62, %v1351_v47  ;;  %v1376_v11 = vmul.f32 %v5118_v62, %v1352_v5  ;;  %v1377_v56 = vmul.f32 %v5118_v62, %v1353_v29 }
 0x354   :  { %v1378_v41 = vmul.f32 %v5118_v62, %v1354_v60  ;;  %v1379_v6 = vmul.f32 %v5118_v62, %v1355_v61  ;;  %v1380_v24 = vmul.f32 %v5118_v62, %v1356_v30  ;;  %v1381_v40 = vmul.f32 %v5118_v62, %v1357_v4 }
 0x355   :  { %v1382_v22 = vmul.f32 %v5118_v62, %v1358_v59  ;;  %v1383_v48 = vmul.f32 %v5118_v62, %v1359_v13  ;;  %v1384_v21 = vmul.f32 %v5118_v62, %v1360_v26  ;;  %v1385_v55 = vmul.f32 %v5118_v62, %v1361_v19 }
 0x356   :  { %v1386_v46 = vmul.f32 %v5118_v62, %v1362_v10  ;;  %v1387_v32 = vmul.f32 %v5118_v62, %v1363_v0  ;;  %v1388_v44 = vmul.f32 %v5118_v62, %v1364_v58  ;;  %v1389_v54 = vmul.f32 %v5118_v62, %v1365_v23 }
 0x357   :  { %v1390_v39 = vmul.f32 %v5118_v62, %v1366_v7  ;;  %v1391_v38 = vmul.f32 %v5118_v62, %v1367_v27  ;;  %v1398_v53 = vmul.f32 %v3858_v49, %v1370_v3  ;;  %v1399_v52 = vmul.f32 %v3858_v49, %v1371_v63 }
 0x358   :  { %v1400_v37 = vmul.f32 %v3858_v49, %v1372_v45  ;;  %v1401_v18 = vmul.f32 %v3858_v49, %v1373_v42  ;;  %v1402_v20 = vmul.f32 %v3858_v49, %v1374_v2  ;;  %v1403_v36 = vmul.f32 %v3858_v49, %v1375_v57 }
 0x359   :  { %v1404_v12 = vmul.f32 %v3858_v49, %v1376_v11  ;;  %v1405_v28 = vmul.f32 %v3858_v49, %v1377_v56  ;;  %v1406_v51 = vmul.f32 %v3858_v49, %v1378_v41  ;;  %v1407_v33 = vmul.f32 %v3858_v49, %v1379_v6 }
 0x35a   :  { %v1408_v17 = vmul.f32 %v3858_v49, %v1380_v24  ;;  %v1409_v50 = vmul.f32 %v3858_v49, %v1381_v40  ;;  %v1410_v31 = vmul.f32 %v3858_v49, %v1382_v22  ;;  %v1411_v35 = vmul.f32 %v3858_v49, %v1383_v48 }
 0x35b   :  { %v1412_v15 = vmul.f32 %v3858_v49, %v1384_v21  ;;  %v1413_v43 = vmul.f32 %v3858_v49, %v1385_v55  ;;  %v1414_v34 = vmul.f32 %v3858_v49, %v1386_v46  ;;  %v1415_v25 = vmul.f32 %v3858_v49, %v1387_v32 }
 0x35c   :  { %v1416_v1 = vmul.f32 %v3858_v49, %v1388_v44  ;;  %v1417_v16 = vmul.f32 %v3858_v49, %v1389_v54  ;;  %v1418_v8 = vmul.f32 %v3858_v49, %v1390_v39  ;;  %v1419_v14 = vmul.f32 %v3858_v49, %v1391_v38 }
 0x35d   :  { %v1427_v47 = vadd.f32 %v3859_v9, %v1398_v53  ;;  %v1428_v5 = vadd.f32 %v3859_v9, %v1399_v52  ;;  %v1429_v29 = vadd.f32 %v3859_v9, %v1400_v37  ;;  %v7092_v60 = vadd.f32 %v3859_v9, %v1401_v18 }
 0x35e   :  { %v7094_v61 = vadd.f32 %v3859_v9, %v1402_v20  ;;  %v7096_v30 = vadd.f32 %v3859_v9, %v1403_v36  ;;  %v7098_v4 = vadd.f32 %v3859_v9, %v1404_v12  ;;  %v7100_v59 = vadd.f32 %v3859_v9, %v1405_v28 }
 0x35f   :  { %v7102_v13 = vadd.f32 %v3859_v9, %v1406_v51  ;;  %v7104_v26 = vadd.f32 %v3859_v9, %v1407_v33  ;;  %v7106_v19 = vadd.f32 %v3859_v9, %v1408_v17  ;;  %v7108_v62 = vadd.f32 %v3859_v9, %v1409_v50 }
 0x360   :  { %v7110_v10 = vadd.f32 %v3859_v9, %v1410_v31  ;;  %v7112_v0 = vadd.f32 %v3859_v9, %v1411_v35  ;;  %v7114_v58 = vadd.f32 %v3859_v9, %v1412_v15  ;;  %v7116_v23 = vadd.f32 %v3859_v9, %v1413_v43 }
 0x361   :  { %v7118_v7 = vadd.f32 %v3859_v9, %v1414_v34  ;;  %v7120_v27 = vadd.f32 %v3859_v9, %v1415_v25  ;;  %v7122_v3 = vadd.f32 %v3859_v9, %v1416_v1  ;;  %v7124_v63 = vadd.f32 %v3859_v9, %v1417_v16 }
 0x362   :  { %v7126_v45 = vadd.f32 %v3859_v9, %v1418_v8  ;;  %v7128_v42 = vadd.f32 %v3859_v9, %v1419_v14  ;;  %vm1449_vm4 = vcmp.gt.f32.partialorder %v1427_v47, 0.0  ;;  %vm1450_vm5 = vcmp.gt.f32.partialorder %v1428_v5, 0.0 }
 0x363   :  { %vm1451_vm6 = vcmp.gt.f32.partialorder %v1429_v29, 0.0  ;;  %vm1452_vm7 = vcmp.gt.f32.partialorder %v7092_v60, 0.0  ;;  %vm1453_vm8 = vcmp.gt.f32.partialorder %v7094_v61, 0.0  ;;  %vm1454_vm9 = vcmp.gt.f32.partialorder %v7096_v30, 0.0 }
 0x364   :  { %vm1461_vm1 = vcmp.gt.f32.partialorder %v7110_v10, 0.0  ;;  %vm1462_vm2 = vcmp.gt.f32.partialorder %v7112_v0, 0.0  ;;  %vm1463_vm0 = vcmp.gt.f32.partialorder %v7114_v58, 0.0  ;;  %vm1464_vm3 = vcmp.gt.f32.partialorder %v7116_v23, 0.0 }
 0x365   :  { %vm1465_vm10 = vcmp.gt.f32.partialorder %v7118_v7, 0.0  ;;  %vm1466_vm11 = vcmp.gt.f32.partialorder %v7120_v27, 0.0  ;;  %vm1467_vm12 = vcmp.gt.f32.partialorder %v7122_v3, 0.0  ;;  %vm1468_vm13 = vcmp.gt.f32.partialorder %v7124_v63, 0.0 }
 0x366   :  { %vm1469_vm14 = vcmp.gt.f32.partialorder %v7126_v45, 0.0  ;;  %vm1470_vm15 = vcmp.gt.f32.partialorder %v7128_v42, 0.0  ;;  %v1471_v2 = vmul.f32 0.1, %v1427_v47  ;;  %v1472_v57 = vmul.f32 0.1, %v1428_v5 }
 0x367   :  { %v1473_v11 = vmul.f32 0.1, %v1429_v29  ;;  %v1474_v56 = vmul.f32 0.1, %v7092_v60  ;;  %v1475_v41 = vmul.f32 0.1, %v7094_v61 }
 0x368   :  { %v1476_v6 = vmul.f32 0.1, %v7096_v30  ;;  %v1477_v49 = vmul.f32 0.1, %v7098_v4  ;;  %v1478_v24 = vmul.f32 0.1, %v7100_v59  ;;  %v7156_v22 = vsel %vm1449_vm4, %v1427_v47, %v1471_v2 }
 0x369   :  { %v1479_v40 = vmul.f32 0.1, %v7102_v13  ;;  %8689 = vst [vmem:[#allocation32_spill] sm:$0xff] %v7156_v22  ;;  %v1480_v48 = vmul.f32 0.1, %v7104_v26  ;;  %v7162_v46 = vsel %vm1450_vm5, %v1428_v5, %v1472_v57  ;;  %v7168_v39 = vsel %vm1451_vm6, %v1429_v29, %v1473_v11 }
 0x36a   :  { %v1481_v21 = vmul.f32 0.1, %v7106_v19  ;;  %v1482_v55 = vmul.f32 0.1, %v7108_v62  ;;  %8690 = vst [vmem:[#allocation33_spill] sm:$0xff] %v7162_v46  ;;  %v7176_v37 = vsel %vm1452_vm7, %v7092_v60, %v1474_v56  ;;  %v7184_v12 = vsel %vm1453_vm8, %v7094_v61, %v1475_v41 }
 0x36b   :  { %v1483_v32 = vmul.f32 0.1, %v7110_v10  ;;  %v1484_v44 = vmul.f32 0.1, %v7112_v0  ;;  %v1485_v54 = vmul.f32 0.1, %v7114_v58  ;;  %v7190_v51 = vsel %vm1454_vm9, %v7096_v30, %v1476_v6 }
 0x36c   :  { %v1486_v38 = vmul.f32 0.1, %v7116_v23  ;;  %v1487_v53 = vmul.f32 0.1, %v7118_v7  ;;  %v1488_v52 = vmul.f32 0.1, %v7120_v27  ;;  %v7274_v29 = vpack.c.bf16 %v7162_v46, %v7156_v22 }
 0x36d   :  { %v1489_v18 = vmul.f32 0.1, %v7122_v3  ;;  %v1490_v20 = vmul.f32 0.1, %v7124_v63  ;;  %v1491_v36 = vmul.f32 0.1, %v7126_v45  ;;  %v7225_v15 = vsel %vm1461_vm1, %v7110_v10, %v1483_v32 }
 0x36e   :  { %v1492_v28 = vmul.f32 0.1, %v7128_v42  ;;  %vm8691_vm4 = vcmp.gt.f32.partialorder %v7098_v4, 0.0  ;;  %vm8692_vm5 = vcmp.gt.f32.partialorder %v7100_v59, 0.0  ;;  %vm8693_vm6 = vcmp.gt.f32.partialorder %v7102_v13, 0.0 }
 0x36f   :  { %v7195_v33 = vsel %vm8691_vm4, %v7098_v4, %v1477_v49  ;;  %v7200_v17 = vsel %vm8692_vm5, %v7100_v59, %v1478_v24  ;;  %v7205_v50 = vsel %vm8693_vm6, %v7102_v13, %v1479_v40  ;;  %vm8694_vm7 = vcmp.gt.f32.partialorder %v7104_v26, 0.0 }
 0x370   :  { %v7210_v9 = vsel %vm8694_vm7, %v7104_v26, %v1480_v48  ;;  %vm8695_vm8 = vcmp.gt.f32.partialorder %v7106_v19, 0.0  ;;  %vm8696_vm9 = vcmp.gt.f32.partialorder %v7108_v62, 0.0  ;;  %v7230_v43 = vsel %vm1462_vm2, %v7112_v0, %v1484_v44 }
 0x371   :  { %v7215_v31 = vsel %vm8695_vm8, %v7106_v19, %v1481_v21  ;;  %v7220_v35 = vsel %vm8696_vm9, %v7108_v62, %v1482_v55  ;;  %v7235_v34 = vsel %vm1463_vm0, %v7114_v58, %v1485_v54  ;;  %v7240_v25 = vsel %vm1464_vm3, %v7116_v23, %v1486_v38 }
 0x372   :  { %v7245_v1 = vsel %vm1465_vm10, %v7118_v7, %v1487_v53  ;;  %v7250_v16 = vsel %vm1466_vm11, %v7120_v27, %v1488_v52  ;;  %v7255_v8 = vsel %vm1467_vm12, %v7122_v3, %v1489_v18  ;;  %v7260_v14 = vsel %vm1468_vm13, %v7124_v63, %v1490_v20 }
 0x373   :  { %8697 = vst [vmem:[#allocation34_spill] sm:$0xff] %v7245_v1  ;;  %8698 = vst [vmem:[#allocation35_spill] sm:$0xff] %v7250_v16  ;;  %v7265_v47 = vsel %vm1469_vm14, %v7126_v45, %v1491_v36  ;;  %v7270_v5 = vsel %vm1470_vm15, %v7128_v42, %v1492_v28  ;;  %v7278_v60 = vpack.c.bf16 %v7176_v37, %v7168_v39  ;;  %v7316_v0 = vmov 0.0  }
 0x374   :  { %8699 = vst [vmem:[#allocation36_spill] sm:$0xff] %v7255_v8  ;;  %8700 = vst [vmem:[#allocation37_spill] sm:$0xff] %v7260_v14  ;;  %v7282_v61 = vpack.c.bf16 %v7190_v51, %v7184_v12  ;;  %v7286_v30 = vpack.c.bf16 %v7200_v17, %v7195_v33  ;;  %v7290_v4 = vpack.c.bf16 %v7210_v9, %v7205_v50  ;;  %v7318_v58 = vmov 0.0  }
 0x375   :  { %8701 = vst [vmem:[#allocation38_spill] sm:$0xff] %v7265_v47  ;;  %8702 = vst [vmem:[#allocation39_spill] sm:$0xff] %v7270_v5  ;;  %v7294_v59 = vpack.c.bf16 %v7220_v35, %v7215_v31  ;;  %v7298_v13 = vpack.c.bf16 %v7230_v43, %v7225_v15  ;;  %v7302_v26 = vpack.c.bf16 %v7240_v25, %v7235_v34  ;;  %v7320_v23 = vmov 0.0  }
 0x376   :  { %v7306_v19 = vpack.c.bf16 %v7250_v16, %v7245_v1  ;;  %v7310_v62 = vpack.c.bf16 %v7260_v14, %v7255_v8  ;;  %v7314_v10 = vpack.c.bf16 %v7270_v5, %v7265_v47  ;;  %v7322_v7 = vmov 0.0  }
 0x377   :  { %v7324_v27 = vmov 0.0   ;;  %v7326_v3 = vmov 0.0   ;;  %v7328_v63 = vmov 0.0   ;;  %v7330_v45 = vmov 0.0  }
 0x378 LB: > { %v6034_v42 = vmov 0   ;;  %s3965_s12 = sshll.u32 %s5867_s19, 6  ;;  %s8703_s13 = sld [smem:[#allocation99_spill]]  ;;  %vm1587_vm0 = vcmask 392192   ;;  %vm1696_vm3 = vcmask 1040384   ;;  %vm8705_vm10 = vcmask 146432   ;;  %s5867_s19 = sphi %s7332_s19, %s1531_s19   ;;  %v5863_v45 = vphi %v7330_v45, %v8724_v45   ;;  %v5859_v63 = vphi %v7328_v63, %v8723_v63   ;;  %v5855_v3 = vphi %v7326_v3, %v8722_v3   ;;  %v5851_v27 = vphi %v7324_v27, %v8721_v27   ;;  %v5847_v7 = vphi %v7322_v7, %v8720_v7   ;;  %v5843_v23 = vphi %v7320_v23, %v8719_v23   ;;  %v5839_v58 = vphi %v7318_v58, %v8718_v58   ;;  %v5835_v0 = vphi %v7316_v0, %v8717_v0  }
 0x379   : > { %1600 = vmatprep.subr.bf16.mxu0 %v6034_v42  ;;  %4451 = vmatprep.subr.bf16.mxu1 %v6034_v42  ;;  %s3966_s28 = smul.u32 12, %s5867_s19  ;;  %s8704_s21 = sld [smem:[#allocation104_spill]]  ;;  %vm8706_vm11 = vmmov %vm8705_vm10 }
 0x37a   : > { %1601 = vmatpush1.bf16.msra.mxu0 %v7302_v26  ;;  %4462 = vmatpush1.bf16.msra.mxu1 %v7302_v26  ;;  %vm8707_vm12 = vmmov %vm8705_vm10  ;;  %s1531_s19 = sadd.s32 1, %s5867_s19  }
 0x37b   : > { %1602 = vmatprep.subr.bf16.mxu0 %v6034_v42  ;;  %4452 = vmatprep.subr.bf16.mxu1 %v6034_v42  ;;  %vm8708_vm13 = vmmov %vm8705_vm10  ;;  %p1528_p10 = scmp.ge.s32.totalorder %s1531_s19, 16  }
 0x37c   :  { %vm1773_vm14 = vcmask (%p1528_p10), 293888   ;;  %s7526_s30 = smov (%p1528_p10), 0  }
 0x37e   : > { %s7367_s14 = scalar_lea.vmem %s8703_s13, %s3965_s12  ;;  %1603 = vmatpush1.bf16.msra.mxu0 %v7298_v13  ;;  %4463 = vmatpush1.bf16.msra.mxu1 %v7298_v13 }
 0x37f   : > { %v5121_v2 = vld [vmem:[%s7367_s14 + $0x4] ss:$8 sps:$4 sm:$0xff]   ;;  %1604 = vmatprep.subr.bf16.mxu0 %v6034_v42  ;;  %4453 = vmatprep.subr.bf16.mxu1 %v6034_v42  ;;  %v5127_v57 = vld [vmem:[%s7367_s14 + $0x34] ss:$8 sps:$4 sm:$0xff]   ;;  %v5119_v11 = vld [vmem:[%s7367_s14] ss:$8 sps:$4 sm:$0xff]   ;;  %s1671_s7 = scalar_lea.vmem %s8704_s21, %s3966_s28 }
 0x380   : > { %3870 = vmatprep.mubr.msk.bf16.mxu0 %vm1587_vm0, %v5121_v2  ;;  %3873 = vmatprep.mubr.msk.bf16.mxu1 %vm1587_vm0, %v5127_v57  ;;  %v5125_v56 = vld [vmem:[%s7367_s14 + $0x30] ss:$8 sps:$4 sm:$0xff]   ;;  %v5122_v41 = vld [vmem:[%s7367_s14 + $0x14] ss:$8 sps:$4 sm:$0xff]   ;;  %v5128_v49 = vld [vmem:[%s7367_s14 + $0x24] ss:$8 sps:$4 sm:$0xff]  }
 0x381   : > { %v5124_v6 = vld [vmem:[%s7367_s14 + $0x10] ss:$8 sps:$4 sm:$0xff]   ;;  %v5130_v24 = vld [vmem:[%s7367_s14 + $0x20] ss:$8 sps:$4 sm:$0xff]  }
 0x382   : > { %1605 = vmatpush1.bf16.msra.mxu0 %v7294_v59  ;;  %4464 = vmatpush1.bf16.msra.mxu1 %v7294_v59  ;;  %v5131_v40 = vld [vmem:[%s1671_s7 + $0x8] ss:$0 sps:$4 sm:$0x11]   ;;  %v5132_v21 = vld [vmem:[%s1671_s7] sm:$0xff]  }
 0x383   : > { %1606 = vmatprep.subr.bf16.mxu0 %v6034_v42  ;;  %4454 = vmatprep.subr.bf16.mxu1 %v6034_v42  ;;  %v1698_v48 = vsel %vm1696_vm3, %v5131_v40, 0 }
 0x386   : > { %1607 = vmatpush1.bf16.msra.mxu0 %v7290_v4  ;;  %4465 = vmatpush1.bf16.msra.mxu1 %v7290_v4 }
 0x387   : > { %1608 = vmatprep.subr.bf16.mxu0 %v6034_v42  ;;  %4455 = vmatprep.subr.bf16.mxu1 %v6034_v42 }
 0x38a   : > { %1609 = vmatpush1.bf16.msra.mxu0 %v7286_v30  ;;  %4466 = vmatpush1.bf16.msra.mxu1 %v7286_v30 }
 0x38b   : > { %1610 = vmatprep.subr.bf16.mxu0 %v6034_v42  ;;  %4456 = vmatprep.subr.bf16.mxu1 %v6034_v42 }
 0x38e   : > { %1611 = vmatpush1.bf16.msra.mxu0 %v7282_v61  ;;  %4467 = vmatpush1.bf16.msra.mxu1 %v7282_v61 }
 0x38f   : > { %1612 = vmatprep.subr.bf16.mxu0 %v6034_v42  ;;  %4457 = vmatprep.subr.bf16.mxu1 %v6034_v42 }
 0x392   : > { %1613 = vmatpush1.bf16.msra.mxu0 %v7278_v60  ;;  %4468 = vmatpush1.bf16.msra.mxu1 %v7278_v60 }
 0x393   : > { %1614 = vmatprep.subr.bf16.mxu0 %v6034_v42  ;;  %4458 = vmatprep.subr.bf16.mxu1 %v6034_v42 }
 0x396   : > { %1615 = vmatpush1.bf16.msra.mxu0 %v7274_v29  ;;  %4469 = vmatpush1.bf16.msra.mxu1 %v7274_v29 }
 0x397   : > { %1626 = vmatprep.subr.bf16.mxu0 %v6034_v42  ;;  %4459 = vmatprep.subr.bf16.mxu1 %v6034_v42 }
 0x39a   : > { %1627 = vmatpush2.bf16.msra.mxu0 %v7314_v10  ;;  %4470 = vmatpush2.bf16.msra.mxu1 %v7314_v10 }
 0x39b   : > { %1628 = vmatprep.subr.bf16.mxu0 %v6034_v42  ;;  %4460 = vmatprep.subr.bf16.mxu1 %v6034_v42 }
 0x39e   : > { %1629 = vmatpush2.bf16.msra.mxu0 %v7310_v62  ;;  %4471 = vmatpush2.bf16.msra.mxu1 %v7310_v62 }
 0x39f   : > { %1630 = vmatprep.subr.bf16.mxu0 %v6034_v42  ;;  %4461 = vmatprep.subr.bf16.mxu1 %v6034_v42 }
 0x3a2   : > { %1631 = vmatpush2.bf16.msra.mxu0 %v7306_v19  ;;  %4472 = vmatpush2.bf16.msra.mxu1 %v7306_v19 }
 0x3a3   : > { %4473 = vmatprep.subr.msk.bf16.mxu1 %vm1696_vm3, %v5131_v40 }
 0x3a5   : > { %1633 = vmatmul.mubr.bf16.vlgmr.msra.gmra.mxu0 %v5119_v11  ;;  %1657 = vmatmul.mubr.bf16.vlgmr.msra.gmra.mxu1 %v5125_v56 }
 0x3a6   : > { %3871 = vmatprep.mubr.msk.bf16.mxu0 %vm1587_vm0, %v5122_v41  ;;  %4261 = vmatpush3.bf16.msra.mxu1 %v1698_v48 }
 0x3a7   : > { %4262 = vmatprep.subr.bf16.mxu1 %v5132_v21 }
 0x3aa   : > { %4263 = vmatpush3.bf16.msra.mxu1 %v5132_v21 }
 0x3ad   : > { %1641 = vmatmul.mubr.bf16.gmra.mxu0 %v5124_v6 }
 0x3ae   : > { %3872 = vmatprep.mubr.msk.bf16.mxu0 %vm1587_vm0, %v5128_v49 }
 0x3b5   : > { %1649 = vmatmul.mubr.bf16.gmra.mxu0 %v5130_v24 }
 0x465   : > { %v1634_v55 = vpop.f32.mrf.mxu0  ;;  %v1658_v32 = vpop.f32.mrf.mxu1 }
 0x467   : > { %v1636_v44 = vpop.f32.mrf.mxu0  ;;  %v1660_v54 = vpop.f32.mrf.mxu1 }
 0x469   : > { %v1637_v38 = vpop.f32.mrf.mxu0  ;;  %v1661_v53 = vpop.f32.mrf.mxu1 }
 0x46a   : > { %v1665_v52 = vpack.c.bf16 %v1637_v38, %v1634_v55  ;;  %v1668_v49 = vpack.c.bf16 %v1661_v53, %v1658_v32 }
 0x46b   : > { %v1639_v18 = vpop.f32.mrf.mxu0  ;;  %v1663_v20 = vpop.f32.mrf.mxu1 }
 0x46c   : > { %4264 = vmatprep.mubr.msk.bf16.mxu1 %vm8705_vm10, %v1665_v52 }
 0x46d   : > { %v1642_v36 = vpop.f32.mrf.mxu0 }
 0x46f   : > { %v1644_v28 = vpop.f32.mrf.mxu0 }
 0x471   : > { %v1645_v42 = vpop.f32.mrf.mxu0 }
 0x472   : > { %v1666_v2 = vpack.c.bf16 %v1645_v42, %v1642_v36 }
 0x473   : > { %v1647_v57 = vpop.f32.mrf.mxu0 }
 0x474   : > { %4265 = vmatmul.mubr.msk.bf16.vlgmr.msra.gmra.mxu1 %vm8706_vm11, %v1666_v2 }
 0x475   : > { %v1650_v11 = vpop.f32.mrf.mxu0 }
 0x477   : > { %v1652_v56 = vpop.f32.mrf.mxu0 }
 0x479   : > { %v1653_v41 = vpop.f32.mrf.mxu0 }
 0x47a   : > { %v1667_v6 = vpack.c.bf16 %v1653_v41, %v1650_v11 }
 0x47b   : > { %v1655_v24 = vpop.f32.mrf.mxu0 }
 0x47c   : > { %4268 = vmatprep.mubr.msk.bf16.mxu1 %vm8707_vm12, %v1667_v6 }
 0x47d   : > { %4269 = vmatmul.mubr.msk.bf16.gmra.mxu1 %vm8708_vm13, %v1668_v49 }
 0x534   : > { %v4266_v40 = vpop.f32.mrf.mxu1 }
 0x535   : > { %v7410_v3 = vadd.f32 %v5855_v3, %v4266_v40  }
 0x536   : > { %v1734_v21 = vpop.f32.mrf.mxu1 }
 0x537   : > { %v8709_v48 = vmov %v7410_v3  ;;  %v7413_v45 = vadd.f32 %v5863_v45, %v1734_v21  }
 0x538   : > { %v4267_v44 = vpop.f32.mrf.mxu1  ;;  %v1777_v56 = vsel (%p1528_p10), %vm1773_vm14, %v8709_v48, 0.0  ;;  %v1798_v41 = vmul.f32 (%p1528_p10), %v8709_v48, %v8709_v48 }
 0x539   : > { %v8710_v55 = vmov %v7413_v45  ;;  %v7416_v27 = vadd.f32 %v5851_v27, %v4267_v44  }
 0x53a   : > { %v1737_v38 = vpop.f32.mrf.mxu1  ;;  %v1796_v42 = vmul.f32 (%p1528_p10), %v8710_v55, %v8710_v55  ;;  %v1774_v57 = vsel (%p1528_p10), %vm1773_vm14, %v8710_v55, 0.0  ;;  %v1807_v26 = vsel (%p1528_p10), %vm1773_vm14, %v1798_v41, 0.0 }
 0x53b   : > { %v8711_v54 = vmov %v7416_v27  ;;  %v7419_v63 = vadd.f32 %v5859_v63, %v1737_v38  }
 0x53c   : > { %v8721_v27 = vmov %v8711_v54  ;;  %v1779_v29 = vsel (%p1528_p10), %vm1773_vm14, %v8711_v54, 0.0  ;;  %v1799_v60 = vmul.f32 (%p1528_p10), %v8711_v54, %v8711_v54  ;;  %v1804_v30 = vsel (%p1528_p10), %vm1773_vm14, %v1796_v42, 0.0 }
 0x53d   : > { %v8712_v32 = vmov %v7419_v63  ;;  %v4270_v53 = vpop.f32.mrf.mxu1 }
 0x53e   : > { %v7422_v58 = vadd.f32 %v5839_v58, %v4270_v53   ;;  %v8723_v63 = vmov %v8712_v32  ;;  %v1797_v2 = vmul.f32 (%p1528_p10), %v8712_v32, %v8712_v32  ;;  %v1775_v11 = vsel (%p1528_p10), %vm1773_vm14, %v8712_v32, 0.0 }
 0x53f   : > { %v1750_v18 = vpop.f32.mrf.mxu1  ;;  %v1776_v6 = vadd.f32 (%p1528_p10), %v1775_v11, %v1774_v57 }
 0x540   : > { %v8713_v52 = vmov %v7422_v58  ;;  %v7425_v7 = vadd.f32 %v5847_v7, %v1750_v18   ;;  %v1805_v13 = vsel (%p1528_p10), %vm1773_vm14, %v1797_v2, 0.0 }
 0x541   : > { %v4271_v3 = vpop.f32.mrf.mxu1  ;;  %v8718_v58 = vmov %v8713_v52  ;;  %v1778_v61 = vadd.f32 (%p1528_p10), %v1777_v56, %v1776_v6  ;;  %v1806_v62 = vadd.f32 (%p1528_p10), %v1805_v13, %v1804_v30  ;;  %v1785_v27 = vsel (%p1528_p10), %vm1773_vm14, %v8713_v52, 0.0 }
 0x542   : > { %v8714_v20 = vmov %v7425_v7  ;;  %v7428_v0 = vadd.f32 %v5835_v0, %v4271_v3   ;;  %v8722_v3 = vmov %v8709_v48  ;;  %v1809_v58 = vsel (%p1528_p10), %vm1773_vm14, %v1799_v60, 0.0 }
 0x543   : > { %v1753_v45 = vpop.f32.mrf.mxu1  ;;  %v8720_v7 = vmov %v8714_v20  ;;  %1530 = sbr.rel (!%p1528_p10) target bundleno = 888 (0x378), region = 224  ;;  %v1781_v4 = vsel (%p1528_p10), %vm1773_vm14, %v8714_v20, 0.0  ;;  %v1800_v59 = vmul.f32 (%p1528_p10), %v8714_v20, %v8714_v20  ;;  %v1780_v19 = vadd.f32 (%p1528_p10), %v1779_v29, %v1778_v61 }
 0x544   : > { %v8715_v36 = vmov %v7428_v0  ;;  %v7431_v23 = vadd.f32 %v5843_v23, %v1753_v45   ;;  %v8724_v45 = vmov %v8710_v55  ;;  %v1808_v7 = vadd.f32 (%p1528_p10), %v1807_v26, %v1806_v62 }
 0x545   : > { %v8717_v0 = vmov %v8715_v36  ;;  %v1802_v63 = vmul.f32 (%p1528_p10), %v8713_v52, %v8713_v52  ;;  %v1811_v49 = vsel (%p1528_p10), %vm1773_vm14, %v1800_v59, 0.0  ;;  %v1787_v21 = vsel (%p1528_p10), %vm1773_vm14, %v8715_v36, 0.0 }
 0x546   : > { %v8716_v28 = vmov %v7431_v23  ;;  %v1810_v40 = vadd.f32 (%p1528_p10), %v1809_v58, %v1808_v7  ;;  %v1803_v44 = vmul.f32 (%p1528_p10), %v8715_v36, %v8715_v36 }
 0x547   : > { %v8719_v23 = vmov %v8716_v28  ;;  %v1783_v10 = vsel (%p1528_p10), %vm1773_vm14, %v8716_v28, 0.0  ;;  %v1801_v0 = vmul.f32 (%p1528_p10), %v8716_v28, %v8716_v28  ;;  %v1815_v3 = vsel (%p1528_p10), %vm1773_vm14, %v1802_v63, 0.0 }
 0x548   :  { %v1782_v23 = vadd.f32 %v1781_v4, %v1780_v19  ;;  %v1812_v18 = vadd.f32 %v1811_v49, %v1810_v40  ;;  %v1817_v2 = vsel %vm1773_vm14, %v1803_v44, 0.0 }
 0x549   :  { %v1813_v38 = vsel %vm1773_vm14, %v1801_v0, 0.0 }
 0x54a   :  { %v1784_v24 = vadd.f32 %v1783_v10, %v1782_v23  ;;  %v1814_v42 = vadd.f32 %v1813_v38, %v1812_v18  ;;  %v3881_v18 = vld [vmem:[#allocation8] ss:$0 sm:$0xff] }
 0x54c   :  { %v1786_v53 = vadd.f32 %v1785_v27, %v1784_v24  ;;  %v1816_v11 = vadd.f32 %v1815_v3, %v1814_v42 }
 0x54e   :  { %v1788_v45 = vadd.f32 %v1787_v21, %v1786_v53  ;;  %v1818_v41 = vadd.f32 %v1817_v2, %v1816_v11  ;;  %v3882_v11 = vld [vmem:[#allocation10] ss:$0 sm:$0xff] }
 0x550   :  { %v1789_v57 = vrot.slane %v1788_v45, 4  ;;  %v1819_v29 = vrot.slane %v1818_v41, 4 }
 0x552   :  { %v1790_v56 = vadd.f32 %v1789_v57, %v1788_v45  ;;  %v1820_v61 = vadd.f32 %v1819_v29, %v1818_v41 }
 0x554   :  { %v1791_v6 = vrot.slane %v1790_v56, 2  ;;  %v1821_v4 = vrot.slane %v1820_v61, 2 }
 0x556   :  { %v1792_v60 = vadd.f32 %v1791_v6, %v1790_v56  ;;  %v1822_v13 = vadd.f32 %v1821_v4, %v1820_v61 }
 0x558   :  { %v1793_v30 = vrot.slane %v1792_v60, 1  ;;  %v1823_v19 = vrot.slane %v1822_v13, 1 }
 0x55a   :  { %v1794_v59 = vadd.f32 %v1793_v30, %v1792_v60  ;;  %v1824_v62 = vadd.f32 %v1823_v19, %v1822_v13 }
 0x55c   :  { %v1795_v26 = vmul.f32 0.02, %v1794_v59  ;;  %v1825_v0 = vmul.f32 0.02, %v1824_v62 }
 0x55e   :  { %v1826_v10 = vmul.f32 %v1795_v26, %v1795_v26  ;;  %v1830_v27 = vsub.f32 %v8710_v55, %v1795_v26  ;;  %v1831_v63 = vsub.f32 %v8712_v32, %v1795_v26  ;;  %v1832_v49 = vsub.f32 %v8709_v48, %v1795_v26 }
 0x55f   :  { %v1833_v24 = vsub.f32 %v8711_v54, %v1795_v26  ;;  %v1834_v40 = vsub.f32 %v8714_v20, %v1795_v26  ;;  %v1835_v21 = vsub.f32 %v8716_v28, %v1795_v26  ;;  %v1836_v44 = vsub.f32 %v8713_v52, %v1795_v26 }
 0x560   :  { %v1827_v58 = vsub.f32 %v1825_v0, %v1826_v10  ;;  %v1837_v38 = vsub.f32 %v8715_v36, %v1795_v26 }
 0x562   :  { %v1828_v23 = vmax.f32 %v1827_v58, 0.0 }
 0x564   :  { %v1838_v7 = vadd.f32 1e-05, %v1828_v23 }
 0x566   :  { %5133 = vrsqrt.f32 %v1838_v7 }
 0x573   :  { %v5134_v53 = vpop.eup %5133 }
 0x574   :  { %v1840_v3 = vmul.f32 %v5134_v53, %v1830_v27  ;;  %v1841_v45 = vmul.f32 %v5134_v53, %v1831_v63  ;;  %v1842_v42 = vmul.f32 %v5134_v53, %v1832_v49  ;;  %v1843_v55 = vmul.f32 %v5134_v53, %v1833_v24 }
 0x575   :  { %v1844_v2 = vmul.f32 %v5134_v53, %v1834_v40  ;;  %v1845_v32 = vmul.f32 %v5134_v53, %v1835_v21  ;;  %v1846_v57 = vmul.f32 %v5134_v53, %v1836_v44  ;;  %v1847_v48 = vmul.f32 %v5134_v53, %v1837_v38 }
 0x576   :  { %v1854_v54 = vmul.f32 %v3881_v18, %v1840_v3  ;;  %v1855_v56 = vmul.f32 %v3881_v18, %v1841_v45  ;;  %v1856_v20 = vmul.f32 %v3881_v18, %v1842_v42  ;;  %v1857_v41 = vmul.f32 %v3881_v18, %v1843_v55 }
 0x577   :  { %v1858_v28 = vmul.f32 %v3881_v18, %v1844_v2  ;;  %v1859_v6 = vmul.f32 %v3881_v18, %v1845_v32  ;;  %v1860_v52 = vmul.f32 %v3881_v18, %v1846_v57  ;;  %v1861_v29 = vmul.f32 %v3881_v18, %v1847_v48 }
 0x578   :  { %v1869_v36 = vadd.f32 %v3882_v11, %v1854_v54  ;;  %v1870_v60 = vadd.f32 %v3882_v11, %v1855_v56  ;;  %v1871_v61 = vadd.f32 %v3882_v11, %v1856_v20  ;;  %v1872_v30 = vadd.f32 %v3882_v11, %v1857_v41 }
 0x579   :  { %v1873_v4 = vadd.f32 %v3882_v11, %v1858_v28  ;;  %v1874_v59 = vadd.f32 %v3882_v11, %v1859_v6  ;;  %v1875_v13 = vadd.f32 %v3882_v11, %v1860_v52  ;;  %v1876_v26 = vadd.f32 %v3882_v11, %v1861_v29 }
 0x57a   :  { %vm1877_vm15 = vcmp.gt.f32.partialorder %v1869_v36, 0.0  ;;  %vm1878_vm1 = vcmp.gt.f32.partialorder %v1870_v60, 0.0  ;;  %vm1879_vm2 = vcmp.gt.f32.partialorder %v1871_v61, 0.0  ;;  %vm1880_vm4 = vcmp.gt.f32.partialorder %v1872_v30, 0.0 }
 0x57b   :  { %vm1881_vm5 = vcmp.gt.f32.partialorder %v1873_v4, 0.0  ;;  %vm1882_vm6 = vcmp.gt.f32.partialorder %v1874_v59, 0.0  ;;  %vm1883_vm7 = vcmp.gt.f32.partialorder %v1875_v13, 0.0  ;;  %vm1884_vm8 = vcmp.gt.f32.partialorder %v1876_v26, 0.0 }
 0x57c   :  { %v1885_v19 = vmul.f32 0.1, %v1869_v36  ;;  %v1886_v62 = vmul.f32 0.1, %v1870_v60  ;;  %v1887_v10 = vmul.f32 0.1, %v1871_v61 }
 0x57d   :  { %v1888_v0 = vmul.f32 0.1, %v1872_v30  ;;  %v1889_v58 = vmul.f32 0.1, %v1873_v4  ;;  %v1890_v23 = vmul.f32 0.1, %v1874_v59 }
 0x57e   :  { %v1891_v7 = vmul.f32 0.1, %v1875_v13  ;;  %v1892_v27 = vmul.f32 0.1, %v1876_v26  ;;  %v1893_v63 = vsel %vm1877_vm15, %v1869_v36, %v1885_v19  ;;  %v1894_v49 = vsel %vm1878_vm1, %v1870_v60, %v1886_v62 }
 0x57f   :  { %v1895_v24 = vsel %vm1879_vm2, %v1871_v61, %v1887_v10  ;;  %v1896_v40 = vsel %vm1880_vm4, %v1872_v30, %v1888_v0  ;;  %v1897_v21 = vsel %vm1881_vm5, %v1873_v4, %v1889_v58  ;;  %v1898_v44 = vsel %vm1882_vm6, %v1874_v59, %v1890_v23 }
 0x580   :  { %v1899_v38 = vsel %vm1883_vm7, %v1875_v13, %v1891_v7  ;;  %v1900_v53 = vsel %vm1884_vm8, %v1876_v26, %v1892_v27  ;;  %v7516_v18 = vpack.c.bf16 %v1894_v49, %v1893_v63  ;;  %v7518_v3 = vpack.c.bf16 %v1896_v40, %v1895_v24 }
 0x581   :  { %v7520_v45 = vpack.c.bf16 %v1898_v44, %v1897_v21  ;;  %v7522_v42 = vpack.c.bf16 %v1900_v53, %v1899_v38  ;;  %v7524_v55 = vmov 0.0   ;;  %v5873_v2 = vmov 0.0  }
 0x582   :  { %v5877_v32 = vmov 0.0   ;;  %v5881_v57 = vmov 0.0  }
 0x583 LB: > { %4272 = vmatprep.subr.bf16.mxu0 %v7522_v42  ;;  %s3967_s3 = sshll.u32 %s5887_s30, 4  ;;  %s3968_s16 = smul.u32 20, %s5887_s30  ;;  %vm1932_vm9 = vcmask 523264   ;;  %vm8727_vm3 = vcmask 1041408   ;;  %s5887_s30 = sphi %s7526_s30, %s1910_s30   ;;  %v5883_v57 = vphi %v5881_v57, %v5882_v57   ;;  %v5879_v32 = vphi %v5877_v32, %v5878_v32   ;;  %v5875_v2 = vphi %v5873_v2, %v5874_v2   ;;  %v5871_v55 = vphi %v7524_v55, %v8729_v55  }
 0x584   : > { %4273 = vmatpush3.bf16.msra.mxu0 %v7522_v42  ;;  %s8725_s8 = sld [smem:[#allocation100_spill]]  ;;  %vm8728_vm10 = vmmov %vm8727_vm3  ;;  %s1910_s30 = sadd.s32 1, %s5887_s30  }
 0x585   : > { %4274 = vmatprep.subr.bf16.mxu0 %v7520_v45  ;;  %s8726_s1 = sld [smem:[#allocation105_spill]]  ;;  %p1907_p11 = scmp.ge.s32.totalorder %s1910_s30, 16  }
 0x586   :  { %vm2076_vm11 = vcmask (%p1907_p11), 588800   ;;  %s7587_s17 = smov (%p1907_p11), 0  }
 0x588   : > { %4275 = vmatpush3.bf16.msra.mxu0 %v7520_v45 }
 0x589   : > { %4276 = vmatprep.subr.bf16.mxu0 %v7518_v3 }
 0x58a   : > { %s1917_s18 = scalar_lea.vmem %s8725_s8, %s3967_s3 }
 0x58b   : > { %v5135_v48 = vld [vmem:[%s1917_s18] sm:$0xff]   ;;  %s1992_s20 = scalar_lea.vmem %s8726_s1, %s3968_s16  ;;  %v5136_v56 = vld [vmem:[%s1917_s18 + $0x8] sm:$0xff]  }
 0x58c   : > { %4280 = vmatprep.mubr.msk.bf16.mxu0 %vm1932_vm9, %v5135_v48  ;;  %v5137_v11 = vld [vmem:[%s1992_s20 + $0x10] ss:$0 sps:$4 sm:$0x33]   ;;  %4277 = vmatpush3.bf16.msra.mxu0 %v7518_v3  ;;  %v5138_v20 = vld [vmem:[%s1992_s20 + $0x8] sm:$0xff]   ;;  %v5139_v41 = vld [vmem:[%s1992_s20] sm:$0xff]  }
 0x58d   : > { %4474 = vmatprep.subr.msk.bf16.mxu1 %vm8727_vm3, %v5137_v11  ;;  %v2021_v54 = vsel %vm8728_vm10, %v5137_v11, 0  ;;  %4278 = vmatprep.subr.bf16.mxu0 %v7516_v18 }
 0x58e   : > { %4285 = vmatpush3.bf16.msra.mxu1 %v2021_v54 }
 0x58f   : > { %4286 = vmatprep.subr.bf16.mxu1 %v5138_v20 }
 0x590   : > { %4279 = vmatpush3.bf16.msra.mxu0 %v7516_v18 }
 0x592   : > { %4287 = vmatpush3.bf16.msra.mxu1 %v5138_v20 }
 0x593   : > { %4281 = vmatmul.mubr.msk.bf16.vlgmr.msra.gmra.mxu0 %vm1932_vm9, %v5136_v56  ;;  %4288 = vmatprep.subr.bf16.mxu1 %v5139_v41 }
 0x596   : > { %4289 = vmatpush3.bf16.msra.mxu1 %v5139_v41 }
 0x653   : > { %v4282_v28 = vpop.f32.mrf.mxu0 }
 0x655   : > { %v1973_v6 = vpop.f32.mrf.mxu0 }
 0x657   : > { %v4283_v52 = vpop.f32.mrf.mxu0 }
 0x658   : > { %v1989_v60 = vpack.c.bf16 %v4283_v52, %v4282_v28 }
 0x659   : > { %v1976_v29 = vpop.f32.mrf.mxu0 }
 0x65a   : > { %v1988_v36 = vpack.c.bf16 %v1976_v29, %v1973_v6 }
 0x65c   : > { %4290 = vmatprep.mubr.msk.bf16.mxu1 %vm1773_vm14, %v1988_v36 }
 0x65d   : > { %4291 = vmatmul.mubr.msk.bf16.vlgmr.msra.gmra.mxu1 %vm1773_vm14, %v1989_v60 }
 0x71d   : > { %v4292_v61 = vpop.f32.mrf.mxu1 }
 0x71e   : > { %v2074_v30 = vadd.f32 %v5875_v2, %v4292_v61  }
 0x71f   : > { %v2057_v4 = vpop.f32.mrf.mxu1 }
 0x720   : > { %v2072_v59 = vadd.f32 %v5883_v57, %v2057_v4   ;;  %v5874_v2 = vmov %v2074_v30   ;;  %v2093_v58 = vmul.f32 (%p1907_p11), %v2074_v30, %v2074_v30  ;;  %v2080_v27 = vsel (%p1907_p11), %vm2076_vm11, %v2074_v30, 0.0 }
 0x721   : > { %v4293_v13 = vpop.f32.mrf.mxu1 }
 0x722   : > { %v2075_v26 = vadd.f32 %v5871_v55, %v4293_v13   ;;  %v5882_v57 = vmov %v2072_v59   ;;  %1909 = sbr.rel (!%p1907_p11) target bundleno = 1411 (0x583), region = 235  ;;  %v2091_v10 = vmul.f32 (%p1907_p11), %v2072_v59, %v2072_v59  ;;  %v2077_v23 = vsel (%p1907_p11), %vm2076_vm11, %v2072_v59, 0.0 }
 0x723   : > { %v2060_v19 = vpop.f32.mrf.mxu1  ;;  %v2098_v38 = vsel (%p1907_p11), %vm2076_vm11, %v2093_v58, 0.0 }
 0x724   : > { %v2073_v62 = vadd.f32 %v5879_v32, %v2060_v19   ;;  %v8729_v55 = vmov %v2075_v26  ;;  %v2094_v49 = vmul.f32 (%p1907_p11), %v2075_v26, %v2075_v26  ;;  %v2095_v24 = vsel (%p1907_p11), %vm2076_vm11, %v2091_v10, 0.0 }
 0x725   :  { %v2082_v21 = vsel (%p1907_p11), %vm2076_vm11, %v2075_v26, 0.0 }
 0x726   : > { %v5878_v32 = vmov %v2073_v62   ;;  %v2092_v0 = vmul.f32 (%p1907_p11), %v2073_v62, %v2073_v62  ;;  %v2078_v7 = vsel (%p1907_p11), %vm2076_vm11, %v2073_v62, 0.0  ;;  %v2100_v18 = vsel (%p1907_p11), %vm2076_vm11, %v2094_v49, 0.0 }
 0x727   :  { %v2079_v63 = vadd.f32 %v2078_v7, %v2077_v23  ;;  %v3895_v23 = vld [vmem:[#allocation11] ss:$0 sm:$0xff] }
 0x728   :  { %v2096_v40 = vsel %vm2076_vm11, %v2092_v0, 0.0 }
 0x729   :  { %v2097_v44 = vadd.f32 %v2096_v40, %v2095_v24  ;;  %v2081_v53 = vadd.f32 %v2080_v27, %v2079_v63  ;;  %v3896_v24 = vld [vmem:[#allocation13] ss:$0 sm:$0xff] }
 0x72b   :  { %v2099_v3 = vadd.f32 %v2098_v38, %v2097_v44  ;;  %v2083_v45 = vadd.f32 %v2082_v21, %v2081_v53 }
 0x72d   :  { %v2101_v42 = vadd.f32 %v2100_v18, %v2099_v3  ;;  %v2084_v55 = vrot.slane %v2083_v45, 4 }
 0x72f   :  { %v2102_v2 = vrot.slane %v2101_v42, 4  ;;  %v2085_v32 = vadd.f32 %v2084_v55, %v2083_v45 }
 0x731   :  { %v2103_v57 = vadd.f32 %v2102_v2, %v2101_v42  ;;  %v2086_v48 = vrot.slane %v2085_v32, 2 }
 0x733   :  { %v2104_v11 = vrot.slane %v2103_v57, 2  ;;  %v2087_v54 = vadd.f32 %v2086_v48, %v2085_v32 }
 0x735   :  { %v2105_v56 = vadd.f32 %v2104_v11, %v2103_v57  ;;  %v2088_v20 = vrot.slane %v2087_v54, 1  ;;  %v7571_v11 = vmov 0.0  }
 0x737   :  { %v2106_v41 = vrot.slane %v2105_v56, 1  ;;  %v2089_v28 = vadd.f32 %v2088_v20, %v2087_v54  ;;  %v7573_v54 = vmov 0.0   ;;  %v7577_v20 = vmov 0.0  }
 0x739   :  { %v2107_v6 = vadd.f32 %v2106_v41, %v2105_v56  ;;  %v2090_v52 = vmul.f32 0.055555556, %v2089_v28  ;;  %v7575_v56 = vmov 0.0   ;;  %v7579_v41 = vmov 0.0  }
 0x73a   :  { %v7581_v28 = vmov 0.0  }
 0x73b   :  { %v2108_v29 = vmul.f32 0.055555556, %v2107_v6  ;;  %v2109_v36 = vmul.f32 %v2090_v52, %v2090_v52  ;;  %v2113_v13 = vsub.f32 %v2072_v59, %v2090_v52  ;;  %v2114_v19 = vsub.f32 %v2073_v62, %v2090_v52 }
 0x73c   :  { %v2115_v10 = vsub.f32 %v2074_v30, %v2090_v52  ;;  %v2116_v0 = vsub.f32 %v2075_v26, %v2090_v52  ;;  %v7583_v6 = vmov 0.0   ;;  %v7585_v52 = vmov 0.0  }
 0x73d   :  { %v2110_v60 = vsub.f32 %v2108_v29, %v2109_v36 }
 0x73f   :  { %v2111_v61 = vmax.f32 %v2110_v60, 0.0 }
 0x741   :  { %v2117_v4 = vadd.f32 1e-05, %v2111_v61 }
 0x743   :  { %5140 = vrsqrt.f32 %v2117_v4 }
 0x750   :  { %v5141_v58 = vpop.eup %5140 }
 0x751   :  { %v2119_v7 = vmul.f32 %v5141_v58, %v2113_v13  ;;  %v2120_v27 = vmul.f32 %v5141_v58, %v2114_v19  ;;  %v2121_v63 = vmul.f32 %v5141_v58, %v2115_v10  ;;  %v2122_v49 = vmul.f32 %v5141_v58, %v2116_v0 }
 0x753   :  { %v2129_v40 = vmul.f32 %v3895_v23, %v2119_v7  ;;  %v2130_v21 = vmul.f32 %v3895_v23, %v2120_v27  ;;  %v2131_v44 = vmul.f32 %v3895_v23, %v2121_v63  ;;  %v2132_v38 = vmul.f32 %v3895_v23, %v2122_v49 }
 0x755   :  { %v2140_v53 = vadd.f32 %v3896_v24, %v2129_v40  ;;  %v2141_v18 = vadd.f32 %v3896_v24, %v2130_v21  ;;  %v2142_v3 = vadd.f32 %v3896_v24, %v2131_v44  ;;  %v2143_v45 = vadd.f32 %v3896_v24, %v2132_v38 }
 0x757   :  { %vm2144_vm12 = vcmp.gt.f32.partialorder %v2140_v53, 0.0  ;;  %vm2145_vm13 = vcmp.gt.f32.partialorder %v2141_v18, 0.0  ;;  %vm2146_vm15 = vcmp.gt.f32.partialorder %v2142_v3, 0.0  ;;  %vm2147_vm1 = vcmp.gt.f32.partialorder %v2143_v45, 0.0 }
 0x758   :  { %v2148_v30 = vmul.f32 0.1, %v2140_v53  ;;  %v2149_v59 = vmul.f32 0.1, %v2141_v18  ;;  %v2150_v26 = vmul.f32 0.1, %v2142_v3 }
 0x759   :  { %v2151_v62 = vmul.f32 0.1, %v2143_v45 }
 0x75a   :  { %v2152_v42 = vsel %vm2144_vm12, %v2140_v53, %v2148_v30  ;;  %v2153_v55 = vsel %vm2145_vm13, %v2141_v18, %v2149_v59  ;;  %v2154_v2 = vsel %vm2146_vm15, %v2142_v3, %v2150_v26 }
 0x75b   :  { %v2155_v32 = vsel %vm2147_vm1, %v2143_v45, %v2151_v62  ;;  %v7567_v57 = vpack.c.bf16 %v2153_v55, %v2152_v42 }
 0x75c   :  { %v7569_v48 = vpack.c.bf16 %v2155_v32, %v2154_v2 }
 0x75d LB: > { %s3969_s23 = sshll.u32 %s5923_s17, 5  ;;  %s3970_s27 = smul.u32 36, %s5923_s17  ;;  %vm2203_vm2 = vcmask 261120   ;;  %vm2336_vm4 = vcmask 1043456   ;;  %s5923_s17 = sphi %s7587_s17, %s2163_s17   ;;  %v5919_v52 = vphi %v7585_v52, %v8746_v52   ;;  %v5915_v6 = vphi %v7583_v6, %v8745_v6   ;;  %v5911_v28 = vphi %v7581_v28, %v8744_v28   ;;  %v5907_v41 = vphi %v7579_v41, %v8743_v41   ;;  %v5903_v20 = vphi %v7577_v20, %v8742_v20   ;;  %v5899_v56 = vphi %v7575_v56, %v8741_v56   ;;  %v5895_v54 = vphi %v7573_v54, %v8740_v54   ;;  %v5891_v11 = vphi %v7571_v11, %v8739_v11  }
 0x75e   : > { %4294 = vmatprep.subr.bf16.mxu0 %v7569_v48  ;;  %s8730_s19 = sld [smem:[#allocation101_spill]]  ;;  %s2163_s17 = sadd.s32 1, %s5923_s17  }
 0x75f   : > { %4295 = vmatpush3.bf16.msra.mxu0 %v7569_v48  ;;  %s2287_s13 = scalar_lea.vmem %s8464_s9, %s3970_s27  ;;  %p2160_p12 = scmp.ge.s32.totalorder %s2163_s17, 16  }
 0x760   : > { %4296 = vmatprep.subr.bf16.mxu0 %v7567_v57  ;;  %v5146_v61 = vld [vmem:[%s2287_s13 + $0x20] ss:$0 sps:$4 sm:$0xff]   ;;  %v5147_v4 = vld [vmem:[%s2287_s13 + $0x18] sm:$0xff]   ;;  %v5148_v10 = vld [vmem:[%s2287_s13 + $0x10] sm:$0xff]   ;;  %s7799_s9 = smov (%p2160_p12), 0  }
 0x761   : > { %4475 = vmatprep.subr.msk.bf16.mxu1 %vm2336_vm4, %v5146_v61  ;;  %v2338_v13 = vsel %vm2336_vm4, %v5146_v61, 0  ;;  %v5149_v0 = vld [vmem:[%s2287_s13 + $0x8] sm:$0xff]   ;;  %v5150_v58 = vld [vmem:[%s2287_s13] sm:$0xff]  }
 0x762   : > { %4307 = vmatpush3.bf16.msra.mxu1 %v2338_v13 }
 0x763   : > { %4297 = vmatpush3.bf16.msra.mxu0 %v7567_v57  ;;  %4308 = vmatprep.subr.bf16.mxu1 %v5147_v4 }
 0x764   : > { %s2174_s12 = scalar_lea.vmem %s8730_s19, %s3969_s23 }
 0x765   : > { %v5142_v29 = vld [vmem:[%s2174_s12] sm:$0xff]   ;;  %v5143_v36 = vld [vmem:[%s2174_s12 + $0x8] sm:$0xff]   ;;  %v5144_v60 = vld [vmem:[%s2174_s12 + $0x10] sm:$0xff]  }
 0x766   : > { %4298 = vmatprep.mubr.msk.bf16.mxu0 %vm2203_vm2, %v5142_v29  ;;  %v5145_v19 = vld [vmem:[%s2174_s12 + $0x18] sm:$0xff]   ;;  %4309 = vmatpush3.bf16.msra.mxu1 %v5147_v4 }
 0x767   : > { %4299 = vmatmul.mubr.msk.bf16.vlgmr.msra.gmra.mxu0 %vm2203_vm2, %v5143_v36  ;;  %4310 = vmatprep.subr.bf16.mxu1 %v5148_v10 }
 0x768   : > { %4302 = vmatprep.mubr.msk.bf16.mxu0 %vm2203_vm2, %v5144_v60 }
 0x76a   : > { %4311 = vmatpush3.bf16.msra.mxu1 %v5148_v10 }
 0x76b   : > { %4312 = vmatprep.subr.bf16.mxu1 %v5149_v0 }
 0x76e   : > { %4313 = vmatpush3.bf16.msra.mxu1 %v5149_v0 }
 0x76f   : > { %4303 = vmatmul.mubr.msk.bf16.gmra.mxu0 %vm2203_vm2, %v5145_v19  ;;  %4314 = vmatprep.subr.bf16.mxu1 %v5150_v58 }
 0x772   : > { %4315 = vmatpush3.bf16.msra.mxu1 %v5150_v58 }
 0x827   : > { %v4300_v23 = vpop.f32.mrf.mxu0 }
 0x829   : > { %v2250_v7 = vpop.f32.mrf.mxu0 }
 0x82b   : > { %v4301_v27 = vpop.f32.mrf.mxu0 }
 0x82c   : > { %v2282_v24 = vpack.c.bf16 %v4301_v27, %v4300_v23 }
 0x82d   : > { %v2253_v63 = vpop.f32.mrf.mxu0 }
 0x82e   : > { %v2281_v49 = vpack.c.bf16 %v2253_v63, %v2250_v7 }
 0x82f   : > { %v4304_v40 = vpop.f32.mrf.mxu0 }
 0x830   : > { %4316 = vmatprep.mubr.msk.bf16.mxu1 %vm2076_vm11, %v2281_v49 }
 0x831   : > { %v2266_v21 = vpop.f32.mrf.mxu0  ;;  %4317 = vmatmul.mubr.msk.bf16.vlgmr.msra.gmra.mxu1 %vm2076_vm11, %v2282_v24 }
 0x833   : > { %v4305_v44 = vpop.f32.mrf.mxu0 }
 0x834   : > { %v2284_v18 = vpack.c.bf16 %v4305_v44, %v4304_v40 }
 0x835   : > { %v2269_v38 = vpop.f32.mrf.mxu0 }
 0x836   : > { %v2283_v53 = vpack.c.bf16 %v2269_v38, %v2266_v21 }
 0x838   : > { %4320 = vmatprep.mubr.msk.bf16.mxu1 %vm2076_vm11, %v2283_v53 }
 0x839   : > { %4321 = vmatmul.mubr.msk.bf16.gmra.mxu1 %vm2076_vm11, %v2284_v18 }
 0x8f1   : > { %v4318_v3 = vpop.f32.mrf.mxu1 }
 0x8f2   : > { %v7628_v28 = vadd.f32 %v5911_v28, %v4318_v3  }
 0x8f3   : > { %v2374_v30 = vpop.f32.mrf.mxu1 }
 0x8f4   : > { %v8731_v45 = vmov %v7628_v28  ;;  %v7630_v52 = vadd.f32 %v5919_v52, %v2374_v30  }
 0x8f5   : > { %v4319_v26 = vpop.f32.mrf.mxu1  ;;  %v2416_v19 = vsel (%p2160_p12), %vm1773_vm14, %v8731_v45, 0.0  ;;  %v2437_v57 = vmul.f32 (%p2160_p12), %v8731_v45, %v8731_v45 }
 0x8f6   : > { %v8732_v59 = vmov %v7630_v52  ;;  %v7632_v41 = vadd.f32 %v5907_v41, %v4319_v26  }
 0x8f7   : > { %v2377_v42 = vpop.f32.mrf.mxu1  ;;  %v8746_v52 = vmov %v8732_v59  ;;  %v2435_v58 = vmul.f32 (%p2160_p12), %v8732_v59, %v8732_v59  ;;  %v2446_v27 = vsel (%p2160_p12), %vm1773_vm14, %v2437_v57, 0.0 }
 0x8f8   : > { %v8733_v62 = vmov %v7632_v41  ;;  %v7634_v6 = vadd.f32 %v5915_v6, %v2377_v42   ;;  %v2413_v52 = vsel (%p2160_p12), %vm1773_vm14, %v8732_v59, 0.0 }
 0x8f9   : > { %v4322_v2 = vpop.f32.mrf.mxu1  ;;  %v8743_v41 = vmov %v8733_v62  ;;  %v2418_v0 = vsel (%p2160_p12), %vm1773_vm14, %v8733_v62, 0.0 }
 0x8fa   : > { %v8734_v55 = vmov %v7634_v6  ;;  %v7637_v54 = vadd.f32 %v5895_v54, %v4322_v2  }
 0x8fb   : > { %v2390_v29 = vpop.f32.mrf.mxu1  ;;  %v8745_v6 = vmov %v8734_v55  ;;  %v2414_v13 = vsel (%p2160_p12), %vm1773_vm14, %v8734_v55, 0.0  ;;  %v2436_v23 = vmul.f32 (%p2160_p12), %v8734_v55, %v8734_v55 }
 0x8fc   : > { %v8735_v32 = vmov %v7637_v54  ;;  %v7640_v20 = vadd.f32 %v5903_v20, %v2390_v29   ;;  %v2415_v10 = vadd.f32 (%p2160_p12), %v2414_v13, %v2413_v52 }
 0x8fd   : > { %v4323_v60 = vpop.f32.mrf.mxu1  ;;  %v8740_v54 = vmov %v8735_v32  ;;  %v2444_v41 = vsel (%p2160_p12), %vm1773_vm14, %v2436_v23, 0.0  ;;  %v2424_v44 = vsel (%p2160_p12), %vm1773_vm14, %v8735_v32, 0.0  ;;  %v2441_v38 = vmul.f32 (%p2160_p12), %v8735_v32, %v8735_v32 }
 0x8fe   : > { %v8736_v36 = vmov %v7640_v20  ;;  %v7643_v11 = vadd.f32 %v5891_v11, %v4323_v60   ;;  %v2417_v48 = vadd.f32 (%p2160_p12), %v2416_v19, %v2415_v10 }
 0x8ff   : > { %v2393_v28 = vpop.f32.mrf.mxu1  ;;  %v8742_v20 = vmov %v8736_v36  ;;  %2162 = sbr.rel (!%p2160_p12) target bundleno = 1885 (0x75d), region = 246  ;;  %v2420_v54 = vsel (%p2160_p12), %vm1773_vm14, %v8736_v36, 0.0  ;;  %v2454_v60 = vsel (%p2160_p12), %vm1773_vm14, %v2441_v38, 0.0 }
 0x900   : > { %v8737_v61 = vmov %v7643_v11  ;;  %v7646_v56 = vadd.f32 %v5899_v56, %v2393_v28   ;;  %v8744_v28 = vmov %v8731_v45  ;;  %v2443_v20 = vsel (%p2160_p12), %vm1773_vm14, %v2435_v58, 0.0 }
 0x901   : > { %v8739_v11 = vmov %v8737_v61  ;;  %v2419_v6 = vadd.f32 (%p2160_p12), %v2418_v0, %v2417_v48  ;;  %v2445_v7 = vadd.f32 (%p2160_p12), %v2444_v41, %v2443_v20  ;;  %v2426_v30 = vsel (%p2160_p12), %vm1773_vm14, %v8737_v61, 0.0 }
 0x902   : > { %v8738_v4 = vmov %v7646_v56  ;;  %v2438_v11 = vmul.f32 (%p2160_p12), %v8733_v62, %v8733_v62  ;;  %v2442_v26 = vmul.f32 (%p2160_p12), %v8737_v61, %v8737_v61 }
 0x903   : > { %v8741_v56 = vmov %v8738_v4  ;;  %v2422_v63 = vsel (%p2160_p12), %vm1773_vm14, %v8738_v4, 0.0  ;;  %v2440_v49 = vmul.f32 (%p2160_p12), %v8738_v4, %v8738_v4  ;;  %v2421_v40 = vadd.f32 (%p2160_p12), %v2420_v54, %v2419_v6 }
 0x904   :  { %v2439_v56 = vmul.f32 %v8736_v36, %v8736_v36  ;;  %v2448_v24 = vsel %vm1773_vm14, %v2438_v11, 0.0  ;;  %v2447_v21 = vadd.f32 %v2446_v27, %v2445_v7  ;;  %v2456_v13 = vsel %vm1773_vm14, %v2442_v26, 0.0 }
 0x905   :  { %v2423_v18 = vadd.f32 %v2422_v63, %v2421_v40  ;;  %v2452_v42 = vsel %vm1773_vm14, %v2440_v49, 0.0 }
 0x906   :  { %v2450_v53 = vsel %vm1773_vm14, %v2439_v56, 0.0  ;;  %v2449_v3 = vadd.f32 %v2448_v24, %v2447_v21 }
 0x907   :  { %v2425_v2 = vadd.f32 %v2424_v44, %v2423_v18 }
 0x908   :  { %v2451_v29 = vadd.f32 %v2450_v53, %v2449_v3 }
 0x909   :  { %v2427_v28 = vadd.f32 %v2426_v30, %v2425_v2 }
 0x90a   :  { %v2453_v52 = vadd.f32 %v2452_v42, %v2451_v29  ;;  %v3917_v29 = vld [vmem:[#allocation14] ss:$0 sm:$0xff] }
 0x90b   :  { %v2428_v19 = vrot.slane %v2427_v28, 4 }
 0x90c   :  { %v2455_v10 = vadd.f32 %v2454_v60, %v2453_v52 }
 0x90d   :  { %v2429_v0 = vadd.f32 %v2428_v19, %v2427_v28 }
 0x90e   :  { %v2457_v58 = vadd.f32 %v2456_v13, %v2455_v10  ;;  %v3918_v10 = vld [vmem:[#allocation16] ss:$0 sm:$0xff] }
 0x90f   :  { %v2430_v23 = vrot.slane %v2429_v0, 2 }
 0x910   :  { %v2458_v57 = vrot.slane %v2457_v58, 4 }
 0x911   :  { %v2431_v48 = vadd.f32 %v2430_v23, %v2429_v0 }
 0x912   :  { %v2459_v11 = vadd.f32 %v2458_v57, %v2457_v58 }
 0x913   :  { %v2432_v54 = vrot.slane %v2431_v48, 1 }
 0x914   :  { %v2460_v56 = vrot.slane %v2459_v11, 2 }
 0x915   :  { %v2433_v20 = vadd.f32 %v2432_v54, %v2431_v48 }
 0x916   :  { %v2461_v41 = vadd.f32 %v2460_v56, %v2459_v11 }
 0x917   :  { %v2434_v6 = vmul.f32 0.02, %v2433_v20 }
 0x918   :  { %v2462_v7 = vrot.slane %v2461_v41, 1 }
 0x919   :  { %v2465_v63 = vmul.f32 %v2434_v6, %v2434_v6  ;;  %v2469_v44 = vsub.f32 %v8732_v59, %v2434_v6  ;;  %v2470_v38 = vsub.f32 %v8734_v55, %v2434_v6  ;;  %v2471_v53 = vsub.f32 %v8731_v45, %v2434_v6 }
 0x91a   :  { %v2463_v27 = vadd.f32 %v2462_v7, %v2461_v41  ;;  %v2472_v18 = vsub.f32 %v8733_v62, %v2434_v6  ;;  %v2473_v3 = vsub.f32 %v8736_v36, %v2434_v6  ;;  %v2474_v30 = vsub.f32 %v8738_v4, %v2434_v6 }
 0x91b   :  { %v2475_v26 = vsub.f32 %v8735_v32, %v2434_v6  ;;  %v2476_v42 = vsub.f32 %v8737_v61, %v2434_v6 }
 0x91c   :  { %v2464_v49 = vmul.f32 0.02, %v2463_v27 }
 0x91e   :  { %v2466_v24 = vsub.f32 %v2464_v49, %v2465_v63 }
 0x920   :  { %v2467_v40 = vmax.f32 %v2466_v24, 0.0 }
 0x922   :  { %v2477_v21 = vadd.f32 1e-05, %v2467_v40 }
 0x924   :  { %5151 = vrsqrt.f32 %v2477_v21 }
 0x931   :  { %v5152_v2 = vpop.eup %5151 }
 0x932   :  { %v2479_v60 = vmul.f32 %v5152_v2, %v2469_v44  ;;  %v2480_v28 = vmul.f32 %v5152_v2, %v2470_v38  ;;  %v2481_v52 = vmul.f32 %v5152_v2, %v2471_v53  ;;  %v2482_v59 = vmul.f32 %v5152_v2, %v2472_v18 }
 0x933   :  { %v2483_v13 = vmul.f32 %v5152_v2, %v2473_v3  ;;  %v2484_v55 = vmul.f32 %v5152_v2, %v2474_v30  ;;  %v2485_v19 = vmul.f32 %v5152_v2, %v2475_v26  ;;  %v2486_v45 = vmul.f32 %v5152_v2, %v2476_v42 }
 0x934   :  { %v2493_v62 = vmul.f32 %v3917_v29, %v2479_v60  ;;  %v2494_v0 = vmul.f32 %v3917_v29, %v2480_v28  ;;  %v2495_v36 = vmul.f32 %v3917_v29, %v2481_v52  ;;  %v2496_v58 = vmul.f32 %v3917_v29, %v2482_v59 }
 0x935   :  { %v2497_v4 = vmul.f32 %v3917_v29, %v2483_v13  ;;  %v2498_v23 = vmul.f32 %v3917_v29, %v2484_v55  ;;  %v2499_v32 = vmul.f32 %v3917_v29, %v2485_v19  ;;  %v2500_v57 = vmul.f32 %v3917_v29, %v2486_v45 }
 0x936   :  { %v2508_v61 = vadd.f32 %v3918_v10, %v2493_v62  ;;  %v2509_v48 = vadd.f32 %v3918_v10, %v2494_v0  ;;  %v2510_v11 = vadd.f32 %v3918_v10, %v2495_v36  ;;  %v2511_v54 = vadd.f32 %v3918_v10, %v2496_v58 }
 0x937   :  { %v2512_v56 = vadd.f32 %v3918_v10, %v2497_v4  ;;  %v2513_v20 = vadd.f32 %v3918_v10, %v2498_v23  ;;  %v2514_v41 = vadd.f32 %v3918_v10, %v2499_v32  ;;  %v2515_v6 = vadd.f32 %v3918_v10, %v2500_v57 }
 0x938   :  { %vm2516_vm5 = vcmp.gt.f32.partialorder %v2508_v61, 0.0  ;;  %vm2517_vm6 = vcmp.gt.f32.partialorder %v2509_v48, 0.0  ;;  %vm2518_vm7 = vcmp.gt.f32.partialorder %v2510_v11, 0.0  ;;  %vm2519_vm8 = vcmp.gt.f32.partialorder %v2511_v54, 0.0 }
 0x939   :  { %vm2520_vm3 = vcmp.gt.f32.partialorder %v2512_v56, 0.0  ;;  %vm2521_vm10 = vcmp.gt.f32.partialorder %v2513_v20, 0.0  ;;  %vm2522_vm11 = vcmp.gt.f32.partialorder %v2514_v41, 0.0  ;;  %vm2523_vm12 = vcmp.gt.f32.partialorder %v2515_v6, 0.0 }
 0x93a   :  { %v2524_v7 = vmul.f32 0.1, %v2508_v61  ;;  %v2525_v27 = vmul.f32 0.1, %v2509_v48  ;;  %v2526_v63 = vmul.f32 0.1, %v2510_v11 }
 0x93b   :  { %v2527_v49 = vmul.f32 0.1, %v2511_v54  ;;  %v2528_v24 = vmul.f32 0.1, %v2512_v56  ;;  %v2529_v40 = vmul.f32 0.1, %v2513_v20 }
 0x93c   :  { %v2530_v21 = vmul.f32 0.1, %v2514_v41  ;;  %v2531_v44 = vmul.f32 0.1, %v2515_v6  ;;  %v7724_v38 = vsel %vm2516_vm5, %v2508_v61, %v2524_v7  ;;  %v7727_v53 = vsel %vm2517_vm6, %v2509_v48, %v2525_v27 }
 0x93d   :  { %8747 = vst [vmem:[#allocation40_spill] sm:$0xff] %v7724_v38  ;;  %8748 = vst [vmem:[#allocation41_spill] sm:$0xff] %v7727_v53  ;;  %v7730_v18 = vsel %vm2518_vm7, %v2510_v11, %v2526_v63  ;;  %v7733_v3 = vsel %vm2519_vm8, %v2511_v54, %v2527_v49  ;;  %v7736_v30 = vsel %vm2520_vm3, %v2512_v56, %v2528_v24  ;;  %v7755_v59 = vmov 0.0  }
 0x93e   :  { %8749 = vst [vmem:[#allocation42_spill] sm:$0xff] %v7730_v18  ;;  %8750 = vst [vmem:[#allocation43_spill] sm:$0xff] %v7733_v3  ;;  %v7739_v26 = vsel %vm2521_vm10, %v2513_v20, %v2529_v40  ;;  %v7742_v42 = vsel %vm2522_vm11, %v2514_v41, %v2530_v21  ;;  %v7745_v2 = vsel %vm2523_vm12, %v2515_v6, %v2531_v44  ;;  %v7757_v13 = vmov 0.0  }
 0x93f   :  { %8751 = vst [vmem:[#allocation44_spill] sm:$0xff] %v7736_v30  ;;  %8752 = vst [vmem:[#allocation45_spill] sm:$0xff] %v7739_v26  ;;  %v7759_v55 = vmov 0.0   ;;  %v7761_v19 = vmov 0.0   ;;  %v7763_v45 = vmov 0.0   ;;  %v7765_v10 = vmov 0.0  }
 0x940   :  { %8753 = vst [vmem:[#allocation46_spill] sm:$0xff] %v7742_v42  ;;  %8754 = vst [vmem:[#allocation47_spill] sm:$0xff] %v7745_v2  ;;  %v7767_v62 = vmov 0.0   ;;  %v7769_v0 = vmov 0.0   ;;  %v7771_v36 = vmov 0.0   ;;  %v7773_v58 = vmov 0.0  }
 0x941   :  { %v7775_v4 = vmov 0.0   ;;  %v7777_v23 = vmov 0.0   ;;  %v7779_v32 = vmov 0.0   ;;  %v7781_v57 = vmov 0.0  }
 0x942   :  { %v7783_v61 = vmov 0.0   ;;  %v7785_v48 = vmov 0.0   ;;  %v7787_v11 = vmov 0.0   ;;  %v7789_v54 = vmov 0.0  }
 0x943   :  { %v7791_v56 = vmov 0.0   ;;  %v7793_v20 = vmov 0.0   ;;  %v7795_v41 = vmov 0.0   ;;  %v7797_v6 = vmov 0.0  }
 0x944 LB: > { %v6035_v7 = vmov 0.0   ;;  %vm6036_vm13 = vmmov 0   ;;  %s3971_s14 = smul.u32 88, %s6015_s9  ;;  %s8758_s0 = sld [smem:[#allocation102_spill]]  ;;  %v8765_v53 = vld [vmem:[#allocation41_spill] sm:$0xff]  ;;  %v8766_v38 = vld [vmem:[#allocation40_spill] sm:$0xff]  ;;  %s6015_s9 = sphi %s7799_s9, %s2549_s9   ;;  %v6011_v6 = vphi %v7797_v6, %v8813_v6   ;;  %v6007_v41 = vphi %v7795_v41, %v8812_v41   ;;  %v6003_v20 = vphi %v7793_v20, %v8811_v20   ;;  %v5999_v56 = vphi %v7791_v56, %v8810_v56   ;;  %v5995_v54 = vphi %v7789_v54, %v8809_v54   ;;  %v5991_v11 = vphi %v7787_v11, %v8808_v11   ;;  %v5987_v48 = vphi %v7785_v48, %v8807_v48   ;;  %v5983_v61 = vphi %v7783_v61, %v8806_v61   ;;  %v5979_v57 = vphi %v7781_v57, %v8805_v57   ;;  %v5975_v32 = vphi %v7779_v32, %v8804_v32   ;;  %v5971_v23 = vphi %v7777_v23, %v8803_v23   ;;  %v5967_v4 = vphi %v7775_v4, %v8802_v4   ;;  %v5963_v58 = vphi %v7773_v58, %v8801_v58   ;;  %v5959_v36 = vphi %v7771_v36, %v8800_v36   ;;  %v5955_v0 = vphi %v7769_v0, %v8799_v0   ;;  %v5951_v62 = vphi %v7767_v62, %v8798_v62   ;;  %v5947_v10 = vphi %v7765_v10, %v8797_v10   ;;  %v5943_v45 = vphi %v7763_v45, %v8796_v45   ;;  %v5939_v19 = vphi %v7761_v19, %v8795_v19   ;;  %v5935_v55 = vphi %v7759_v55, %v8794_v55   ;;  %v5931_v13 = vphi %v7757_v13, %v8793_v13   ;;  %v5927_v59 = vphi %v7755_v59, %v8792_v59  }
 0x945   : > { %4324 = vmatprep.subr.bf16.mxu0 %v6035_v7  ;;  %4332 = vmatprep.mubr.msk.bf16.mxu0 %vm6036_vm13, %v6035_v7  ;;  %s3972_s7 = smul.u32 20, %s6015_s9  ;;  %v8762_v3 = vld [vmem:[#allocation43_spill] sm:$0xff]  ;;  %v8763_v18 = vld [vmem:[#allocation42_spill] sm:$0xff]  ;;  %v8767_v29 = vpack.c.bf16 %v8765_v53, %v8766_v38  ;;  %vm8768_vm15 = vcmask 1041408   ;;  %s2549_s9 = sadd.s32 1, %s6015_s9  }
 0x946   : > { %4376 = vmatprep.subr.bf16.mxu1 %v6035_v7  ;;  %4382 = vmatprep.mubr.msk.bf16.mxu1 %vm6036_vm13, %v6035_v7  ;;  %v8759_v26 = vld [vmem:[#allocation45_spill] sm:$0xff]  ;;  %v8760_v30 = vld [vmem:[#allocation44_spill] sm:$0xff]  ;;  %v8764_v60 = vpack.c.bf16 %v8762_v3, %v8763_v18  ;;  %p8049_p13 = scmp.ge.s32.totalorder %s2549_s9, 16  }
 0x947   : > { %v8755_v2 = vld [vmem:[#allocation47_spill] sm:$0xff]  ;;  %v8756_v42 = vld [vmem:[#allocation46_spill] sm:$0xff]  ;;  %v8761_v28 = vpack.c.bf16 %v8759_v26, %v8760_v30  ;;  %s7899_s16 = scalar_lea.vmem %s8465_s10, %s3972_s7  ;;  %vm8814_vm1 = vcmask (%p8049_p13), 146432   ;;  %v6037_v47 = vmov (%p8049_p13), 0.0   ;;  %s6039_s1 = smov (%p8049_p13), [#allocation23]  }
 0x948   : > { %v8757_v52 = vpack.c.bf16 %v8755_v2, %v8756_v42  ;;  %v5164_v63 = vld [vmem:[%s7899_s16 + $0x10] ss:$0 sps:$4 sm:$0x33]   ;;  %vm8815_vm2 = vmmov (%p8049_p13), %vm8814_vm1  ;;  %s3517_s20 = sshll.u32 (%p8049_p13), %s6039_s1, 4  ;;  %s3518_s20 = int_to_ptr.vmem [resolvable:$true] %s3517_s20 }
 0x949   : > { %v2876_v49 = vsel %vm8768_vm15, %v5164_v63, 0  ;;  %vm8816_vm4 = vmmov (%p8049_p13), %vm8814_vm1  ;;  %s5429_s17 = scalar_lea.vmem (%p8049_p13), %s3518_s20, 32  ;;  %p5434_p1 = scmp.lt.s32.totalorder (%p8049_p13), %s3518_s20, %s3518_s20 }
 0x94a   : > { %4325 = vmatpush3.bf16.msra.mxu0 %v8757_v52  ;;  %s7884_s21 = scalar_lea.vmem %s8758_s0, %s3971_s14  ;;  %4377 = vmatpush3.bf16.msra.mxu1 %v2876_v49  ;;  %vm8817_vm5 = vmmov (%p8049_p13), %vm8814_vm1  ;;  %p5430_p0 = scmp.ne.s32.totalorder (%p8049_p13), %s3518_s20, %s5429_s17 }
 0x94b   : > { %4326 = vmatprep.subr.bf16.mxu0 %v6035_v7  ;;  %v5153_v27 = vld [vmem:[%s7884_s21] sm:$0xff]   ;;  %4378 = vmatprep.subr.bf16.mxu1 %v6035_v7  ;;  %v5154_v24 = vld [vmem:[%s7884_s21 + $0x8] sm:$0xff]   ;;  %v5155_v40 = vld [vmem:[%s7884_s21 + $0x10] sm:$0xff]   ;;  %p5435_p2 = scmp.lt.s32.totalorder (%p8049_p13), %s5429_s17, %s5429_s17 }
 0x94c   : > { %v5156_v21 = vld [vmem:[%s7884_s21 + $0x18] sm:$0xff]   ;;  %v5157_v44 = vld [vmem:[%s7884_s21 + $0x20] sm:$0xff]   ;;  %v5159_v63 = vld [vmem:[%s7884_s21 + $0x30] sm:$0xff]  }
 0x94d   : > { %v5160_v49 = vld [vmem:[%s7884_s21 + $0x38] sm:$0xff]   ;;  %vm8820_vm6 = vmmov (%p8049_p13), %vm8814_vm1  ;;  %p5436_p3 = por (%p8049_p13), %p5435_p2, %p5434_p1 }
 0x94e   : > { %4327 = vmatpush3.bf16.msra.mxu0 %v8761_v28  ;;  %vm8821_vm7 = vmmov (%p8049_p13), %vm8814_vm1 }
 0x94f   : > { %4328 = vmatprep.subr.bf16.mxu0 %v6035_v7  ;;  %vm8822_vm8 = vmmov (%p8049_p13), %vm8814_vm1  ;;  %p5437_p4 = pnand (%p8049_p13), %p5436_p3, %p5430_p0 }
 0x950   :  { %vm8823_vm3 = vmmov (%p8049_p13), %vm8814_vm1 }
 0x951   :  { %vm8824_vm10 = vmmov (%p8049_p13), %vm8814_vm1 }
 0x952   : > { %4329 = vmatpush3.bf16.msra.mxu0 %v8764_v60  ;;  %vm8825_vm11 = vmmov (%p8049_p13), %vm8814_vm1 }
 0x953   : > { %4330 = vmatprep.subr.bf16.mxu0 %v6035_v7  ;;  %vm8826_vm12 = vmmov (%p8049_p13), %vm8814_vm1 }
 0x954   :  { %vm8828_vm15 = vmmov (%p8049_p13), %vm8814_vm1 }
 0x956   : > { %4331 = vmatpush3.bf16.msra.mxu0 %v8767_v29 }
 0x957   :  { %3352 = vmatprep.subr.mxu0 (%p8049_p13), %v6037_v47 }
 0x959   : > { %4333 = vmatmul.mubr.msk.bf16.vlgmr.msra.gmra.mxu0 %vm1932_vm9, %v5153_v27  ;;  %v5158_v27 = vld [vmem:[%s7884_s21 + $0x28] sm:$0xff]  }
 0x95a   : > { %4336 = vmatprep.mubr.msk.bf16.mxu0 %vm6036_vm13, %v6035_v7 }
 0x961   : > { %4337 = vmatmul.mubr.msk.bf16.gmra.mxu0 %vm1932_vm9, %v5154_v24  ;;  %v5161_v24 = vld [vmem:[%s7884_s21 + $0x40] sm:$0xff]  }
 0x962   : > { %4340 = vmatprep.mubr.msk.bf16.mxu0 %vm6036_vm13, %v6035_v7 }
 0x969   : > { %4341 = vmatmul.mubr.msk.bf16.gmra.mxu0 %vm1932_vm9, %v5155_v40  ;;  %v5165_v40 = vld [vmem:[%s7899_s16 + $0x8] sm:$0xff]  }
 0x96a   : > { %4344 = vmatprep.mubr.msk.bf16.mxu0 %vm6036_vm13, %v6035_v7  ;;  %4379 = vmatpush3.bf16.msra.mxu1 %v5165_v40 }
 0x96b   : > { %4380 = vmatprep.subr.bf16.mxu1 %v6035_v7 }
 0x971   : > { %4345 = vmatmul.mubr.msk.bf16.gmra.mxu0 %vm1932_vm9, %v5156_v21  ;;  %v5166_v21 = vld [vmem:[%s7899_s16] sm:$0xff]  }
 0x972   : > { %4348 = vmatprep.mubr.msk.bf16.mxu0 %vm6036_vm13, %v6035_v7  ;;  %4381 = vmatpush3.bf16.msra.mxu1 %v5166_v21 }
 0x973   :  { %4426 = vmatprep.subr.mxu1 (%p8049_p13), %v6037_v47 }
 0x979   : > { %4349 = vmatmul.mubr.msk.bf16.gmra.mxu0 %vm1932_vm9, %v5157_v44  ;;  %v5162_v44 = vld [vmem:[%s7884_s21 + $0x48] sm:$0xff]  }
 0x97a   : > { %4352 = vmatprep.mubr.msk.bf16.mxu0 %vm6036_vm13, %v6035_v7 }
 0x981   : > { %4353 = vmatmul.mubr.msk.bf16.gmra.mxu0 %vm1932_vm9, %v5158_v27  ;;  %v5163_v27 = vld [vmem:[%s7884_s21 + $0x50] sm:$0xff]  }
 0x982   : > { %4356 = vmatprep.mubr.msk.bf16.mxu0 %vm6036_vm13, %v6035_v7 }
 0x989   : > { %4357 = vmatmul.mubr.msk.bf16.gmra.mxu0 %vm1932_vm9, %v5159_v63 }
 0x98a   : > { %4360 = vmatprep.mubr.msk.bf16.mxu0 %vm6036_vm13, %v6035_v7 }
 0x991   : > { %4361 = vmatmul.mubr.msk.bf16.gmra.mxu0 %vm1932_vm9, %v5160_v49 }
 0x992   : > { %4364 = vmatprep.mubr.msk.bf16.mxu0 %vm6036_vm13, %v6035_v7 }
 0x999   : > { %4365 = vmatmul.mubr.msk.bf16.gmra.mxu0 %vm1932_vm9, %v5161_v24 }
 0x99a   : > { %4368 = vmatprep.mubr.msk.bf16.mxu0 %vm6036_vm13, %v6035_v7 }
 0x9a1   : > { %4369 = vmatmul.mubr.msk.bf16.gmra.mxu0 %vm1932_vm9, %v5162_v44 }
 0x9a2   : > { %4372 = vmatprep.mubr.msk.bf16.mxu0 %vm6036_vm13, %v6035_v7 }
 0x9a9   : > { %4373 = vmatmul.mubr.msk.bf16.gmra.mxu0 %vm1932_vm9, %v5163_v27  ;;  %vm8819_vm9 = vmmov (%p8049_p13), %vm8814_vm1 }
 0xa19   : > { %v2720_v63 = vpop.f32.mrf.mxu0 }
 0xa1b   : > { %v4334_v49 = vpop.f32.mrf.mxu0 }
 0xa1d   : > { %v2723_v24 = vpop.f32.mrf.mxu0 }
 0xa1e   : > { %v2807_v40 = vpack.c.bf16 %v2723_v24, %v2720_v63 }
 0xa1f   : > { %v4335_v28 = vpop.f32.mrf.mxu0 }
 0xa20   : > { %4383 = vmatmul.mubr.msk.bf16.vlgmr.msra.gmra.mxu1 %vm1773_vm14, %v2807_v40 }
 0xa21   : > { %v2728_v29 = vpop.f32.mrf.mxu0  ;;  %4386 = vmatprep.mubr.msk.bf16.mxu1 %vm6036_vm13, %v6035_v7 }
 0xa23   : > { %v4338_v21 = vpop.f32.mrf.mxu0 }
 0xa25   : > { %v2731_v52 = vpop.f32.mrf.mxu0 }
 0xa26   : > { %v2808_v44 = vpack.c.bf16 %v2731_v52, %v2728_v29 }
 0xa27   : > { %v4339_v60 = vpop.f32.mrf.mxu0 }
 0xa28   : > { %4387 = vmatmul.mubr.msk.bf16.gmra.mxu1 %vm1773_vm14, %v2808_v44 }
 0xa29   : > { %v2736_v2 = vpop.f32.mrf.mxu0  ;;  %4390 = vmatprep.mubr.msk.bf16.mxu1 %vm6036_vm13, %v6035_v7 }
 0xa2b   : > { %v4342_v27 = vpop.f32.mrf.mxu0 }
 0xa2d   : > { %v2739_v49 = vpop.f32.mrf.mxu0 }
 0xa2e   : > { %v2809_v63 = vpack.c.bf16 %v2739_v49, %v2736_v2 }
 0xa2f   : > { %v4343_v28 = vpop.f32.mrf.mxu0 }
 0xa30   : > { %4391 = vmatmul.mubr.msk.bf16.gmra.mxu1 %vm1773_vm14, %v2809_v63 }
 0xa31   : > { %v2744_v24 = vpop.f32.mrf.mxu0  ;;  %4394 = vmatprep.mubr.msk.bf16.mxu1 %vm6036_vm13, %v6035_v7 }
 0xa33   : > { %v4346_v40 = vpop.f32.mrf.mxu0 }
 0xa35   : > { %v2747_v21 = vpop.f32.mrf.mxu0 }
 0xa36   : > { %v2810_v29 = vpack.c.bf16 %v2747_v21, %v2744_v24 }
 0xa37   : > { %v4347_v60 = vpop.f32.mrf.mxu0 }
 0xa38   : > { %4395 = vmatmul.mubr.msk.bf16.gmra.mxu1 %vm1773_vm14, %v2810_v29 }
 0xa39   : > { %v2752_v52 = vpop.f32.mrf.mxu0  ;;  %4398 = vmatprep.mubr.msk.bf16.mxu1 %vm6036_vm13, %v6035_v7 }
 0xa3b   : > { %v4350_v44 = vpop.f32.mrf.mxu0 }
 0xa3d   : > { %v2755_v27 = vpop.f32.mrf.mxu0 }
 0xa3e   : > { %v2811_v2 = vpack.c.bf16 %v2755_v27, %v2752_v52 }
 0xa3f   : > { %v4351_v49 = vpop.f32.mrf.mxu0 }
 0xa40   : > { %4399 = vmatmul.mubr.msk.bf16.gmra.mxu1 %vm1773_vm14, %v2811_v2 }
 0xa41   : > { %v2760_v63 = vpop.f32.mrf.mxu0  ;;  %4402 = vmatprep.mubr.msk.bf16.mxu1 %vm6036_vm13, %v6035_v7 }
 0xa43   : > { %v4354_v28 = vpop.f32.mrf.mxu0 }
 0xa45   : > { %v2763_v40 = vpop.f32.mrf.mxu0 }
 0xa46   : > { %v2812_v24 = vpack.c.bf16 %v2763_v40, %v2760_v63 }
 0xa47   : > { %v4355_v21 = vpop.f32.mrf.mxu0 }
 0xa48   : > { %4403 = vmatmul.mubr.msk.bf16.gmra.mxu1 %vm1773_vm14, %v2812_v24 }
 0xa49   : > { %v2768_v29 = vpop.f32.mrf.mxu0  ;;  %4406 = vmatprep.mubr.msk.bf16.mxu1 %vm6036_vm13, %v6035_v7 }
 0xa4b   : > { %v4358_v60 = vpop.f32.mrf.mxu0 }
 0xa4d   : > { %v2771_v44 = vpop.f32.mrf.mxu0 }
 0xa4e   : > { %v2813_v52 = vpack.c.bf16 %v2771_v44, %v2768_v29 }
 0xa4f   : > { %v4359_v27 = vpop.f32.mrf.mxu0 }
 0xa50   : > { %4407 = vmatmul.mubr.msk.bf16.gmra.mxu1 %vm1773_vm14, %v2813_v52 }
 0xa51   : > { %v2776_v2 = vpop.f32.mrf.mxu0  ;;  %4410 = vmatprep.mubr.msk.bf16.mxu1 %vm6036_vm13, %v6035_v7 }
 0xa53   : > { %v4362_v49 = vpop.f32.mrf.mxu0 }
 0xa55   : > { %v2779_v28 = vpop.f32.mrf.mxu0 }
 0xa56   : > { %v2814_v63 = vpack.c.bf16 %v2779_v28, %v2776_v2 }
 0xa57   : > { %v4363_v40 = vpop.f32.mrf.mxu0 }
 0xa58   : > { %4411 = vmatmul.mubr.msk.bf16.gmra.mxu1 %vm1773_vm14, %v2814_v63 }
 0xa59   : > { %v2784_v24 = vpop.f32.mrf.mxu0  ;;  %4414 = vmatprep.mubr.msk.bf16.mxu1 %vm6036_vm13, %v6035_v7 }
 0xa5b   : > { %v4366_v21 = vpop.f32.mrf.mxu0 }
 0xa5d   : > { %v2787_v60 = vpop.f32.mrf.mxu0 }
 0xa5e   : > { %v2815_v29 = vpack.c.bf16 %v2787_v60, %v2784_v24 }
 0xa5f   : > { %v4367_v44 = vpop.f32.mrf.mxu0 }
 0xa60   : > { %4415 = vmatmul.mubr.msk.bf16.gmra.mxu1 %vm1773_vm14, %v2815_v29 }
 0xa61   : > { %v2792_v52 = vpop.f32.mrf.mxu0  ;;  %4418 = vmatprep.mubr.msk.bf16.mxu1 %vm6036_vm13, %v6035_v7 }
 0xa63   : > { %v4370_v27 = vpop.f32.mrf.mxu0 }
 0xa65   : > { %v2795_v49 = vpop.f32.mrf.mxu0 }
 0xa66   : > { %v2816_v2 = vpack.c.bf16 %v2795_v49, %v2792_v52 }
 0xa67   : > { %v4371_v28 = vpop.f32.mrf.mxu0 }
 0xa68   : > { %4419 = vmatmul.mubr.msk.bf16.gmra.mxu1 %vm1773_vm14, %v2816_v2 }
 0xa69   : > { %v2800_v63 = vpop.f32.mrf.mxu0  ;;  %4422 = vmatprep.mubr.msk.bf16.mxu1 %vm6036_vm13, %v6035_v7  ;;  %vm8827_vm13 = vmmov (%p8049_p13), %vm8814_vm1 }
 0xa6b   : > { %v4374_v40 = vpop.f32.mrf.mxu0 }
 0xa6d   : > { %v2803_v21 = vpop.f32.mrf.mxu0 }
 0xa6e   : > { %v2817_v24 = vpack.c.bf16 %v2803_v21, %v2800_v63 }
 0xa6f   : > { %v4375_v60 = vpop.f32.mrf.mxu0 }
 0xa70   : > { %4423 = vmatmul.mubr.msk.bf16.gmra.mxu1 %vm1773_vm14, %v2817_v24  ;;  %vm8818_vm14 = vmmov (%p8049_p13), %vm8814_vm1 }
 0xae0   : > { %v2912_v29 = vpop.f32.mrf.mxu1 }
 0xae1   : > { %v7983_v6 = vadd.f32 %v6011_v6, %v2912_v29  }
 0xae2   : > { %v4384_v27 = vpop.f32.mrf.mxu1 }
 0xae3   : > { %v8769_v44 = vmov %v7983_v6 }
 0xae4   : > { %v2915_v3 = vpop.f32.mrf.mxu1 }
 0xae5   : > { %v7986_v41 = vadd.f32 %v6007_v41, %v2915_v3  }
 0xae6   : > { %v4385_v49 = vpop.f32.mrf.mxu1 }
 0xae7   : > { %v8770_v52 = vmov %v7986_v41 }
 0xae8   : > { %v2920_v2 = vpop.f32.mrf.mxu1  ;;  %v3022_v8 = vsel (%p8049_p13), %vm8815_vm2, %v8770_v52, 0.0  ;;  %vm8829_vm2 = vcmask (%p8049_p13), 1041408  }
 0xae9   : > { %v7989_v20 = vadd.f32 %v6003_v20, %v2920_v2  }
 0xaea   : > { %v4388_v28 = vpop.f32.mrf.mxu1 }
 0xaeb   : > { %v8771_v7 = vmov %v7989_v20 }
 0xaec   : > { %v2923_v40 = vpop.f32.mrf.mxu1  ;;  %v3024_v14 = vsel (%p8049_p13), %vm8816_vm4, %v8771_v7, 0.0  ;;  %vm8830_vm4 = vmmov (%p8049_p13), %vm8814_vm1 }
 0xaed   : > { %v7992_v56 = vadd.f32 %v5999_v56, %v2923_v40  }
 0xaee   : > { %v4389_v21 = vpop.f32.mrf.mxu1 }
 0xaef   : > { %v8772_v63 = vmov %v7992_v56 }
 0xaf0   : > { %v2928_v24 = vpop.f32.mrf.mxu1  ;;  %v3026_v22 = vsel (%p8049_p13), %vm8817_vm5, %v8772_v63, 0.0  ;;  %vm8831_vm5 = vmmov (%p8049_p13), %vm8814_vm1 }
 0xaf1   : > { %v7995_v54 = vadd.f32 %v5995_v54, %v2928_v24  }
 0xaf2   : > { %v4392_v6 = vpop.f32.mrf.mxu1 }
 0xaf3   : > { %v8773_v60 = vmov %v7995_v54 }
 0xaf4   : > { %v2931_v29 = vpop.f32.mrf.mxu1 }
 0xaf5   : > { %v7998_v11 = vadd.f32 %v5991_v11, %v2931_v29  }
 0xaf6   : > { %v4393_v41 = vpop.f32.mrf.mxu1 }
 0xaf7   : > { %v8774_v3 = vmov %v7998_v11 }
 0xaf8   : > { %v2936_v27 = vpop.f32.mrf.mxu1 }
 0xaf9   : > { %v8001_v48 = vadd.f32 %v5987_v48, %v2936_v27  }
 0xafa   : > { %v4396_v20 = vpop.f32.mrf.mxu1 }
 0xafb   : > { %v8775_v49 = vmov %v8001_v48 }
 0xafc   : > { %v2939_v2 = vpop.f32.mrf.mxu1 }
 0xafd   : > { %v8004_v61 = vadd.f32 %v5983_v61, %v2939_v2  }
 0xafe   : > { %v4397_v56 = vpop.f32.mrf.mxu1 }
 0xaff   : > { %v8776_v28 = vmov %v8004_v61 }
 0xb00   : > { %v2944_v40 = vpop.f32.mrf.mxu1 }
 0xb01   : > { %v8007_v57 = vadd.f32 %v5979_v57, %v2944_v40  }
 0xb02   : > { %v4400_v54 = vpop.f32.mrf.mxu1 }
 0xb03   : > { %v8777_v21 = vmov %v8007_v57 }
 0xb04   : > { %v2947_v24 = vpop.f32.mrf.mxu1 }
 0xb05   : > { %v8010_v32 = vadd.f32 %v5975_v32, %v2947_v24  }
 0xb06   : > { %v4401_v11 = vpop.f32.mrf.mxu1 }
 0xb07   : > { %v8778_v29 = vmov %v8010_v32 }
 0xb08   : > { %v2952_v6 = vpop.f32.mrf.mxu1 }
 0xb09   : > { %v8013_v23 = vadd.f32 %v5971_v23, %v2952_v6  }
 0xb0a   : > { %v4404_v48 = vpop.f32.mrf.mxu1 }
 0xb0b   : > { %v8779_v27 = vmov %v8013_v23 }
 0xb0c   : > { %v2955_v41 = vpop.f32.mrf.mxu1 }
 0xb0d   : > { %v8016_v4 = vadd.f32 %v5967_v4, %v2955_v41  }
 0xb0e   : > { %v4405_v61 = vpop.f32.mrf.mxu1 }
 0xb0f   : > { %v8780_v2 = vmov %v8016_v4 }
 0xb10   : > { %v2960_v20 = vpop.f32.mrf.mxu1 }
 0xb11   : > { %v8019_v58 = vadd.f32 %v5963_v58, %v2960_v20  }
 0xb12   : > { %v4408_v57 = vpop.f32.mrf.mxu1 }
 0xb13   : > { %v8781_v40 = vmov %v8019_v58 }
 0xb14   : > { %v2963_v56 = vpop.f32.mrf.mxu1 }
 0xb15   : > { %v8022_v36 = vadd.f32 %v5959_v36, %v2963_v56   ;;  %v8810_v56 = vmov %v8772_v63 }
 0xb16   : > { %v4409_v32 = vpop.f32.mrf.mxu1  ;;  %v3032_v56 = vsel (%p8049_p13), %vm8820_vm6, %v8775_v49, 0.0  ;;  %vm8834_vm6 = vmmov (%p8049_p13), %vm8814_vm1 }
 0xb17   : > { %v8782_v24 = vmov %v8022_v36  ;;  %v8804_v32 = vmov %v8778_v29 }
 0xb18   : > { %v2968_v54 = vpop.f32.mrf.mxu1 }
 0xb19   : > { %v8025_v0 = vadd.f32 %v5955_v0, %v2968_v54   ;;  %v8809_v54 = vmov %v8773_v60 }
 0xb1a   : > { %v4412_v23 = vpop.f32.mrf.mxu1  ;;  %v3072_v54 = vmul.f32 (%p8049_p13), %v8770_v52, %v8770_v52 }
 0xb1b   : > { %v8783_v18 = vmov %v8025_v0  ;;  %v8803_v23 = vmov %v8779_v27 }
 0xb1c   : > { %v2971_v11 = vpop.f32.mrf.mxu1  ;;  %v3036_v23 = vsel (%p8049_p13), %vm8822_vm8, %v8777_v21, 0.0  ;;  %vm8836_vm8 = vmmov (%p8049_p13), %vm8814_vm1 }
 0xb1d   : > { %v8028_v62 = vadd.f32 %v5951_v62, %v2971_v11   ;;  %v8808_v11 = vmov %v8774_v3 }
 0xb1e   : > { %v4413_v4 = vpop.f32.mrf.mxu1 }
 0xb1f   : > { %v8784_v26 = vmov %v8028_v62  ;;  %v8802_v4 = vmov %v8780_v2 }
 0xb20   : > { %v2976_v6 = vpop.f32.mrf.mxu1 }
 0xb21   : > { %v8031_v10 = vadd.f32 %v5947_v10, %v2976_v6   ;;  %v8813_v6 = vmov %v8769_v44 }
 0xb22   : > { %v4416_v58 = vpop.f32.mrf.mxu1  ;;  %v3021_v6 = vsel (%p8049_p13), %vm8814_vm1, %v8769_v44, 0.0 }
 0xb23   : > { %v8785_v30 = vmov %v8031_v10  ;;  %v8801_v58 = vmov %v8781_v40  ;;  %v3023_v5 = vadd.f32 (%p8049_p13), %v3022_v8, %v3021_v6  ;;  %v3071_v8 = vmul.f32 (%p8049_p13), %v8769_v44, %v8769_v44  ;;  %v3423_v6 = vld [vmem:[%s8477_s22 + $0x8] sm:$0xff] (%p8049_p13) }
 0xb24   : > { %v2979_v48 = vpop.f32.mrf.mxu1  ;;  %v3075_v58 = vmul.f32 (%p8049_p13), %v8773_v60, %v8773_v60 }
 0xb25   : > { %v8034_v45 = vadd.f32 %v5943_v45, %v2979_v48   ;;  %v8807_v48 = vmov %v8775_v49  ;;  %v3025_v46 = vadd.f32 (%p8049_p13), %v3024_v14, %v3023_v5  ;;  %v3073_v14 = vmul.f32 (%p8049_p13), %v8771_v7, %v8771_v7 }
 0xb26   : > { %v4417_v36 = vpop.f32.mrf.mxu1  ;;  %v3074_v5 = vmul.f32 (%p8049_p13), %v8772_v63, %v8772_v63  ;;  %v3093_v11 = vsel (%p8049_p13), %vm8823_vm3, %v3071_v8, 0.0  ;;  %v3094_v48 = vsel (%p8049_p13), %vm8824_vm10, %v3072_v54, 0.0  ;;  %v3078_v54 = vmul.f32 (%p8049_p13), %v8776_v28, %v8776_v28  ;;  %vm8837_vm3 = vmmov (%p8049_p13), %vm8814_vm1 }
 0xb27   : > { %v8786_v38 = vmov %v8034_v45  ;;  %v8800_v36 = vmov %v8782_v24  ;;  %vm8838_vm10 = vmmov (%p8049_p13), %vm8814_vm1 }
 0xb28   : > { %v2984_v41 = vpop.f32.mrf.mxu1  ;;  %v3096_v36 = vsel (%p8049_p13), %vm8825_vm11, %v3073_v14, 0.0 }
 0xb29   : > { %v8037_v19 = vadd.f32 %v5939_v19, %v2984_v41   ;;  %v8812_v41 = vmov %v8770_v52 }
 0xb2a   : > { %v4420_v0 = vpop.f32.mrf.mxu1  ;;  %v3038_v41 = vsel (%p8049_p13), %vm8826_vm12, %v8778_v29, 0.0 }
 0xb2b   : > { %v8787_v42 = vmov %v8037_v19  ;;  %v8799_v0 = vmov %v8783_v18 }
 0xb2c   : > { %v2987_v61 = vpop.f32.mrf.mxu1  ;;  %v8795_v19 = vmov %v8787_v42  ;;  %v3095_v0 = vadd.f32 (%p8049_p13), %v3094_v48, %v3093_v11  ;;  %v3079_v11 = vmul.f32 (%p8049_p13), %v8777_v21, %v8777_v21 }
 0xb2d   : > { %v8040_v55 = vadd.f32 %v5935_v55, %v2987_v61   ;;  %v8806_v61 = vmov %v8776_v28 }
 0xb2e   : > { %v4421_v62 = vpop.f32.mrf.mxu1 }
 0xb2f   : > { %v8788_v53 = vmov %v8040_v55  ;;  %v8798_v62 = vmov %v8784_v26 }
 0xb30   : > { %v2992_v20 = vpop.f32.mrf.mxu1  ;;  %v8794_v55 = vmov %v8788_v53  ;;  %v3076_v62 = vmul.f32 (%p8049_p13), %v8774_v3, %v8774_v3 }
 0xb31   : > { %v8043_v13 = vadd.f32 %v5931_v13, %v2992_v20   ;;  %v8811_v20 = vmov %v8771_v7  ;;  %v3030_v55 = vsel (%p8049_p13), %vm8819_vm9, %v8774_v3, 0.0  ;;  %vm8833_vm9 = vmmov (%p8049_p13), %vm8814_vm1 }
 0xb32   : > { %v4424_v10 = vpop.f32.mrf.mxu1  ;;  %v3098_v20 = vsel (%p8049_p13), %vm8827_vm13, %v3074_v5, 0.0  ;;  %v3102_v14 = vsel (%p8049_p13), %vm8831_vm5, %v3076_v62, 0.0 }
 0xb33   : > { %v8789_v1 = vmov %v8043_v13  ;;  %v8797_v10 = vmov %v8785_v30 }
 0xb34   : > { %v2995_v57 = vpop.f32.mrf.mxu1  ;;  %v8793_v13 = vmov %v8789_v1  ;;  %2548 = sbr.rel (!%p8049_p13) target bundleno = 2372 (0x944), region = 257  ;;  %v3040_v10 = vsel (%p8049_p13), %vm8828_vm15, %v8779_v27, 0.0 }
 0xb35   : > { %v8046_v59 = vadd.f32 %v5927_v59, %v2995_v57   ;;  %v8805_v57 = vmov %v8777_v21  ;;  %v3027_v13 = vadd.f32 (%p8049_p13), %v3026_v22, %v3025_v46  ;;  %v3034_v22 = vsel (%p8049_p13), %vm8821_vm7, %v8776_v28, 0.0  ;;  %vm8835_vm7 = vmmov (%p8049_p13), %vm8814_vm1 }
 0xb36   : > { %v4425_v45 = vpop.f32.mrf.mxu1  ;;  %v3097_v57 = vadd.f32 (%p8049_p13), %v3096_v36, %v3095_v0  ;;  %v3106_v0 = vsel (%p8049_p13), %vm8835_vm7, %v3078_v54, 0.0  ;;  %v3083_v54 = vmul.f32 (%p8049_p13), %v8781_v40, %v8781_v40 }
 0xb37   : > { %v8790_v16 = vmov %v8046_v59  ;;  %v8796_v45 = vmov %v8786_v38 }
 0xb38   : > { %v8792_v59 = vmov %v8790_v16  ;;  %v3424_v45 = vld [vmem:[%s8477_s22 + $0x10] sm:$0x3] (%p8049_p13)  ;;  %v3099_v8 = vadd.f32 (%p8049_p13), %v3098_v20, %v3097_v57  ;;  %v3108_v57 = vsel (%p8049_p13), %vm8837_vm3, %v3079_v11, 0.0 }
 0xb39   :  { %v3028_v59 = vsel %vm8818_vm14, %v8773_v60, 0.0  ;;  %4427 = vmatpush3.msk.msra.mxu1 %vm8829_vm2, %v3424_v45  ;;  %vm8832_vm14 = vmmov %vm8814_vm1  ;;  %v3050_v45 = vsel %vm8838_vm10, %v8784_v26, 0.0 }
 0xb3a   :  { %v3029_v19 = vadd.f32 %v3028_v59, %v3027_v13  ;;  %v3077_v13 = vmul.f32 %v8775_v49, %v8775_v49  ;;  %4428 = vmatprep.subr.mxu1 %v6037_v47 }
 0xb3b   :  { %4429 = vmatpush3.msra.mxu1 %v3423_v6 }
 0xb3c   :  { %v3031_v32 = vadd.f32 %v3030_v55, %v3029_v19  ;;  %v3100_v55 = vsel %vm8814_vm1, %v3075_v58, 0.0  ;;  %v8172_v19 = vld.sshfl [vmem:[#allocation20] sm:$0x33 pattern:$0x76325410]  ;;  %4430 = vmatprep.subr.mxu1 %v6037_v47  ;;  %v3046_v58 = vsel %vm8834_vm6, %v8782_v24, 0.0 }
 0xb3d   :  { %v3347_v5 = vcombine.high %v8172_v19, %v8172_v19 }
 0xb3e   :  { %v3033_v46 = vadd.f32 %v3032_v56, %v3031_v32  ;;  %v3042_v56 = vsel %vm8830_vm4, %v8780_v2, 0.0 }
 0xb3f   :  { %3960 = vmatprep.mubr.msk.f32.mxu0 %vm1587_vm0, %v3347_v5  ;;  %vm8839_vm0 = vmmov %vm8814_vm1 }
 0xb40   :  { %v3035_v4 = vadd.f32 %v3034_v22, %v3033_v46  ;;  %v3044_v22 = vsel %vm8832_vm14, %v8781_v40, 0.0  ;;  %v3101_v46 = vadd.f32 %v3100_v55, %v3099_v8  ;;  %vm8840_vm11 = vmmov %vm8839_vm0 }
 0xb41   :  { %vm8841_vm12 = vmmov %vm8839_vm0 }
 0xb42   :  { %v3037_v61 = vadd.f32 %v3036_v23, %v3035_v4  ;;  %v3104_v4 = vsel %vm8833_vm9, %v3077_v13, 0.0  ;;  %v3103_v48 = vadd.f32 %v3102_v14, %v3101_v46  ;;  %v3082_v13 = vmul.f32 %v8780_v2, %v8780_v2  ;;  %vm8842_vm13 = vmmov %vm8839_vm0 }
 0xb43   :  { %vm8843_vm15 = vmmov %vm8839_vm0 }
 0xb44   :  { %v3039_v59 = vadd.f32 %v3038_v41, %v3037_v61  ;;  %v3080_v41 = vmul.f32 %v8778_v29, %v8778_v29  ;;  %v3048_v61 = vsel %vm8836_vm8, %v8783_v18, 0.0  ;;  %v3105_v62 = vadd.f32 %v3104_v4, %v3103_v48  ;;  %vm8844_vm1 = vmmov %vm8839_vm0 }
 0xb45   :  { %v3114_v11 = vsel %vm8843_vm15, %v3082_v13, 0.0  ;;  %v3056_v4 = vsel %vm8844_vm1, %v8787_v42, 0.0  ;;  %vm8845_vm2 = vmmov %vm8839_vm0 }
 0xb46   :  { %v3041_v32 = vadd.f32 %v3040_v10, %v3039_v59  ;;  %v3081_v10 = vmul.f32 %v8779_v27, %v8779_v27  ;;  %v3107_v6 = vadd.f32 %v3106_v0, %v3105_v62  ;;  %v3110_v55 = vsel %vm8839_vm0, %v3080_v41, 0.0  ;;  %vm8846_vm4 = vmmov %vm8839_vm0 }
 0xb47   :  { %v3116_v41 = vsel %vm8845_vm2, %v3083_v54, 0.0  ;;  %v3058_v0 = vsel %vm8846_vm4, %v8788_v53, 0.0  ;;  %vm8847_vm5 = vmmov %vm8839_vm0 }
 0xb48   :  { %v3043_v23 = vadd.f32 %v3042_v56, %v3041_v32  ;;  %v3052_v56 = vsel %vm8840_vm11, %v8785_v30, 0.0  ;;  %v3109_v8 = vadd.f32 %v3108_v57, %v3107_v6  ;;  %v3112_v14 = vsel %vm8841_vm12, %v3081_v10, 0.0  ;;  %vm8848_vm14 = vmmov %vm8839_vm0 }
 0xb49   :  { %v3060_v57 = vsel %vm8848_vm14, %v8789_v1, 0.0  ;;  %vm8849_vm9 = vmmov %vm8839_vm0 }
 0xb4a   :  { %v3045_v36 = vadd.f32 %v3044_v22, %v3043_v23  ;;  %v3054_v22 = vsel %vm8842_vm13, %v8786_v38, 0.0  ;;  %v3111_v46 = vadd.f32 %v3110_v55, %v3109_v8  ;;  %v3084_v23 = vmul.f32 %v8782_v24, %v8782_v24  ;;  %vm8850_vm6 = vmmov %vm8839_vm0 }
 0xb4b   :  { %v3062_v55 = vsel %vm8850_vm6, %v8790_v16, 0.0  ;;  %vm8851_vm7 = vmmov %vm8839_vm0 }
 0xb4c   :  { %v3047_v20 = vadd.f32 %v3046_v58, %v3045_v36  ;;  %v3113_v58 = vadd.f32 %v3112_v14, %v3111_v46  ;;  %v3085_v36 = vmul.f32 %v8783_v18, %v8783_v18  ;;  %v3118_v10 = vsel %vm8847_vm5, %v3084_v23, 0.0  ;;  %vm8852_vm8 = vmmov %vm8839_vm0 }
 0xb4d   :  { %v3089_v46 = vmul.f32 %v8787_v42, %v8787_v42  ;;  %vm8853_vm3 = vmmov %vm8839_vm0 }
 0xb4e   :  { %v3049_v59 = vadd.f32 %v3048_v61, %v3047_v20  ;;  %v3115_v61 = vadd.f32 %v3114_v11, %v3113_v58  ;;  %v3086_v20 = vmul.f32 %v8784_v26, %v8784_v26  ;;  %v3120_v13 = vsel %vm8849_vm9, %v3085_v36, 0.0  ;;  %vm8854_vm10 = vmmov %vm8839_vm0 }
 0xb4f   :  { %vm8855_vm11 = vmmov %vm8839_vm0 }
 0xb50   :  { %v3051_v32 = vadd.f32 %v3050_v45, %v3049_v59  ;;  %v3117_v45 = vadd.f32 %v3116_v41, %v3115_v61  ;;  %v3087_v59 = vmul.f32 %v8785_v30, %v8785_v30  ;;  %v3122_v54 = vsel %vm8851_vm7, %v3086_v20, 0.0  ;;  %vm8856_vm12 = vmmov %vm8839_vm0 }
 0xb51   :  { %v3091_v41 = vmul.f32 %v8789_v1, %v8789_v1  ;;  %v3092_v20 = vmul.f32 %v8790_v16, %v8790_v16 }
 0xb52   :  { %v3053_v5 = vadd.f32 %v3052_v56, %v3051_v32  ;;  %v3119_v56 = vadd.f32 %v3118_v10, %v3117_v45  ;;  %v3088_v32 = vmul.f32 %v8786_v38, %v8786_v38 }
 0xb53   :  { %v3132_v45 = vsel %vm8855_vm11, %v3091_v41, 0.0 }
 0xb54   :  { %v3055_v48 = vadd.f32 %v3054_v22, %v3053_v5  ;;  %v3121_v14 = vadd.f32 %v3120_v13, %v3119_v56  ;;  %v3124_v5 = vsel %vm8852_vm8, %v3087_v59, 0.0  ;;  %v3126_v58 = vsel %vm8853_vm3, %v3088_v32, 0.0 }
 0xb55   :  { %v3134_v13 = vsel %vm8856_vm12, %v3092_v20, 0.0 }
 0xb56   :  { %v3057_v62 = vadd.f32 %v3056_v4, %v3055_v48  ;;  %v3123_v23 = vadd.f32 %v3122_v54, %v3121_v14  ;;  %v3090_v4 = vmul.f32 %v8788_v53, %v8788_v53 }
 0xb58   :  { %v3059_v6 = vadd.f32 %v3058_v0, %v3057_v62  ;;  %v3125_v48 = vadd.f32 %v3124_v5, %v3123_v23  ;;  %v3128_v0 = vsel %vm8854_vm10, %v3089_v46, 0.0  ;;  %v3130_v10 = vsel %vm8839_vm0, %v3090_v4, 0.0 }
 0xb5a   :  { %v3061_v8 = vadd.f32 %v3060_v57, %v3059_v6  ;;  %v3127_v61 = vadd.f32 %v3126_v58, %v3125_v48 }
 0xb5c   :  { %v3063_v22 = vadd.f32 %v3062_v55, %v3061_v8  ;;  %v3129_v57 = vadd.f32 %v3128_v0, %v3127_v61 }
 0xb5e   :  { %v3064_v11 = vrot.slane %v3063_v22, 4  ;;  %v3131_v59 = vadd.f32 %v3130_v10, %v3129_v57 }
 0xb60   :  { %v3065_v36 = vadd.f32 %v3064_v11, %v3063_v22  ;;  %v3133_v55 = vadd.f32 %v3132_v45, %v3131_v59 }
 0xb62   :  { %v3066_v62 = vrot.slane %v3065_v36, 2  ;;  %v3135_v8 = vadd.f32 %v3134_v13, %v3133_v55 }
 0xb64   :  { %v3067_v6 = vadd.f32 %v3066_v62, %v3065_v36  ;;  %v3136_v32 = vrot.slane %v3135_v8, 4 }
 0xb66   :  { %v3068_v56 = vrot.slane %v3067_v6, 1  ;;  %v3137_v14 = vadd.f32 %v3136_v32, %v3135_v8 }
 0xb68   :  { %v3069_v54 = vadd.f32 %v3068_v56, %v3067_v6  ;;  %v3138_v22 = vrot.slane %v3137_v14, 2 }
 0xb6a   :  { %v8249_v46 = vmul.f32 0.0061728396, %v3069_v54  ;;  %v3139_v5 = vadd.f32 %v3138_v22, %v3137_v14  ;;  %v8297_v22 = vld [vmem:[#allocation19] ss:$0 sm:$0xff] }
 0xb6c   :  { %v3140_v23 = vrot.slane %v3139_v5, 1  ;;  %v3143_v4 = vmul.f32 %v8249_v46, %v8249_v46  ;;  %v3162_v0 = vsub.f32 %v8784_v26, %v8249_v46  ;;  %v3161_v61 = vsub.f32 %v8783_v18, %v8249_v46 }
 0xb6d   :  { %v3160_v62 = vsub.f32 %v8782_v24, %v8249_v46  ;;  %v3159_v20 = vsub.f32 %v8781_v40, %v8249_v46  ;;  %v3158_v10 = vsub.f32 %v8780_v2, %v8249_v46  ;;  %v3157_v57 = vsub.f32 %v8779_v27, %v8249_v46 }
 0xb6e   :  { %v3141_v11 = vadd.f32 %v3140_v23, %v3139_v5  ;;  %v3156_v45 = vsub.f32 %v8778_v29, %v8249_v46  ;;  %v3155_v26 = vsub.f32 %v8777_v21, %v8249_v46  ;;  %v3154_v18 = vsub.f32 %v8776_v28, %v8249_v46  ;;  %v8283_v21 = vld [vmem:[#allocation17] ss:$0 sm:$0xff] }
 0xb6f   :  { %v3153_v24 = vsub.f32 %v8775_v49, %v8249_v46  ;;  %v3152_v40 = vsub.f32 %v8774_v3, %v8249_v46  ;;  %v3151_v2 = vsub.f32 %v8773_v60, %v8249_v46  ;;  %v3150_v27 = vsub.f32 %v8772_v63, %v8249_v46 }
 0xb70   :  { %v3142_v58 = vmul.f32 0.0061728396, %v3141_v11  ;;  %v3149_v29 = vsub.f32 %v8771_v7, %v8249_v46  ;;  %v3148_v59 = vsub.f32 %v8770_v52, %v8249_v46  ;;  %v3166_v55 = vsub.f32 %v8788_v53, %v8249_v46 }
 0xb71   :  { %v8857_v63 = vsub.f32 %v8769_v44, %v8249_v46 }
 0xb72   :  { %v3144_v48 = vsub.f32 %v3142_v58, %v3143_v4 }
 0xb74   :  { %v3145_v36 = vmax.f32 %v3144_v48, 0.0 }
 0xb76   :  { %v3169_v41 = vadd.f32 1e-05, %v3145_v36 }
 0xb78   :  { %5167 = vrsqrt.f32 %v3169_v41 }
 0xb85   :  { %v8281_v6 = vpop.eup %5167 }
 0xb86   :  { %v3186_v8 = vmul.f32 %v8281_v6, %v3162_v0  ;;  %v3185_v32 = vmul.f32 %v8281_v6, %v3161_v61  ;;  %v3184_v54 = vmul.f32 %v8281_v6, %v3160_v62  ;;  %v3183_v14 = vmul.f32 %v8281_v6, %v3159_v20 }
 0xb87   :  { %v3182_v5 = vmul.f32 %v8281_v6, %v3158_v10  ;;  %v3181_v23 = vmul.f32 %v8281_v6, %v3157_v57  ;;  %v3180_v11 = vmul.f32 %v8281_v6, %v3156_v45  ;;  %v3179_v4 = vmul.f32 %v8281_v6, %v3155_v26 }
 0xb88   :  { %v3214_v58 = vmul.f32 %v8283_v21, %v3186_v8  ;;  %v3213_v48 = vmul.f32 %v8283_v21, %v3185_v32  ;;  %v3212_v36 = vmul.f32 %v8283_v21, %v3184_v54  ;;  %v3211_v41 = vmul.f32 %v8283_v21, %v3183_v14 }
 0xb89   :  { %v3210_v0 = vmul.f32 %v8283_v21, %v3182_v5  ;;  %v3209_v61 = vmul.f32 %v8283_v21, %v3181_v23  ;;  %v3208_v62 = vmul.f32 %v8283_v21, %v3180_v11  ;;  %v3207_v20 = vmul.f32 %v8283_v21, %v3179_v4 }
 0xb8a   :  { %v3243_v10 = vadd.f32 %v8297_v22, %v3214_v58  ;;  %v3242_v57 = vadd.f32 %v8297_v22, %v3213_v48  ;;  %v3241_v45 = vadd.f32 %v8297_v22, %v3212_v36  ;;  %v3240_v26 = vadd.f32 %v8297_v22, %v3211_v41 }
 0xb8b   :  { %v3239_v8 = vadd.f32 %v8297_v22, %v3210_v0  ;;  %v3238_v32 = vadd.f32 %v8297_v22, %v3209_v61  ;;  %v3237_v54 = vadd.f32 %v8297_v22, %v3208_v62  ;;  %v3236_v14 = vadd.f32 %v8297_v22, %v3207_v20 }
 0xb8c   :  { %vm3265_vm13 = vcmp.gt.f32.partialorder %v3243_v10, 0.0  ;;  %v3287_v5 = vmul.f32 0.1, %v3243_v10  ;;  %vm3264_vm15 = vcmp.gt.f32.partialorder %v3242_v57, 0.0  ;;  %v3286_v23 = vmul.f32 0.1, %v3242_v57 }
 0xb8d   :  { %vm3263_vm1 = vcmp.gt.f32.partialorder %v3241_v45, 0.0  ;;  %v3285_v11 = vmul.f32 0.1, %v3241_v45  ;;  %vm3262_vm2 = vcmp.gt.f32.partialorder %v3240_v26, 0.0  ;;  %v3284_v4 = vmul.f32 0.1, %v3240_v26 }
 0xb8e   :  { %v3309_v58 = vsel %vm3265_vm13, %v3243_v10, %v3287_v5  ;;  %v3308_v48 = vsel %vm3264_vm15, %v3242_v57, %v3286_v23  ;;  %vm3261_vm4 = vcmp.gt.f32.partialorder %v3239_v8, 0.0  ;;  %v3283_v36 = vmul.f32 0.1, %v3239_v8 }
 0xb8f   :  { %v3331_v41 = vadd.f32 %v3309_v58, %v7240_v25  ;;  %v3330_v0 = vadd.f32 %v3308_v48, %v7235_v34  ;;  %v3307_v61 = vsel %vm3263_vm1, %v3241_v45, %v3285_v11  ;;  %v3306_v62 = vsel %vm3262_vm2, %v3240_v26, %v3284_v4 }
 0xb90   :  { %v3329_v20 = vadd.f32 %v3307_v61, %v7230_v43  ;;  %v3328_v56 = vadd.f32 %v3306_v62, %v7225_v15  ;;  %vm3260_vm5 = vcmp.gt.f32.partialorder %v3238_v32, 0.0  ;;  %v3305_v13 = vsel %vm3261_vm4, %v3239_v8, %v3283_v36 }
 0xb91   :  { %3353 = vmatpush1.msra.mxu0 %v3331_v41  ;;  %v3282_v10 = vmul.f32 0.1, %v3238_v32  ;;  %vm3259_vm14 = vcmp.gt.f32.partialorder %v3237_v54, 0.0  ;;  %v3281_v57 = vmul.f32 0.1, %v3237_v54  ;;  %vm3258_vm9 = vcmp.gt.f32.partialorder %v3236_v14, 0.0 }
 0xb92   :  { %3354 = vmatprep.subr.mxu0 %v6037_v47  ;;  %v3280_v25 = vmul.f32 0.1, %v3236_v14  ;;  %v3178_v43 = vmul.f32 %v8281_v6, %v3154_v18  ;;  %v3177_v15 = vmul.f32 %v8281_v6, %v3153_v24  ;;  %v3176_v26 = vmul.f32 %v8281_v6, %v3152_v40 }
 0xb93   :  { %3355 = vmatpush1.msra.mxu0 %v3330_v0  ;;  %v3304_v34 = vsel %vm3260_vm5, %v3238_v32, %v3282_v10  ;;  %v3303_v45 = vsel %vm3259_vm14, %v3237_v54, %v3281_v57  ;;  %v3175_v28 = vmul.f32 %v8281_v6, %v3151_v2  ;;  %v3327_v18 = vadd.f32 %v3305_v13, %v7220_v35 }
 0xb94   :  { %3356 = vmatprep.subr.mxu0 %v6037_v47  ;;  %v3326_v49 = vadd.f32 %v3304_v34, %v7215_v31  ;;  %v3325_v24 = vadd.f32 %v3303_v45, %v7210_v9  ;;  %v3206_v8 = vmul.f32 %v8283_v21, %v3178_v43  ;;  %v3302_v32 = vsel %vm3258_vm9, %v3236_v14, %v3280_v25 }
 0xb95   :  { %3357 = vmatpush1.msra.mxu0 %v3329_v20  ;;  %v3205_v3 = vmul.f32 %v8283_v21, %v3177_v15  ;;  %v3204_v40 = vmul.f32 %v8283_v21, %v3176_v26  ;;  %v3203_v60 = vmul.f32 %v8283_v21, %v3175_v28  ;;  %v3174_v31 = vmul.f32 %v8281_v6, %v3150_v27 }
 0xb96   :  { %3358 = vmatprep.subr.mxu0 %v6037_v47  ;;  %v3235_v2 = vadd.f32 %v8297_v22, %v3206_v8  ;;  %v3173_v9 = vmul.f32 %v8281_v6, %v3149_v29  ;;  %v3172_v35 = vmul.f32 %v8281_v6, %v3148_v59  ;;  %v3171_v27 = vmul.f32 %v8281_v6, %v8857_v63 }
 0xb97   :  { %3359 = vmatpush1.msra.mxu0 %v3328_v56  ;;  %v3234_v13 = vadd.f32 %v8297_v22, %v3205_v3  ;;  %v3233_v54 = vadd.f32 %v8297_v22, %v3204_v40  ;;  %v3232_v14 = vadd.f32 %v8297_v22, %v3203_v60  ;;  %v3202_v52 = vmul.f32 %v8283_v21, %v3174_v31 }
 0xb98   :  { %3360 = vmatprep.subr.mxu0 %v6037_v47  ;;  %vm3257_vm6 = vcmp.gt.f32.partialorder %v3235_v2, 0.0  ;;  %v3279_v7 = vmul.f32 0.1, %v3235_v2  ;;  %v3201_v29 = vmul.f32 %v8283_v21, %v3173_v9  ;;  %v3324_v11 = vadd.f32 %v3302_v32, %v7205_v50 }
 0xb99   :  { %3361 = vmatpush1.msra.mxu0 %v3327_v18  ;;  %vm3256_vm7 = vcmp.gt.f32.partialorder %v3234_v13, 0.0  ;;  %v3278_v59 = vmul.f32 0.1, %v3234_v13  ;;  %vm3255_vm8 = vcmp.gt.f32.partialorder %v3233_v54, 0.0  ;;  %v3277_v56 = vmul.f32 0.1, %v3233_v54 }
 0xb9a   :  { %3362 = vmatprep.subr.mxu0 %v6037_v47  ;;  %v3301_v5 = vsel %vm3257_vm6, %v3235_v2, %v3279_v7  ;;  %vm3254_vm3 = vcmp.gt.f32.partialorder %v3232_v14, 0.0  ;;  %v3276_v44 = vmul.f32 0.1, %v3232_v14  ;;  %v3231_v23 = vadd.f32 %v8297_v22, %v3202_v52 }
 0xb9b   :  { %3363 = vmatpush1.msra.mxu0 %v3326_v49  ;;  %v3300_v4 = vsel %vm3256_vm7, %v3234_v13, %v3278_v59  ;;  %v3230_v58 = vadd.f32 %v8297_v22, %v3201_v29  ;;  %v3165_v48 = vsub.f32 %v8787_v42, %v8249_v46  ;;  %v3323_v36 = vadd.f32 %v3301_v5, %v7200_v17  ;;  %v8860_v13 = vld [vmem:[#allocation33_spill] sm:$0xff]  ;;  %v8862_v59 = vld [vmem:[#allocation39_spill] sm:$0xff] }
 0xb9c   :  { %3364 = vmatprep.subr.mxu0 %v6037_v47  ;;  %v3164_v41 = vsub.f32 %v8786_v38, %v8249_v46  ;;  %v3322_v0 = vadd.f32 %v3300_v4, %v7195_v33  ;;  %v3299_v61 = vsel %vm3255_vm8, %v3233_v54, %v3277_v56  ;;  %v3298_v62 = vsel %vm3254_vm3, %v3232_v14, %v3276_v44 }
 0xb9d   :  { %3365 = vmatpush1.msra.mxu0 %v3325_v24  ;;  %v3275_v50 = vmul.f32 0.1, %v3231_v23  ;;  %v3200_v20 = vmul.f32 %v8283_v21, %v3172_v35  ;;  %v3199_v42 = vmul.f32 %v8283_v21, %v3171_v27  ;;  %v8858_v10 = vsub.f32 %v8790_v16, %v8249_v46  ;;  %v8861_v27 = vld [vmem:[#allocation32_spill] sm:$0xff] }
 0xb9e   :  { %3366 = vmatprep.subr.mxu0 %v6037_v47  ;;  %v8859_v38 = vsub.f32 %v8789_v1, %v8249_v46  ;;  %vm3253_vm10 = vcmp.gt.f32.partialorder %v3231_v23, 0.0  ;;  %v3274_v57 = vmul.f32 0.1, %v3230_v58  ;;  %v3190_v25 = vmul.f32 %v8281_v6, %v3166_v55 }
 0xb9f   :  { %v3192_v17 = vmul.f32 %v8281_v6, %v8858_v10  ;;  %3367 = vmatpush1.msra.mxu0 %v3324_v11  ;;  %v3189_v43 = vmul.f32 %v8281_v6, %v3165_v48  ;;  %vm3252_vm0 = vcmp.gt.f32.partialorder %v3230_v58, 0.0  ;;  %v3229_v16 = vadd.f32 %v8297_v22, %v3200_v20  ;;  %v8864_v48 = vld [vmem:[#allocation37_spill] sm:$0xff]  ;;  %v8867_v20 = vld [vmem:[#allocation34_spill] sm:$0xff] }
 0xba0   :  { %v3191_v33 = vmul.f32 %v8281_v6, %v8859_v38  ;;  %3368 = vmatprep.subr.mxu0 %v6037_v47  ;;  %v3228_v15 = vadd.f32 %v8297_v22, %v3199_v42  ;;  %v3163_v1 = vsub.f32 %v8785_v30, %v8249_v46  ;;  %v3321_v34 = vadd.f32 %v3299_v61, %v7190_v51  ;;  %v3422_v10 = vld [vmem:[%s8477_s22] sm:$0xff] }
 0xba1   :  { %3369 = vmatpush1.msra.mxu0 %v3323_v36  ;;  %v3220_v45 = vmul.f32 %v8283_v21, %v3192_v17  ;;  %v3320_v55 = vadd.f32 %v3298_v62, %v7184_v12  ;;  %v3297_v26 = vsel %vm3253_vm10, %v3231_v23, %v3275_v50  ;;  %v3273_v28 = vmul.f32 0.1, %v3229_v16  ;;  %v8863_v23 = vld [vmem:[#allocation38_spill] sm:$0xff]  ;;  %v8866_v62 = vld [vmem:[#allocation35_spill] sm:$0xff]  ;;  %4431 = vmatpush3.msra.mxu1 %v3422_v10 }
 0xba2   :  { %v3219_v53 = vmul.f32 %v8283_v21, %v3191_v33  ;;  %3370 = vmatprep.subr.mxu0 %v6037_v47  ;;  %v3218_v18 = vmul.f32 %v8283_v21, %v3190_v25  ;;  %v3296_v49 = vsel %vm3252_vm0, %v3230_v58, %v3274_v57  ;;  %vm3251_vm11 = vcmp.gt.f32.partialorder %v3229_v16, 0.0  ;;  %v3961_v33 = vld [vmem:[#allocation22] ss:$0 sm:$0xff] }
 0xba3   :  { %3371 = vmatpush1.msra.mxu0 %v3322_v0  ;;  %v3249_v30 = vadd.f32 %v8297_v22, %v3220_v45  ;;  %v3217_v46 = vmul.f32 %v8283_v21, %v3189_v43  ;;  %v3272_v51 = vmul.f32 0.1, %v3228_v15  ;;  %v3188_v8 = vmul.f32 %v8281_v6, %v3164_v41  ;;  %v8865_v41 = vld [vmem:[#allocation36_spill] sm:$0xff] }
 0xba4   :  { %3372 = vmatprep.subr.mxu0 %v6037_v47  ;;  %v3248_v24 = vadd.f32 %v8297_v22, %v3219_v53  ;;  %v3187_v12 = vmul.f32 %v8281_v6, %v3163_v1  ;;  %v3319_v32 = vadd.f32 %v3297_v26, %v7176_v37  ;;  %vm3250_vm12 = vcmp.gt.f32.partialorder %v3228_v15, 0.0 }
 0xba5   :  { %3373 = vmatpush1.msra.mxu0 %v3321_v34  ;;  %v3295_v3 = vsel %vm3251_vm11, %v3229_v16, %v3273_v28  ;;  %v3293_v40 = vmul.f32 0.1, %v3249_v30  ;;  %v3247_v60 = vadd.f32 %v8297_v22, %v3218_v18  ;;  %v3318_v2 = vadd.f32 %v3296_v49, %v7168_v39 }
 0xba6   :  { %3374 = vmatprep.subr.mxu0 %v6037_v47  ;;  %vm3271_vm13 = vcmp.gt.f32.partialorder %v3249_v30, 0.0  ;;  %v3216_v31 = vmul.f32 %v8283_v21, %v3188_v8  ;;  %v3294_v9 = vsel %vm3250_vm12, %v3228_v15, %v3272_v51  ;;  %v3292_v6 = vmul.f32 0.1, %v3248_v24 }
 0xba7   :  { %3375 = vmatpush1.msra.mxu0 %v3320_v55  ;;  %v3246_v35 = vadd.f32 %v8297_v22, %v3217_v46  ;;  %v3215_v37 = vmul.f32 %v8283_v21, %v3187_v12  ;;  %v3317_v54 = vadd.f32 %v3295_v3, %v8860_v13  ;;  %vm3270_vm15 = vcmp.gt.f32.partialorder %v3248_v24, 0.0 }
 0xba8   :  { %3376 = vmatprep.subr.mxu0 %v6037_v47  ;;  %v3315_v14 = vsel %vm3271_vm13, %v3249_v30, %v3293_v40  ;;  %v3291_v63 = vmul.f32 0.1, %v3247_v60  ;;  %v3245_v39 = vadd.f32 %v8297_v22, %v3216_v31  ;;  %v3316_v7 = vadd.f32 %v3294_v9, %v8861_v27 }
 0xba9   :  { %3377 = vmatpush1.msra.mxu0 %v3319_v32  ;;  %vm3269_vm1 = vcmp.gt.f32.partialorder %v3247_v60, 0.0  ;;  %v3314_v52 = vsel %vm3270_vm15, %v3248_v24, %v3292_v6  ;;  %v3290_v29 = vmul.f32 0.1, %v3246_v35  ;;  %v3244_v21 = vadd.f32 %v8297_v22, %v3215_v37 }
 0xbaa   :  { %3378 = vmatprep.subr.mxu0 %v6037_v47  ;;  %v3337_v56 = vadd.f32 %v3315_v14, %v8862_v59  ;;  %vm3268_vm2 = vcmp.gt.f32.partialorder %v3246_v35, 0.0  ;;  %v3313_v5 = vsel %vm3269_vm1, %v3247_v60, %v3291_v63  ;;  %v3289_v44 = vmul.f32 0.1, %v3245_v39 }
 0xbab   :  { %3379 = vmatpush1.msra.mxu0 %v3318_v2  ;;  %v3336_v11 = vadd.f32 %v3314_v52, %v8863_v23  ;;  %vm3267_vm4 = vcmp.gt.f32.partialorder %v3245_v39, 0.0  ;;  %v3312_v4 = vsel %vm3268_vm2, %v3246_v35, %v3290_v29  ;;  %v3288_v58 = vmul.f32 0.1, %v3244_v21 }
 0xbac   :  { %3380 = vmatprep.subr.mxu0 %v6037_v47  ;;  %v3335_v36 = vadd.f32 %v3313_v5, %v8864_v48  ;;  %vm3266_vm5 = vcmp.gt.f32.partialorder %v3244_v21, 0.0  ;;  %v3311_v22 = vsel %vm3267_vm4, %v3245_v39, %v3289_v44  ;;  %v3334_v0 = vadd.f32 %v3312_v4, %v8865_v41 }
 0xbad   :  { %3381 = vmatpush1.msra.mxu0 %v3317_v54  ;;  %v3310_v61 = vsel %vm3266_vm5, %v3244_v21, %v3288_v58  ;;  %v3333_v50 = vadd.f32 %v3311_v22, %v8866_v62  ;;  %vm6038_vm14 = vmmov 0   ;;  %vm8868_vm9 = vcmask 146432  }
 0xbae   :  { %3382 = vmatprep.subr.mxu0 %v6037_v47  ;;  %v3332_v42 = vadd.f32 %v3310_v61, %v8867_v20  ;;  %4432 = vmatprep.mubr.msk.f32.mxu1 %vm6038_vm14, %v6037_v47  ;;  %vm3509_vm6 = vcmask 9216  }
 0xbaf   :  { %3383 = vmatpush1.msra.mxu0 %v3316_v7 }
 0xbb0   :  { %3404 = vmatprep.subr.mxu0 %v6037_v47 }
 0xbb1   :  { %3405 = vmatpush2.msra.mxu0 %v3337_v56 }
 0xbb2   :  { %3406 = vmatprep.subr.mxu0 %v6037_v47 }
 0xbb3   :  { %3407 = vmatpush2.msra.mxu0 %v3336_v11 }
 0xbb4   :  { %3408 = vmatprep.subr.mxu0 %v6037_v47 }
 0xbb5   :  { %3409 = vmatpush2.msra.mxu0 %v3335_v36 }
 0xbb6   :  { %3410 = vmatprep.subr.mxu0 %v6037_v47 }
 0xbb7   :  { %3411 = vmatpush2.msra.mxu0 %v3334_v0 }
 0xbb8   :  { %3412 = vmatprep.subr.mxu0 %v6037_v47 }
 0xbb9   :  { %3413 = vmatpush2.msra.mxu0 %v3333_v50 }
 0xbba   :  { %3414 = vmatprep.subr.mxu0 %v6037_v47 }
 0xbbb   :  { %3415 = vmatpush2.msra.mxu0 %v3332_v42 }
 0xbbc   :  { %3417 = vmatmul.mubr.f32.vlgmr.msra.gmra.mxu0 %v8172_v19 }
 0xc7c   :  { %v3418_v17 = vpop.f32.mrf.mxu0 }
 0xc7d   :  { %4433 = vmatmul.mubr.msk.f32.vlgmr.msra.gmra.mxu1 %vm8868_vm9, %v3418_v17 }
 0xc7e   :  { %v3420_v38 = vpop.f32.mrf.mxu0 }
 0xd3d   :  { %v3505_v57 = vpop.f32.mrf.mxu1 }
 0xd3e   :  { %v3506_v25 = vadd.f32 %v3961_v33, %v3505_v57 }
 0xd3f   :  { %v4434_v19 = vpop.f32.mrf.mxu1 }
 0xd40   :  { %3510 = vst.msk [vmem:[#allocation23] sm:$0x3] %vm3509_vm6, %v3506_v25 }
 0xd41   :  { %5440 = shalt.err (!%p5437_p4)
}
 0xd42   :  { %3520 = dma.vmem_to_hbm [thread:$0]  %s3518_s20, 32, %s8479_s24, [#allocation4]  }
 0xd43   :  { %5739 = dma.done.wait [#allocation4], 32  }
 0xd44   :  { %5740 = vsyncadd [#allocation4], 4294967264 }
 0xd45   :  { %3524 = vsyncpa [#allocation3], 1 }
 0xd46   :  { %3525 = vsyncpa [#allocation6], 1 }
 0xd47   :  { %3526 = vsyncpa [#allocation9], 1 }
 0xd48   :  { %3527 = vsyncpa [#allocation12], 1 }
 0xd49   :  { %3528 = vsyncpa [#allocation15], 1 }
 0xd4a   :  { %3529 = vsyncpa [#allocation18], 1 }
 0xd4b   :  { %3530 = vsyncpa [#allocation21], 1 }
 0xd4c   :  { %3531 = vsyncpa [#allocation4], 1 }

</bundles_post_ra>
